<compile_context>
chip_gen: v7x
topology: tpu7x:2x2x1
jax: 0.10.0
libtpu: 0.0.40
codegen_flags: <defaults>
</compile_context>

<pallas_src>
import math
import functools

import jax
import jax.numpy as jnp
from jax.experimental import pallas as pl
from jax.experimental.pallas import tpu as pltpu

LN_EPS = 1e-5  # nn.LayerNorm default


# ----------------------------- small math helpers -----------------------------
def _ln(x, g, b):
    # x: (M, D); g/b: (1, D). Biased variance, like nn.LayerNorm.
    mu = jnp.mean(x, axis=-1, keepdims=True)
    var = jnp.mean(jnp.square(x - mu), axis=-1, keepdims=True)
    return (x - mu) * jax.lax.rsqrt(var + LN_EPS) * g + b


def _sigmoid(x):
    return 1.0 / (1.0 + jnp.exp(-x))


def _gelu_exact(x):
    # nn.GELU() default = 0.5*x*(1+erf(x/sqrt(2))).
    # erf via Abramowitz & Stegun 7.1.26 (|abs err| <= 1.5e-7), built from abs/exp/fma
    # which all lower on the TPU VPU/EUP.
    a1, a2, a3, a4, a5 = 0.254829592, -0.284496736, 1.421413741, -1.453152027, 1.061405429
    pp = 0.3275911
    z = x * 0.7071067811865476
    az = jnp.abs(z)
    t = 1.0 / (1.0 + pp * az)
    poly = ((((a5 * t + a4) * t + a3) * t + a2) * t + a1) * t
    erf_abs = 1.0 - poly * jnp.exp(-az * az)
    erf = jnp.where(z >= 0.0, erf_abs, -erf_abs)
    return 0.5 * x * (1.0 + erf)


def _gate(pool_x, pool_r, w1a, w1b, b1, lg, lb, w2, b2):
    # AdaptiveResidualGate.fc on cat([pool_x, pool_r], -1) with the 2C->R weight
    # pre-split into its two C-row halves (no lane concat).
    g = (jnp.dot(pool_x, w1a, preferred_element_type=jnp.float32)
         + jnp.dot(pool_r, w1b, preferred_element_type=jnp.float32) + b1)
    g = _ln(g, lg, lb)
    g = jnp.maximum(g, 0.0)
    g = jnp.dot(g, w2, preferred_element_type=jnp.float32) + b2
    return _sigmoid(g)                                      # (Bb, C)


# ------------------------------- fused kernel ---------------------------------
def block_kernel(x_ref, focal_ref,
                 n1g_ref, n1b_ref,
                 wq_ref, wk_ref, wv_ref, bq_ref, bk_ref, bv_ref, wp_ref, bp_ref,
                 g1w1a_ref, g1w1b_ref, g1b1_ref, g1lg_ref, g1lb_ref, g1w2_ref, g1b2_ref,
                 n2g_ref, n2b_ref,
                 mw1_ref, mb1_ref, mw2_ref, mb2_ref,
                 g2w1a_ref, g2w1b_ref, g2b1_ref, g2lg_ref, g2lb_ref, g2w2_ref, g2b2_ref,
                 n3g_ref, n3b_ref,
                 cw1a_ref, cw1b_ref, cb1_ref, clg_ref, clb_ref, cw2_ref, cb2_ref,
                 o_ref, *, num_heads):
    Bb, N, C = x_ref.shape
    hd = C // num_heads
    scale = 1.0 / math.sqrt(hd)

    x3 = x_ref[...]                                         # (Bb, N, C); residual == x
    x2d = x3.reshape(Bb * N, C)

    # -------- norm1 + FocalResidualAttention ----------------------------------
    nx = _ln(x2d, n1g_ref[...], n1b_ref[...])
    Q = jnp.dot(nx, wq_ref[...], preferred_element_type=jnp.float32) + bq_ref[...]
    K = jnp.dot(nx, wk_ref[...], preferred_element_type=jnp.float32) + bk_ref[...]
    V = jnp.dot(nx, wv_ref[...], preferred_element_type=jnp.float32) + bv_ref[...]
    Q3 = Q.reshape(Bb, N, C)
    K3 = K.reshape(Bb, N, C)
    V3 = V.reshape(Bb, N, C)

    alpha = focal_ref[0, 0]                                 # focal_alpha (scalar, SMEM)
    gamma = focal_ref[0, 1]                                 # focal_gamma (scalar, SMEM)
    wp = wp_ref[...]                                        # (C, C) proj weight (in, out)

    attn_rows = []
    for b in range(Bb):
        acc = jnp.zeros((N, C), jnp.float32)
        for h in range(num_heads):
            sl = slice(h * hd, (h + 1) * hd)
            Qh, Kh, Vh = Q3[b, :, sl], K3[b, :, sl], V3[b, :, sl]
            # q @ k^T without materializing a transpose (contract feature axes).
            s = jax.lax.dot_general(Qh, Kh, (((1,), (1,)), ((), ())),
                                    preferred_element_type=jnp.float32) * scale
            m = jnp.max(s, axis=-1, keepdims=True)
            e = jnp.exp(s - m)
            p = e / jnp.sum(e, axis=-1, keepdims=True)       # softmax
            pf = jnp.exp(gamma * jnp.log(p)) * alpha         # pow(p, gamma) * alpha
            pf = pf / (jnp.sum(pf, axis=-1, keepdims=True) + 1e-6)
            oh = jnp.dot(pf, Vh, preferred_element_type=jnp.float32)     # (N, hd)
            # fold this head through its rows of proj -- no lane-dim concatenate
            acc = acc + jnp.dot(oh, wp[sl, :], preferred_element_type=jnp.float32)
        attn_rows.append(acc)
    attn3 = jnp.stack(attn_rows, axis=0) + bp_ref[...]       # (Bb, N, C)

    # -------- res_gate1 + first gated residual (DropPath = identity) ----------
    pool_r = jnp.mean(x3, axis=1)                            # (Bb, C) pooled residual
    pool_a = jnp.mean(attn3, axis=1)
    rw1 = _gate(pool_a, pool_r,
                g1w1a_ref[...], g1w1b_ref[...], g1b1_ref[...],
                g1lg_ref[...], g1lb_ref[...], g1w2_ref[...], g1b2_ref[...])
    x1 = x3 + attn3 * rw1[:, None, :]

    # -------- norm2 + MLP (GELU; Dropout = identity) + res_gate2 ---------------
    x1_2d = x1.reshape(Bb * N, C)
    nx2 = _ln(x1_2d, n2g_ref[...], n2b_ref[...])
    hmid = jnp.dot(nx2, mw1_ref[...], preferred_element_type=jnp.float32) + mb1_ref[...]
    hmid = _gelu_exact(hmid)
    mlp2d = jnp.dot(hmid, mw2_ref[...], preferred_element_type=jnp.float32) + mb2_ref[...]
    mlp3 = mlp2d.reshape(Bb, N, C)

    pool_m = jnp.mean(mlp3, axis=1)
    rw2 = _gate(pool_m, pool_r,
                g2w1a_ref[...], g2w1b_ref[...], g2b1_ref[...],
                g2lg_ref[...], g2lb_ref[...], g2w2_ref[...], g2b2_ref[...])
    x2 = x1 + mlp3 * rw2[:, None, :]

    # -------- cross gate between x and the original residual -------------------
    x2_2d = x2.reshape(Bb * N, C)
    n3g, n3b = n3g_ref[...], n3b_ref[...]
    n3x = _ln(x2_2d, n3g, n3b)
    n3r = _ln(x2d, n3g, n3b)
    ch = (jnp.dot(n3x, cw1a_ref[...], preferred_element_type=jnp.float32)
          + jnp.dot(n3r, cw1b_ref[...], preferred_element_type=jnp.float32)
          + cb1_ref[...])
    ch = jnp.maximum(_ln(ch, clg_ref[...], clb_ref[...]), 0.0)
    logits = jnp.dot(ch, cw2_ref[...], preferred_element_type=jnp.float32) + cb2_ref[...]
    lm = jnp.max(logits, axis=-1, keepdims=True)
    le = jnp.exp(logits - lm)
    cwt = le / jnp.sum(le, axis=-1, keepdims=True)           # softmax over the 2 gates
    out2d = x2_2d * cwt[:, 0:1] + x2d * cwt[:, 1:2]
    o_ref[...] = out2d.reshape(Bb, N, C)


# --------------------------------- wrapper ------------------------------------
def imbalance_block_pallas(x, p, *, num_heads, batch_block=None):
    B, N, C = x.shape
    assert C % num_heads == 0
    if batch_block is None:
        # keep >=2 grid steps when possible so both v7x TensorCores get work;
        # per-step overhead is negligible at this step count on v5e/v6e.
        batch_block = max(1, B // 2) if B >= 2 else B
    assert B % batch_block == 0
    grid = (B // batch_block,)

    weights = [
        p["n1_g"], p["n1_b"],
        p["wq"], p["wk"], p["wv"], p["bq"], p["bk"], p["bv"], p["wp"], p["bp"],
        p["g1_w1a"], p["g1_w1b"], p["g1_b1"], p["g1_lg"], p["g1_lb"], p["g1_w2"], p["g1_b2"],
        p["n2_g"], p["n2_b"],
        p["m_w1"], p["m_b1"], p["m_w2"], p["m_b2"],
        p["g2_w1a"], p["g2_w1b"], p["g2_b1"], p["g2_lg"], p["g2_lb"], p["g2_w2"], p["g2_b2"],
        p["n3_g"], p["n3_b"],
        p["c_w1a"], p["c_w1b"], p["c_b1"], p["c_lg"], p["c_lb"], p["c_w2"], p["c_b2"],
    ]

    in_specs = (
        [pl.BlockSpec((batch_block, N, C), lambda i: (i, 0, 0)),
         pl.BlockSpec(memory_space=pltpu.MemorySpace.SMEM)]            # focal scalars
        + [pl.BlockSpec(w.shape, lambda i: (0, 0)) for w in weights]   # resident weights
    )

    kern = functools.partial(block_kernel, num_heads=num_heads)
    return pl.pallas_call(
        kern,
        out_shape=jax.ShapeDtypeStruct((B, N, C), jnp.float32),
        grid=grid,
        in_specs=in_specs,
        out_specs=pl.BlockSpec((batch_block, N, C), lambda i: (i, 0, 0)),
        compiler_params=pltpu.CompilerParams(dimension_semantics=("parallel",)),
    )(x, p["focal"], *weights)


# --------------------------- parameter construction ----------------------------
def make_params(key, dim, mlp_ratio=4, reduction=4):
    C = dim
    R = max(C // reduction, 32)          # AdaptiveResidualGate reduced_dim
    H = C * mlp_ratio
    keys = jax.random.split(key, 8)

    def linear(k, fi, fo):               # PyTorch nn.Linear init, stored (in, out)
        kw, kb = jax.random.split(k)
        lim = 1.0 / math.sqrt(fi)
        w = jax.random.uniform(kw, (fi, fo), jnp.float32, -lim, lim)
        b = jax.random.uniform(kb, (1, fo), jnp.float32, -lim, lim)
        return w, b

    ones = lambda n: jnp.ones((1, n), jnp.float32)
    zeros = lambda n: jnp.zeros((1, n), jnp.float32)

    wqkv, bqkv = linear(keys[0], C, 3 * C)        # fused qkv, split columns q|k|v
    wp, bp = linear(keys[1], C, C)

    def gate(k):
        k1, k2 = jax.random.split(k)
        w1, b1 = linear(k1, 2 * C, R)             # split rows: [x_pool | r_pool]
        w2, b2 = linear(k2, R, C)
        return dict(w1a=w1[:C], w1b=w1[C:], b1=b1, lg=ones(R), lb=zeros(R), w2=w2, b2=b2)

    g1, g2 = gate(keys[2]), gate(keys[3])
    mw1, mb1 = linear(keys[4], C, H)
    mw2, mb2 = linear(keys[5], H, C)
    cw1, cb1 = linear(keys[6], 2 * C, C)          # split rows: [norm3(x) | norm3(res)]
    cw2, cb2 = linear(keys[7], C, 2)

    return dict(
        focal=jnp.array([[1.0, 2.0]], jnp.float32),   # [focal_alpha, focal_gamma] init
        n1_g=ones(C), n1_b=zeros(C),
        wq=wqkv[:, 0:C], wk=wqkv[:, C:2 * C], wv=wqkv[:, 2 * C:3 * C],
        bq=bqkv[:, 0:C], bk=bqkv[:, C:2 * C], bv=bqkv[:, 2 * C:3 * C],
        wp=wp, bp=bp,
        g1_w1a=g1["w1a"], g1_w1b=g1["w1b"], g1_b1=g1["b1"],
        g1_lg=g1["lg"], g1_lb=g1["lb"], g1_w2=g1["w2"], g1_b2=g1["b2"],
        n2_g=ones(C), n2_b=zeros(C),
        m_w1=mw1, m_b1=mb1, m_w2=mw2, m_b2=mb2,
        g2_w1a=g2["w1a"], g2_w1b=g2["w1b"], g2_b1=g2["b1"],
        g2_lg=g2["lg"], g2_lb=g2["lb"], g2_w2=g2["w2"], g2_b2=g2["b2"],
        n3_g=ones(C), n3_b=zeros(C),
        c_w1a=cw1[:C], c_w1b=cw1[C:], c_b1=cb1,
        c_lg=ones(C), c_lb=zeros(C), c_w2=cw2, c_b2=cb2,
    )


if __name__ == "__main__":
    dim = 32          # block dimension (hidden)
    num_heads = 4     # dim % num_heads == 0 -> head_dim = 8
    mlp_ratio = 4     # MLP hidden = 128 (lane dense)
    batch = 2
    seq = 8

    key = jax.random.PRNGKey(0)
    kx, kp = jax.random.split(key)
    x = jax.random.normal(kx, (batch, seq, dim), jnp.float32)
    params = make_params(kp, dim, mlp_ratio=mlp_ratio)

    out = imbalance_block_pallas(x, params, num_heads=num_heads)
    out = jax.block_until_ready(out)
    assert out.shape == (batch, seq, dim), out.shape
    assert bool(jnp.all(jnp.isfinite(out)))
    print("KERNEL_OK")
</pallas_src>

<mosaic_0001>
module attributes {stable_mosaic.version = 11 : i64} {
  func.func @block_kernel(%arg0: i32, %arg1: memref<1x8x32xf32, #tpu.memory_space<vmem>>, %arg2: memref<1x2xf32, #tpu.memory_space<smem>>, %arg3: memref<1x32xf32, #tpu.memory_space<vmem>>, %arg4: memref<1x32xf32, #tpu.memory_space<vmem>>, %arg5: memref<32x32xf32, #tpu.memory_space<vmem>>, %arg6: memref<32x32xf32, #tpu.memory_space<vmem>>, %arg7: memref<32x32xf32, #tpu.memory_space<vmem>>, %arg8: memref<1x32xf32, #tpu.memory_space<vmem>>, %arg9: memref<1x32xf32, #tpu.memory_space<vmem>>, %arg10: memref<1x32xf32, #tpu.memory_space<vmem>>, %arg11: memref<32x32xf32, #tpu.memory_space<vmem>>, %arg12: memref<1x32xf32, #tpu.memory_space<vmem>>, %arg13: memref<32x32xf32, #tpu.memory_space<vmem>>, %arg14: memref<32x32xf32, #tpu.memory_space<vmem>>, %arg15: memref<1x32xf32, #tpu.memory_space<vmem>>, %arg16: memref<1x32xf32, #tpu.memory_space<vmem>>, %arg17: memref<1x32xf32, #tpu.memory_space<vmem>>, %arg18: memref<32x32xf32, #tpu.memory_space<vmem>>, %arg19: memref<1x32xf32, #tpu.memory_space<vmem>>, %arg20: memref<1x32xf32, #tpu.memory_space<vmem>>, %arg21: memref<1x32xf32, #tpu.memory_space<vmem>>, %arg22: memref<32x128xf32, #tpu.memory_space<vmem>>, %arg23: memref<1x128xf32, #tpu.memory_space<vmem>>, %arg24: memref<128x32xf32, #tpu.memory_space<vmem>>, %arg25: memref<1x32xf32, #tpu.memory_space<vmem>>, %arg26: memref<32x32xf32, #tpu.memory_space<vmem>>, %arg27: memref<32x32xf32, #tpu.memory_space<vmem>>, %arg28: memref<1x32xf32, #tpu.memory_space<vmem>>, %arg29: memref<1x32xf32, #tpu.memory_space<vmem>>, %arg30: memref<1x32xf32, #tpu.memory_space<vmem>>, %arg31: memref<32x32xf32, #tpu.memory_space<vmem>>, %arg32: memref<1x32xf32, #tpu.memory_space<vmem>>, %arg33: memref<1x32xf32, #tpu.memory_space<vmem>>, %arg34: memref<1x32xf32, #tpu.memory_space<vmem>>, %arg35: memref<32x32xf32, #tpu.memory_space<vmem>>, %arg36: memref<32x32xf32, #tpu.memory_space<vmem>>, %arg37: memref<1x32xf32, #tpu.memory_space<vmem>>, %arg38: memref<1x32xf32, #tpu.memory_space<vmem>>, %arg39: memref<1x32xf32, #tpu.memory_space<vmem>>, %arg40: memref<32x2xf32, #tpu.memory_space<vmem>>, %arg41: memref<1x2xf32, #tpu.memory_space<vmem>>, %arg42: memref<1x8x32xf32, #tpu.memory_space<vmem>>) attributes {dimension_semantics = [#tpu.dimension_semantics<parallel>], iteration_bounds = array<i64: 2>, scalar_prefetch = 0 : i64, scratch_operands = 0 : i64, tpu.core_type = #tpu.core_type<tc>, window_params = [{transform_indices = @transform_0, window_bounds = array<i64: 1, 8, 32>}, {transform_indices = @transform_1, window_bounds = array<i64: 1, 2>}, {pipeline_mode = #tpu.pipeline_mode<synchronous>, transform_indices = @transform_2, window_bounds = array<i64: 1, 32>}, {pipeline_mode = #tpu.pipeline_mode<synchronous>, transform_indices = @transform_3, window_bounds = array<i64: 1, 32>}, {pipeline_mode = #tpu.pipeline_mode<synchronous>, transform_indices = @transform_4, window_bounds = array<i64: 32, 32>}, {pipeline_mode = #tpu.pipeline_mode<synchronous>, transform_indices = @transform_5, window_bounds = array<i64: 32, 32>}, {pipeline_mode = #tpu.pipeline_mode<synchronous>, transform_indices = @transform_6, window_bounds = array<i64: 32, 32>}, {pipeline_mode = #tpu.pipeline_mode<synchronous>, transform_indices = @transform_7, window_bounds = array<i64: 1, 32>}, {pipeline_mode = #tpu.pipeline_mode<synchronous>, transform_indices = @transform_8, window_bounds = array<i64: 1, 32>}, {pipeline_mode = #tpu.pipeline_mode<synchronous>, transform_indices = @transform_9, window_bounds = array<i64: 1, 32>}, {pipeline_mode = #tpu.pipeline_mode<synchronous>, transform_indices = @transform_10, window_bounds = array<i64: 32, 32>}, {pipeline_mode = #tpu.pipeline_mode<synchronous>, transform_indices = @transform_11, window_bounds = array<i64: 1, 32>}, {pipeline_mode = #tpu.pipeline_mode<synchronous>, transform_indices = @transform_12, window_bounds = array<i64: 32, 32>}, {pipeline_mode = #tpu.pipeline_mode<synchronous>, transform_indices = @transform_13, window_bounds = array<i64: 32, 32>}, {pipeline_mode = #tpu.pipeline_mode<synchronous>, transform_indices = @transform_14, window_bounds = array<i64: 1, 32>}, {pipeline_mode = #tpu.pipeline_mode<synchronous>, transform_indices = @transform_15, window_bounds = array<i64: 1, 32>}, {pipeline_mode = #tpu.pipeline_mode<synchronous>, transform_indices = @transform_16, window_bounds = array<i64: 1, 32>}, {pipeline_mode = #tpu.pipeline_mode<synchronous>, transform_indices = @transform_17, window_bounds = array<i64: 32, 32>}, {pipeline_mode = #tpu.pipeline_mode<synchronous>, transform_indices = @transform_18, window_bounds = array<i64: 1, 32>}, {pipeline_mode = #tpu.pipeline_mode<synchronous>, transform_indices = @transform_19, window_bounds = array<i64: 1, 32>}, {pipeline_mode = #tpu.pipeline_mode<synchronous>, transform_indices = @transform_20, window_bounds = array<i64: 1, 32>}, {pipeline_mode = #tpu.pipeline_mode<synchronous>, transform_indices = @transform_21, window_bounds = array<i64: 32, 128>}, {pipeline_mode = #tpu.pipeline_mode<synchronous>, transform_indices = @transform_22, window_bounds = array<i64: 1, 128>}, {pipeline_mode = #tpu.pipeline_mode<synchronous>, transform_indices = @transform_23, window_bounds = array<i64: 128, 32>}, {pipeline_mode = #tpu.pipeline_mode<synchronous>, transform_indices = @transform_24, window_bounds = array<i64: 1, 32>}, {pipeline_mode = #tpu.pipeline_mode<synchronous>, transform_indices = @transform_25, window_bounds = array<i64: 32, 32>}, {pipeline_mode = #tpu.pipeline_mode<synchronous>, transform_indices = @transform_26, window_bounds = array<i64: 32, 32>}, {pipeline_mode = #tpu.pipeline_mode<synchronous>, transform_indices = @transform_27, window_bounds = array<i64: 1, 32>}, {pipeline_mode = #tpu.pipeline_mode<synchronous>, transform_indices = @transform_28, window_bounds = array<i64: 1, 32>}, {pipeline_mode = #tpu.pipeline_mode<synchronous>, transform_indices = @transform_29, window_bounds = array<i64: 1, 32>}, {pipeline_mode = #tpu.pipeline_mode<synchronous>, transform_indices = @transform_30, window_bounds = array<i64: 32, 32>}, {pipeline_mode = #tpu.pipeline_mode<synchronous>, transform_indices = @transform_31, window_bounds = array<i64: 1, 32>}, {pipeline_mode = #tpu.pipeline_mode<synchronous>, transform_indices = @transform_32, window_bounds = array<i64: 1, 32>}, {pipeline_mode = #tpu.pipeline_mode<synchronous>, transform_indices = @transform_33, window_bounds = array<i64: 1, 32>}, {pipeline_mode = #tpu.pipeline_mode<synchronous>, transform_indices = @transform_34, window_bounds = array<i64: 32, 32>}, {pipeline_mode = #tpu.pipeline_mode<synchronous>, transform_indices = @transform_35, window_bounds = array<i64: 32, 32>}, {pipeline_mode = #tpu.pipeline_mode<synchronous>, transform_indices = @transform_36, window_bounds = array<i64: 1, 32>}, {pipeline_mode = #tpu.pipeline_mode<synchronous>, transform_indices = @transform_37, window_bounds = array<i64: 1, 32>}, {pipeline_mode = #tpu.pipeline_mode<synchronous>, transform_indices = @transform_38, window_bounds = array<i64: 1, 32>}, {pipeline_mode = #tpu.pipeline_mode<synchronous>, transform_indices = @transform_39, window_bounds = array<i64: 32, 2>}, {pipeline_mode = #tpu.pipeline_mode<synchronous>, transform_indices = @transform_40, window_bounds = array<i64: 1, 2>}, {transform_indices = @transform_41, window_bounds = array<i64: 1, 8, 32>}]} {
    %c0 = arith.constant 0 : index
    %c0_0 = arith.constant 0 : index
    %c0_1 = arith.constant 0 : index
    %0 = vector.load %arg1[%c0, %c0_0, %c0_1] : memref<1x8x32xf32, #tpu.memory_space<vmem>>, vector<1x8x32xf32>
    %1 = vector.shape_cast %0 : vector<1x8x32xf32> to vector<8x32xf32>
    %c0_2 = arith.constant 0 : index
    %c0_3 = arith.constant 0 : index
    %2 = vector.load %arg3[%c0_2, %c0_3] : memref<1x32xf32, #tpu.memory_space<vmem>>, vector<1x32xf32>
    %c0_4 = arith.constant 0 : index
    %c0_5 = arith.constant 0 : index
    %3 = vector.load %arg4[%c0_4, %c0_5] : memref<1x32xf32, #tpu.memory_space<vmem>>, vector<1x32xf32>
    %cst = arith.constant dense<0.000000e+00> : vector<8xf32>
    %4 = vector.multi_reduction <add>, %1, %cst [1] : vector<8x32xf32> to vector<8xf32>
    %5 = vector.shape_cast %4 : vector<8xf32> to vector<8x1xf32>
    %cst_6 = arith.constant 3.200000e+01 : f32
    %6 = vector.broadcast %cst_6 : f32 to vector<8x1xf32>
    %7 = arith.divf %5, %6 : vector<8x1xf32>
    %8 = vector.broadcast %7 : vector<8x1xf32> to vector<8x32xf32>
    %9 = arith.subf %1, %8 : vector<8x32xf32>
    %10 = arith.mulf %9, %9 : vector<8x32xf32>
    %cst_7 = arith.constant dense<0.000000e+00> : vector<8xf32>
    %11 = vector.multi_reduction <add>, %10, %cst_7 [1] : vector<8x32xf32> to vector<8xf32>
    %12 = vector.shape_cast %11 : vector<8xf32> to vector<8x1xf32>
    %cst_8 = arith.constant 3.200000e+01 : f32
    %13 = vector.broadcast %cst_8 : f32 to vector<8x1xf32>
    %14 = arith.divf %12, %13 : vector<8x1xf32>
    %15 = vector.broadcast %7 : vector<8x1xf32> to vector<8x32xf32>
    %16 = arith.subf %1, %15 : vector<8x32xf32>
    %cst_9 = arith.constant 9.99999974E-6 : f32
    %17 = vector.broadcast %cst_9 : f32 to vector<8x1xf32>
    %18 = arith.addf %14, %17 : vector<8x1xf32>
    %19 = math.rsqrt %18 : vector<8x1xf32>
    %20 = vector.broadcast %19 : vector<8x1xf32> to vector<8x32xf32>
    %21 = arith.mulf %16, %20 : vector<8x32xf32>
    %22 = vector.broadcast %2 : vector<1x32xf32> to vector<8x32xf32>
    %23 = arith.mulf %21, %22 : vector<8x32xf32>
    %24 = vector.broadcast %3 : vector<1x32xf32> to vector<8x32xf32>
    %25 = arith.addf %23, %24 : vector<8x32xf32>
    %c0_10 = arith.constant 0 : index
    %c0_11 = arith.constant 0 : index
    %26 = vector.load %arg5[%c0_10, %c0_11] : memref<32x32xf32, #tpu.memory_space<vmem>>, vector<32x32xf32>
    %cst_12 = arith.constant dense<0.000000e+00> : vector<8x32xf32>
    %27 = tpu.matmul %25, %26, %cst_12 {dimension_numbers = #tpu.dot_dimension_numbers<[1], [0], [0], [1], [0, 0, 1, 1], [], []>} : vector<8x32xf32>, vector<32x32xf32>, vector<8x32xf32> -> vector<8x32xf32>
    %c0_13 = arith.constant 0 : index
    %c0_14 = arith.constant 0 : index
    %28 = vector.load %arg8[%c0_13, %c0_14] : memref<1x32xf32, #tpu.memory_space<vmem>>, vector<1x32xf32>
    %29 = vector.broadcast %28 : vector<1x32xf32> to vector<8x32xf32>
    %30 = arith.addf %27, %29 : vector<8x32xf32>
    %c0_15 = arith.constant 0 : index
    %c0_16 = arith.constant 0 : index
    %31 = vector.load %arg6[%c0_15, %c0_16] : memref<32x32xf32, #tpu.memory_space<vmem>>, vector<32x32xf32>
    %cst_17 = arith.constant dense<0.000000e+00> : vector<8x32xf32>
    %32 = tpu.matmul %25, %31, %cst_17 {dimension_numbers = #tpu.dot_dimension_numbers<[1], [0], [0], [1], [0, 0, 1, 1], [], []>} : vector<8x32xf32>, vector<32x32xf32>, vector<8x32xf32> -> vector<8x32xf32>
    %c0_18 = arith.constant 0 : index
    %c0_19 = arith.constant 0 : index
    %33 = vector.load %arg9[%c0_18, %c0_19] : memref<1x32xf32, #tpu.memory_space<vmem>>, vector<1x32xf32>
    %34 = vector.broadcast %33 : vector<1x32xf32> to vector<8x32xf32>
    %35 = arith.addf %32, %34 : vector<8x32xf32>
    %c0_20 = arith.constant 0 : index
    %c0_21 = arith.constant 0 : index
    %36 = vector.load %arg7[%c0_20, %c0_21] : memref<32x32xf32, #tpu.memory_space<vmem>>, vector<32x32xf32>
    %cst_22 = arith.constant dense<0.000000e+00> : vector<8x32xf32>
    %37 = tpu.matmul %25, %36, %cst_22 {dimension_numbers = #tpu.dot_dimension_numbers<[1], [0], [0], [1], [0, 0, 1, 1], [], []>} : vector<8x32xf32>, vector<32x32xf32>, vector<8x32xf32> -> vector<8x32xf32>
    %c0_23 = arith.constant 0 : index
    %c0_24 = arith.constant 0 : index
    %38 = vector.load %arg10[%c0_23, %c0_24] : memref<1x32xf32, #tpu.memory_space<vmem>>, vector<1x32xf32>
    %39 = vector.broadcast %38 : vector<1x32xf32> to vector<8x32xf32>
    %40 = arith.addf %37, %39 : vector<8x32xf32>
    %41 = vector.shape_cast %30 : vector<8x32xf32> to vector<1x8x32xf32>
    %42 = vector.shape_cast %35 : vector<8x32xf32> to vector<1x8x32xf32>
    %43 = vector.shape_cast %40 : vector<8x32xf32> to vector<1x8x32xf32>
    %c0_25 = arith.constant 0 : index
    %c0_26 = arith.constant 0 : index
    %44 = memref.load %arg2[%c0_25, %c0_26] : memref<1x2xf32, #tpu.memory_space<smem>>
    %c0_27 = arith.constant 0 : index
    %c1 = arith.constant 1 : index
    %45 = memref.load %arg2[%c0_27, %c1] : memref<1x2xf32, #tpu.memory_space<smem>>
    %c0_28 = arith.constant 0 : index
    %c0_29 = arith.constant 0 : index
    %46 = vector.load %arg11[%c0_28, %c0_29] : memref<32x32xf32, #tpu.memory_space<vmem>>, vector<32x32xf32>
    %cst_30 = arith.constant 0.000000e+00 : f32
    %47 = vector.broadcast %cst_30 : f32 to vector<8x32xf32>
    %48 = vector.extract_strided_slice %41 {offsets = [0, 0, 0], sizes = [1, 8, 8], strides = [1, 1, 1]} : vector<1x8x32xf32> to vector<1x8x8xf32>
    %49 = vector.shape_cast %48 : vector<1x8x8xf32> to vector<8x8xf32>
    %50 = vector.extract_strided_slice %42 {offsets = [0, 0, 0], sizes = [1, 8, 8], strides = [1, 1, 1]} : vector<1x8x32xf32> to vector<1x8x8xf32>
    %51 = vector.shape_cast %50 : vector<1x8x8xf32> to vector<8x8xf32>
    %52 = vector.extract_strided_slice %43 {offsets = [0, 0, 0], sizes = [1, 8, 8], strides = [1, 1, 1]} : vector<1x8x32xf32> to vector<1x8x8xf32>
    %53 = vector.shape_cast %52 : vector<1x8x8xf32> to vector<8x8xf32>
    %cst_31 = arith.constant dense<0.000000e+00> : vector<8x8xf32>
    %54 = tpu.matmul %49, %51, %cst_31 {dimension_numbers = #tpu.dot_dimension_numbers<[1], [1], [0], [0], [0, 0, 1, 0], [], []>} : vector<8x8xf32>, vector<8x8xf32>, vector<8x8xf32> -> vector<8x8xf32>
    %cst_32 = arith.constant 0.353553385 : f32
    %55 = vector.broadcast %cst_32 : f32 to vector<8x8xf32>
    %56 = arith.mulf %54, %55 : vector<8x8xf32>
    %cst_33 = arith.constant dense<0xFF800000> : vector<8xf32>
    %57 = vector.multi_reduction <maximumf>, %56, %cst_33 [1] : vector<8x8xf32> to vector<8xf32>
    %58 = vector.shape_cast %57 : vector<8xf32> to vector<8x1xf32>
    %59 = vector.broadcast %58 : vector<8x1xf32> to vector<8x8xf32>
    %60 = arith.subf %56, %59 : vector<8x8xf32>
    %61 = math.exp %60 : vector<8x8xf32>
    %cst_34 = arith.constant dense<0.000000e+00> : vector<8xf32>
    %62 = vector.multi_reduction <add>, %61, %cst_34 [1] : vector<8x8xf32> to vector<8xf32>
    %63 = vector.shape_cast %62 : vector<8xf32> to vector<8x1xf32>
    %64 = vector.broadcast %63 : vector<8x1xf32> to vector<8x8xf32>
    %65 = arith.divf %61, %64 : vector<8x8xf32>
    %66 = math.log %65 : vector<8x8xf32>
    %67 = vector.broadcast %45 : f32 to vector<8x8xf32>
    %68 = arith.mulf %67, %66 : vector<8x8xf32>
    %69 = math.exp %68 : vector<8x8xf32>
    %70 = vector.broadcast %44 : f32 to vector<8x8xf32>
    %71 = arith.mulf %69, %70 : vector<8x8xf32>
    %cst_35 = arith.constant dense<0.000000e+00> : vector<8xf32>
    %72 = vector.multi_reduction <add>, %71, %cst_35 [1] : vector<8x8xf32> to vector<8xf32>
    %73 = vector.shape_cast %72 : vector<8xf32> to vector<8x1xf32>
    %cst_36 = arith.constant 9.99999997E-7 : f32
    %74 = vector.broadcast %cst_36 : f32 to vector<8x1xf32>
    %75 = arith.addf %73, %74 : vector<8x1xf32>
    %76 = vector.broadcast %75 : vector<8x1xf32> to vector<8x8xf32>
    %77 = arith.divf %71, %76 : vector<8x8xf32>
    %cst_37 = arith.constant dense<0.000000e+00> : vector<8x8xf32>
    %78 = tpu.matmul %77, %53, %cst_37 {dimension_numbers = #tpu.dot_dimension_numbers<[1], [0], [0], [1], [0, 0, 1, 1], [], []>} : vector<8x8xf32>, vector<8x8xf32>, vector<8x8xf32> -> vector<8x8xf32>
    %79 = vector.extract_strided_slice %46 {offsets = [0, 0], sizes = [8, 32], strides = [1, 1]} : vector<32x32xf32> to vector<8x32xf32>
    %cst_38 = arith.constant dense<0.000000e+00> : vector<8x32xf32>
    %80 = tpu.matmul %78, %79, %cst_38 {dimension_numbers = #tpu.dot_dimension_numbers<[1], [0], [0], [1], [0, 0, 1, 1], [], []>} : vector<8x8xf32>, vector<8x32xf32>, vector<8x32xf32> -> vector<8x32xf32>
    %81 = arith.addf %47, %80 : vector<8x32xf32>
    %82 = vector.extract_strided_slice %41 {offsets = [0, 0, 8], sizes = [1, 8, 8], strides = [1, 1, 1]} : vector<1x8x32xf32> to vector<1x8x8xf32>
    %83 = vector.shape_cast %82 : vector<1x8x8xf32> to vector<8x8xf32>
    %84 = vector.extract_strided_slice %42 {offsets = [0, 0, 8], sizes = [1, 8, 8], strides = [1, 1, 1]} : vector<1x8x32xf32> to vector<1x8x8xf32>
    %85 = vector.shape_cast %84 : vector<1x8x8xf32> to vector<8x8xf32>
    %86 = vector.extract_strided_slice %43 {offsets = [0, 0, 8], sizes = [1, 8, 8], strides = [1, 1, 1]} : vector<1x8x32xf32> to vector<1x8x8xf32>
    %87 = vector.shape_cast %86 : vector<1x8x8xf32> to vector<8x8xf32>
    %cst_39 = arith.constant dense<0.000000e+00> : vector<8x8xf32>
    %88 = tpu.matmul %83, %85, %cst_39 {dimension_numbers = #tpu.dot_dimension_numbers<[1], [1], [0], [0], [0, 0, 1, 0], [], []>} : vector<8x8xf32>, vector<8x8xf32>, vector<8x8xf32> -> vector<8x8xf32>
    %cst_40 = arith.constant 0.353553385 : f32
    %89 = vector.broadcast %cst_40 : f32 to vector<8x8xf32>
    %90 = arith.mulf %88, %89 : vector<8x8xf32>
    %cst_41 = arith.constant dense<0xFF800000> : vector<8xf32>
    %91 = vector.multi_reduction <maximumf>, %90, %cst_41 [1] : vector<8x8xf32> to vector<8xf32>
    %92 = vector.shape_cast %91 : vector<8xf32> to vector<8x1xf32>
    %93 = vector.broadcast %92 : vector<8x1xf32> to vector<8x8xf32>
    %94 = arith.subf %90, %93 : vector<8x8xf32>
    %95 = math.exp %94 : vector<8x8xf32>
    %cst_42 = arith.constant dense<0.000000e+00> : vector<8xf32>
    %96 = vector.multi_reduction <add>, %95, %cst_42 [1] : vector<8x8xf32> to vector<8xf32>
    %97 = vector.shape_cast %96 : vector<8xf32> to vector<8x1xf32>
    %98 = vector.broadcast %97 : vector<8x1xf32> to vector<8x8xf32>
    %99 = arith.divf %95, %98 : vector<8x8xf32>
    %100 = math.log %99 : vector<8x8xf32>
    %101 = vector.broadcast %45 : f32 to vector<8x8xf32>
    %102 = arith.mulf %101, %100 : vector<8x8xf32>
    %103 = math.exp %102 : vector<8x8xf32>
    %104 = vector.broadcast %44 : f32 to vector<8x8xf32>
    %105 = arith.mulf %103, %104 : vector<8x8xf32>
    %cst_43 = arith.constant dense<0.000000e+00> : vector<8xf32>
    %106 = vector.multi_reduction <add>, %105, %cst_43 [1] : vector<8x8xf32> to vector<8xf32>
    %107 = vector.shape_cast %106 : vector<8xf32> to vector<8x1xf32>
    %cst_44 = arith.constant 9.99999997E-7 : f32
    %108 = vector.broadcast %cst_44 : f32 to vector<8x1xf32>
    %109 = arith.addf %107, %108 : vector<8x1xf32>
    %110 = vector.broadcast %109 : vector<8x1xf32> to vector<8x8xf32>
    %111 = arith.divf %105, %110 : vector<8x8xf32>
    %cst_45 = arith.constant dense<0.000000e+00> : vector<8x8xf32>
    %112 = tpu.matmul %111, %87, %cst_45 {dimension_numbers = #tpu.dot_dimension_numbers<[1], [0], [0], [1], [0, 0, 1, 1], [], []>} : vector<8x8xf32>, vector<8x8xf32>, vector<8x8xf32> -> vector<8x8xf32>
    %113 = vector.extract_strided_slice %46 {offsets = [8, 0], sizes = [8, 32], strides = [1, 1]} : vector<32x32xf32> to vector<8x32xf32>
    %cst_46 = arith.constant dense<0.000000e+00> : vector<8x32xf32>
    %114 = tpu.matmul %112, %113, %cst_46 {dimension_numbers = #tpu.dot_dimension_numbers<[1], [0], [0], [1], [0, 0, 1, 1], [], []>} : vector<8x8xf32>, vector<8x32xf32>, vector<8x32xf32> -> vector<8x32xf32>
    %115 = arith.addf %81, %114 : vector<8x32xf32>
    %116 = vector.extract_strided_slice %41 {offsets = [0, 0, 16], sizes = [1, 8, 8], strides = [1, 1, 1]} : vector<1x8x32xf32> to vector<1x8x8xf32>
    %117 = vector.shape_cast %116 : vector<1x8x8xf32> to vector<8x8xf32>
    %118 = vector.extract_strided_slice %42 {offsets = [0, 0, 16], sizes = [1, 8, 8], strides = [1, 1, 1]} : vector<1x8x32xf32> to vector<1x8x8xf32>
    %119 = vector.shape_cast %118 : vector<1x8x8xf32> to vector<8x8xf32>
    %120 = vector.extract_strided_slice %43 {offsets = [0, 0, 16], sizes = [1, 8, 8], strides = [1, 1, 1]} : vector<1x8x32xf32> to vector<1x8x8xf32>
    %121 = vector.shape_cast %120 : vector<1x8x8xf32> to vector<8x8xf32>
    %cst_47 = arith.constant dense<0.000000e+00> : vector<8x8xf32>
    %122 = tpu.matmul %117, %119, %cst_47 {dimension_numbers = #tpu.dot_dimension_numbers<[1], [1], [0], [0], [0, 0, 1, 0], [], []>} : vector<8x8xf32>, vector<8x8xf32>, vector<8x8xf32> -> vector<8x8xf32>
    %cst_48 = arith.constant 0.353553385 : f32
    %123 = vector.broadcast %cst_48 : f32 to vector<8x8xf32>
    %124 = arith.mulf %122, %123 : vector<8x8xf32>
    %cst_49 = arith.constant dense<0xFF800000> : vector<8xf32>
    %125 = vector.multi_reduction <maximumf>, %124, %cst_49 [1] : vector<8x8xf32> to vector<8xf32>
    %126 = vector.shape_cast %125 : vector<8xf32> to vector<8x1xf32>
    %127 = vector.broadcast %126 : vector<8x1xf32> to vector<8x8xf32>
    %128 = arith.subf %124, %127 : vector<8x8xf32>
    %129 = math.exp %128 : vector<8x8xf32>
    %cst_50 = arith.constant dense<0.000000e+00> : vector<8xf32>
    %130 = vector.multi_reduction <add>, %129, %cst_50 [1] : vector<8x8xf32> to vector<8xf32>
    %131 = vector.shape_cast %130 : vector<8xf32> to vector<8x1xf32>
    %132 = vector.broadcast %131 : vector<8x1xf32> to vector<8x8xf32>
    %133 = arith.divf %129, %132 : vector<8x8xf32>
    %134 = math.log %133 : vector<8x8xf32>
    %135 = vector.broadcast %45 : f32 to vector<8x8xf32>
    %136 = arith.mulf %135, %134 : vector<8x8xf32>
    %137 = math.exp %136 : vector<8x8xf32>
    %138 = vector.broadcast %44 : f32 to vector<8x8xf32>
    %139 = arith.mulf %137, %138 : vector<8x8xf32>
    %cst_51 = arith.constant dense<0.000000e+00> : vector<8xf32>
    %140 = vector.multi_reduction <add>, %139, %cst_51 [1] : vector<8x8xf32> to vector<8xf32>
    %141 = vector.shape_cast %140 : vector<8xf32> to vector<8x1xf32>
    %cst_52 = arith.constant 9.99999997E-7 : f32
    %142 = vector.broadcast %cst_52 : f32 to vector<8x1xf32>
    %143 = arith.addf %141, %142 : vector<8x1xf32>
    %144 = vector.broadcast %143 : vector<8x1xf32> to vector<8x8xf32>
    %145 = arith.divf %139, %144 : vector<8x8xf32>
    %cst_53 = arith.constant dense<0.000000e+00> : vector<8x8xf32>
    %146 = tpu.matmul %145, %121, %cst_53 {dimension_numbers = #tpu.dot_dimension_numbers<[1], [0], [0], [1], [0, 0, 1, 1], [], []>} : vector<8x8xf32>, vector<8x8xf32>, vector<8x8xf32> -> vector<8x8xf32>
    %147 = vector.extract_strided_slice %46 {offsets = [16, 0], sizes = [8, 32], strides = [1, 1]} : vector<32x32xf32> to vector<8x32xf32>
    %cst_54 = arith.constant dense<0.000000e+00> : vector<8x32xf32>
    %148 = tpu.matmul %146, %147, %cst_54 {dimension_numbers = #tpu.dot_dimension_numbers<[1], [0], [0], [1], [0, 0, 1, 1], [], []>} : vector<8x8xf32>, vector<8x32xf32>, vector<8x32xf32> -> vector<8x32xf32>
    %149 = arith.addf %115, %148 : vector<8x32xf32>
    %150 = vector.extract_strided_slice %41 {offsets = [0, 0, 24], sizes = [1, 8, 8], strides = [1, 1, 1]} : vector<1x8x32xf32> to vector<1x8x8xf32>
    %151 = vector.shape_cast %150 : vector<1x8x8xf32> to vector<8x8xf32>
    %152 = vector.extract_strided_slice %42 {offsets = [0, 0, 24], sizes = [1, 8, 8], strides = [1, 1, 1]} : vector<1x8x32xf32> to vector<1x8x8xf32>
    %153 = vector.shape_cast %152 : vector<1x8x8xf32> to vector<8x8xf32>
    %154 = vector.extract_strided_slice %43 {offsets = [0, 0, 24], sizes = [1, 8, 8], strides = [1, 1, 1]} : vector<1x8x32xf32> to vector<1x8x8xf32>
    %155 = vector.shape_cast %154 : vector<1x8x8xf32> to vector<8x8xf32>
    %cst_55 = arith.constant dense<0.000000e+00> : vector<8x8xf32>
    %156 = tpu.matmul %151, %153, %cst_55 {dimension_numbers = #tpu.dot_dimension_numbers<[1], [1], [0], [0], [0, 0, 1, 0], [], []>} : vector<8x8xf32>, vector<8x8xf32>, vector<8x8xf32> -> vector<8x8xf32>
    %cst_56 = arith.constant 0.353553385 : f32
    %157 = vector.broadcast %cst_56 : f32 to vector<8x8xf32>
    %158 = arith.mulf %156, %157 : vector<8x8xf32>
    %cst_57 = arith.constant dense<0xFF800000> : vector<8xf32>
    %159 = vector.multi_reduction <maximumf>, %158, %cst_57 [1] : vector<8x8xf32> to vector<8xf32>
    %160 = vector.shape_cast %159 : vector<8xf32> to vector<8x1xf32>
    %161 = vector.broadcast %160 : vector<8x1xf32> to vector<8x8xf32>
    %162 = arith.subf %158, %161 : vector<8x8xf32>
    %163 = math.exp %162 : vector<8x8xf32>
    %cst_58 = arith.constant dense<0.000000e+00> : vector<8xf32>
    %164 = vector.multi_reduction <add>, %163, %cst_58 [1] : vector<8x8xf32> to vector<8xf32>
    %165 = vector.shape_cast %164 : vector<8xf32> to vector<8x1xf32>
    %166 = vector.broadcast %165 : vector<8x1xf32> to vector<8x8xf32>
    %167 = arith.divf %163, %166 : vector<8x8xf32>
    %168 = math.log %167 : vector<8x8xf32>
    %169 = vector.broadcast %45 : f32 to vector<8x8xf32>
    %170 = arith.mulf %169, %168 : vector<8x8xf32>
    %171 = math.exp %170 : vector<8x8xf32>
    %172 = vector.broadcast %44 : f32 to vector<8x8xf32>
    %173 = arith.mulf %171, %172 : vector<8x8xf32>
    %cst_59 = arith.constant dense<0.000000e+00> : vector<8xf32>
    %174 = vector.multi_reduction <add>, %173, %cst_59 [1] : vector<8x8xf32> to vector<8xf32>
    %175 = vector.shape_cast %174 : vector<8xf32> to vector<8x1xf32>
    %cst_60 = arith.constant 9.99999997E-7 : f32
    %176 = vector.broadcast %cst_60 : f32 to vector<8x1xf32>
    %177 = arith.addf %175, %176 : vector<8x1xf32>
    %178 = vector.broadcast %177 : vector<8x1xf32> to vector<8x8xf32>
    %179 = arith.divf %173, %178 : vector<8x8xf32>
    %cst_61 = arith.constant dense<0.000000e+00> : vector<8x8xf32>
    %180 = tpu.matmul %179, %155, %cst_61 {dimension_numbers = #tpu.dot_dimension_numbers<[1], [0], [0], [1], [0, 0, 1, 1], [], []>} : vector<8x8xf32>, vector<8x8xf32>, vector<8x8xf32> -> vector<8x8xf32>
    %181 = vector.extract_strided_slice %46 {offsets = [24, 0], sizes = [8, 32], strides = [1, 1]} : vector<32x32xf32> to vector<8x32xf32>
    %cst_62 = arith.constant dense<0.000000e+00> : vector<8x32xf32>
    %182 = tpu.matmul %180, %181, %cst_62 {dimension_numbers = #tpu.dot_dimension_numbers<[1], [0], [0], [1], [0, 0, 1, 1], [], []>} : vector<8x8xf32>, vector<8x32xf32>, vector<8x32xf32> -> vector<8x32xf32>
    %183 = arith.addf %149, %182 : vector<8x32xf32>
    %184 = vector.shape_cast %183 : vector<8x32xf32> to vector<1x8x32xf32>
    %c0_63 = arith.constant 0 : index
    %c0_64 = arith.constant 0 : index
    %185 = vector.load %arg12[%c0_63, %c0_64] : memref<1x32xf32, #tpu.memory_space<vmem>>, vector<1x32xf32>
    %186 = vector.shape_cast %185 : vector<1x32xf32> to vector<1x1x32xf32>
    %187 = vector.broadcast %186 : vector<1x1x32xf32> to vector<1x8x32xf32>
    %188 = arith.addf %184, %187 : vector<1x8x32xf32>
    %cst_65 = arith.constant dense<0.000000e+00> : vector<1x32xf32>
    %189 = vector.multi_reduction <add>, %0, %cst_65 [1] : vector<1x8x32xf32> to vector<1x32xf32>
    %cst_66 = arith.constant 8.000000e+00 : f32
    %190 = vector.broadcast %cst_66 : f32 to vector<1x32xf32>
    %191 = arith.divf %189, %190 : vector<1x32xf32>
    %cst_67 = arith.constant dense<0.000000e+00> : vector<1x32xf32>
    %192 = vector.multi_reduction <add>, %188, %cst_67 [1] : vector<1x8x32xf32> to vector<1x32xf32>
    %cst_68 = arith.constant 8.000000e+00 : f32
    %193 = vector.broadcast %cst_68 : f32 to vector<1x32xf32>
    %194 = arith.divf %192, %193 : vector<1x32xf32>
    %c0_69 = arith.constant 0 : index
    %c0_70 = arith.constant 0 : index
    %195 = vector.load %arg13[%c0_69, %c0_70] : memref<32x32xf32, #tpu.memory_space<vmem>>, vector<32x32xf32>
    %c0_71 = arith.constant 0 : index
    %c0_72 = arith.constant 0 : index
    %196 = vector.load %arg14[%c0_71, %c0_72] : memref<32x32xf32, #tpu.memory_space<vmem>>, vector<32x32xf32>
    %c0_73 = arith.constant 0 : index
    %c0_74 = arith.constant 0 : index
    %197 = vector.load %arg15[%c0_73, %c0_74] : memref<1x32xf32, #tpu.memory_space<vmem>>, vector<1x32xf32>
    %c0_75 = arith.constant 0 : index
    %c0_76 = arith.constant 0 : index
    %198 = vector.load %arg16[%c0_75, %c0_76] : memref<1x32xf32, #tpu.memory_space<vmem>>, vector<1x32xf32>
    %c0_77 = arith.constant 0 : index
    %c0_78 = arith.constant 0 : index
    %199 = vector.load %arg17[%c0_77, %c0_78] : memref<1x32xf32, #tpu.memory_space<vmem>>, vector<1x32xf32>
    %c0_79 = arith.constant 0 : index
    %c0_80 = arith.constant 0 : index
    %200 = vector.load %arg18[%c0_79, %c0_80] : memref<32x32xf32, #tpu.memory_space<vmem>>, vector<32x32xf32>
    %c0_81 = arith.constant 0 : index
    %c0_82 = arith.constant 0 : index
    %201 = vector.load %arg19[%c0_81, %c0_82] : memref<1x32xf32, #tpu.memory_space<vmem>>, vector<1x32xf32>
    %cst_83 = arith.constant dense<0.000000e+00> : vector<1x32xf32>
    %202 = tpu.matmul %194, %195, %cst_83 {dimension_numbers = #tpu.dot_dimension_numbers<[1], [0], [0], [1], [0, 0, 1, 1], [], []>} : vector<1x32xf32>, vector<32x32xf32>, vector<1x32xf32> -> vector<1x32xf32>
    %cst_84 = arith.constant dense<0.000000e+00> : vector<1x32xf32>
    %203 = tpu.matmul %191, %196, %cst_84 {dimension_numbers = #tpu.dot_dimension_numbers<[1], [0], [0], [1], [0, 0, 1, 1], [], []>} : vector<1x32xf32>, vector<32x32xf32>, vector<1x32xf32> -> vector<1x32xf32>
    %204 = arith.addf %202, %203 : vector<1x32xf32>
    %205 = arith.addf %204, %197 : vector<1x32xf32>
    %cst_85 = arith.constant dense<0.000000e+00> : vector<1xf32>
    %206 = vector.multi_reduction <add>, %205, %cst_85 [1] : vector<1x32xf32> to vector<1xf32>
    %207 = vector.shape_cast %206 : vector<1xf32> to vector<1x1xf32>
    %cst_86 = arith.constant 3.200000e+01 : f32
    %208 = vector.broadcast %cst_86 : f32 to vector<1x1xf32>
    %209 = arith.divf %207, %208 : vector<1x1xf32>
    %210 = vector.broadcast %209 : vector<1x1xf32> to vector<1x32xf32>
    %211 = arith.subf %205, %210 : vector<1x32xf32>
    %212 = arith.mulf %211, %211 : vector<1x32xf32>
    %cst_87 = arith.constant dense<0.000000e+00> : vector<1xf32>
    %213 = vector.multi_reduction <add>, %212, %cst_87 [1] : vector<1x32xf32> to vector<1xf32>
    %214 = vector.shape_cast %213 : vector<1xf32> to vector<1x1xf32>
    %cst_88 = arith.constant 3.200000e+01 : f32
    %215 = vector.broadcast %cst_88 : f32 to vector<1x1xf32>
    %216 = arith.divf %214, %215 : vector<1x1xf32>
    %217 = vector.broadcast %209 : vector<1x1xf32> to vector<1x32xf32>
    %218 = arith.subf %205, %217 : vector<1x32xf32>
    %cst_89 = arith.constant 9.99999974E-6 : f32
    %219 = vector.broadcast %cst_89 : f32 to vector<1x1xf32>
    %220 = arith.addf %216, %219 : vector<1x1xf32>
    %221 = math.rsqrt %220 : vector<1x1xf32>
    %222 = vector.broadcast %221 : vector<1x1xf32> to vector<1x32xf32>
    %223 = arith.mulf %218, %222 : vector<1x32xf32>
    %224 = arith.mulf %223, %198 : vector<1x32xf32>
    %225 = arith.addf %224, %199 : vector<1x32xf32>
    %cst_90 = arith.constant 0.000000e+00 : f32
    %226 = vector.broadcast %cst_90 : f32 to vector<1x32xf32>
    %227 = arith.maximumf %225, %226 : vector<1x32xf32>
    %cst_91 = arith.constant dense<0.000000e+00> : vector<1x32xf32>
    %228 = tpu.matmul %227, %200, %cst_91 {dimension_numbers = #tpu.dot_dimension_numbers<[1], [0], [0], [1], [0, 0, 1, 1], [], []>} : vector<1x32xf32>, vector<32x32xf32>, vector<1x32xf32> -> vector<1x32xf32>
    %229 = arith.addf %228, %201 : vector<1x32xf32>
    %cst_92 = arith.constant 0.000000e+00 : f32
    %230 = vector.broadcast %cst_92 : f32 to vector<1x32xf32>
    %231 = arith.subf %230, %229 : vector<1x32xf32>
    %232 = math.exp %231 : vector<1x32xf32>
    %cst_93 = arith.constant 1.000000e+00 : f32
    %233 = vector.broadcast %cst_93 : f32 to vector<1x32xf32>
    %234 = arith.addf %233, %232 : vector<1x32xf32>
    %cst_94 = arith.constant 1.000000e+00 : f32
    %235 = vector.broadcast %cst_94 : f32 to vector<1x32xf32>
    %236 = arith.divf %235, %234 : vector<1x32xf32>
    %237 = vector.shape_cast %236 : vector<1x32xf32> to vector<1x1x32xf32>
    %238 = vector.broadcast %237 : vector<1x1x32xf32> to vector<1x8x32xf32>
    %239 = arith.mulf %188, %238 : vector<1x8x32xf32>
    %240 = arith.addf %0, %239 : vector<1x8x32xf32>
    %241 = vector.shape_cast %240 : vector<1x8x32xf32> to vector<8x32xf32>
    %c0_95 = arith.constant 0 : index
    %c0_96 = arith.constant 0 : index
    %242 = vector.load %arg20[%c0_95, %c0_96] : memref<1x32xf32, #tpu.memory_space<vmem>>, vector<1x32xf32>
    %c0_97 = arith.constant 0 : index
    %c0_98 = arith.constant 0 : index
    %243 = vector.load %arg21[%c0_97, %c0_98] : memref<1x32xf32, #tpu.memory_space<vmem>>, vector<1x32xf32>
    %cst_99 = arith.constant dense<0.000000e+00> : vector<8xf32>
    %244 = vector.multi_reduction <add>, %241, %cst_99 [1] : vector<8x32xf32> to vector<8xf32>
    %245 = vector.shape_cast %244 : vector<8xf32> to vector<8x1xf32>
    %cst_100 = arith.constant 3.200000e+01 : f32
    %246 = vector.broadcast %cst_100 : f32 to vector<8x1xf32>
    %247 = arith.divf %245, %246 : vector<8x1xf32>
    %248 = vector.broadcast %247 : vector<8x1xf32> to vector<8x32xf32>
    %249 = arith.subf %241, %248 : vector<8x32xf32>
    %250 = arith.mulf %249, %249 : vector<8x32xf32>
    %cst_101 = arith.constant dense<0.000000e+00> : vector<8xf32>
    %251 = vector.multi_reduction <add>, %250, %cst_101 [1] : vector<8x32xf32> to vector<8xf32>
    %252 = vector.shape_cast %251 : vector<8xf32> to vector<8x1xf32>
    %cst_102 = arith.constant 3.200000e+01 : f32
    %253 = vector.broadcast %cst_102 : f32 to vector<8x1xf32>
    %254 = arith.divf %252, %253 : vector<8x1xf32>
    %255 = vector.broadcast %247 : vector<8x1xf32> to vector<8x32xf32>
    %256 = arith.subf %241, %255 : vector<8x32xf32>
    %cst_103 = arith.constant 9.99999974E-6 : f32
    %257 = vector.broadcast %cst_103 : f32 to vector<8x1xf32>
    %258 = arith.addf %254, %257 : vector<8x1xf32>
    %259 = math.rsqrt %258 : vector<8x1xf32>
    %260 = vector.broadcast %259 : vector<8x1xf32> to vector<8x32xf32>
    %261 = arith.mulf %256, %260 : vector<8x32xf32>
    %262 = vector.broadcast %242 : vector<1x32xf32> to vector<8x32xf32>
    %263 = arith.mulf %261, %262 : vector<8x32xf32>
    %264 = vector.broadcast %243 : vector<1x32xf32> to vector<8x32xf32>
    %265 = arith.addf %263, %264 : vector<8x32xf32>
    %c0_104 = arith.constant 0 : index
    %c0_105 = arith.constant 0 : index
    %266 = vector.load %arg22[%c0_104, %c0_105] : memref<32x128xf32, #tpu.memory_space<vmem>>, vector<32x128xf32>
    %cst_106 = arith.constant dense<0.000000e+00> : vector<8x128xf32>
    %267 = tpu.matmul %265, %266, %cst_106 {dimension_numbers = #tpu.dot_dimension_numbers<[1], [0], [0], [1], [0, 0, 1, 1], [], []>} : vector<8x32xf32>, vector<32x128xf32>, vector<8x128xf32> -> vector<8x128xf32>
    %c0_107 = arith.constant 0 : index
    %c0_108 = arith.constant 0 : index
    %268 = vector.load %arg23[%c0_107, %c0_108] : memref<1x128xf32, #tpu.memory_space<vmem>>, vector<1x128xf32>
    %269 = vector.broadcast %268 : vector<1x128xf32> to vector<8x128xf32>
    %270 = arith.addf %267, %269 : vector<8x128xf32>
    %cst_109 = arith.constant 0.707106769 : f32
    %271 = vector.broadcast %cst_109 : f32 to vector<8x128xf32>
    %272 = arith.mulf %270, %271 : vector<8x128xf32>
    %273 = math.absf %272 : vector<8x128xf32>
    %cst_110 = arith.constant 0.327591091 : f32
    %274 = vector.broadcast %cst_110 : f32 to vector<8x128xf32>
    %275 = arith.mulf %274, %273 : vector<8x128xf32>
    %cst_111 = arith.constant 1.000000e+00 : f32
    %276 = vector.broadcast %cst_111 : f32 to vector<8x128xf32>
    %277 = arith.addf %276, %275 : vector<8x128xf32>
    %cst_112 = arith.constant 1.000000e+00 : f32
    %278 = vector.broadcast %cst_112 : f32 to vector<8x128xf32>
    %279 = arith.divf %278, %277 : vector<8x128xf32>
    %cst_113 = arith.constant 1.06140542 : f32
    %280 = vector.broadcast %cst_113 : f32 to vector<8x128xf32>
    %281 = arith.mulf %280, %279 : vector<8x128xf32>
    %cst_114 = arith.constant -1.45315206 : f32
    %282 = vector.broadcast %cst_114 : f32 to vector<8x128xf32>
    %283 = arith.addf %281, %282 : vector<8x128xf32>
    %284 = arith.mulf %283, %279 : vector<8x128xf32>
    %cst_115 = arith.constant 1.42141378 : f32
    %285 = vector.broadcast %cst_115 : f32 to vector<8x128xf32>
    %286 = arith.addf %284, %285 : vector<8x128xf32>
    %287 = arith.mulf %286, %279 : vector<8x128xf32>
    %cst_116 = arith.constant -0.284496725 : f32
    %288 = vector.broadcast %cst_116 : f32 to vector<8x128xf32>
    %289 = arith.addf %287, %288 : vector<8x128xf32>
    %290 = arith.mulf %289, %279 : vector<8x128xf32>
    %cst_117 = arith.constant 0.254829586 : f32
    %291 = vector.broadcast %cst_117 : f32 to vector<8x128xf32>
    %292 = arith.addf %290, %291 : vector<8x128xf32>
    %293 = arith.mulf %292, %279 : vector<8x128xf32>
    %cst_118 = arith.constant 0.000000e+00 : f32
    %294 = vector.broadcast %cst_118 : f32 to vector<8x128xf32>
    %295 = arith.subf %294, %273 : vector<8x128xf32>
    %296 = arith.mulf %295, %273 : vector<8x128xf32>
    %297 = math.exp %296 : vector<8x128xf32>
    %298 = arith.mulf %293, %297 : vector<8x128xf32>
    %cst_119 = arith.constant 1.000000e+00 : f32
    %299 = vector.broadcast %cst_119 : f32 to vector<8x128xf32>
    %300 = arith.subf %299, %298 : vector<8x128xf32>
    %cst_120 = arith.constant 0.000000e+00 : f32
    %301 = vector.broadcast %cst_120 : f32 to vector<8x128xf32>
    %302 = arith.cmpf oge, %272, %301 : vector<8x128xf32>
    %cst_121 = arith.constant 0.000000e+00 : f32
    %303 = vector.broadcast %cst_121 : f32 to vector<8x128xf32>
    %304 = arith.subf %303, %300 : vector<8x128xf32>
    %305 = arith.select %302, %300, %304 : vector<8x128xi1>, vector<8x128xf32>
    %cst_122 = arith.constant 5.000000e-01 : f32
    %306 = vector.broadcast %cst_122 : f32 to vector<8x128xf32>
    %307 = arith.mulf %306, %270 : vector<8x128xf32>
    %cst_123 = arith.constant 1.000000e+00 : f32
    %308 = vector.broadcast %cst_123 : f32 to vector<8x128xf32>
    %309 = arith.addf %308, %305 : vector<8x128xf32>
    %310 = arith.mulf %307, %309 : vector<8x128xf32>
    %c0_124 = arith.constant 0 : index
    %c0_125 = arith.constant 0 : index
    %311 = vector.load %arg24[%c0_124, %c0_125] : memref<128x32xf32, #tpu.memory_space<vmem>>, vector<128x32xf32>
    %cst_126 = arith.constant dense<0.000000e+00> : vector<8x32xf32>
    %312 = tpu.matmul %310, %311, %cst_126 {dimension_numbers = #tpu.dot_dimension_numbers<[1], [0], [0], [1], [0, 0, 1, 1], [], []>} : vector<8x128xf32>, vector<128x32xf32>, vector<8x32xf32> -> vector<8x32xf32>
    %c0_127 = arith.constant 0 : index
    %c0_128 = arith.constant 0 : index
    %313 = vector.load %arg25[%c0_127, %c0_128] : memref<1x32xf32, #tpu.memory_space<vmem>>, vector<1x32xf32>
    %314 = vector.broadcast %313 : vector<1x32xf32> to vector<8x32xf32>
    %315 = arith.addf %312, %314 : vector<8x32xf32>
    %316 = vector.shape_cast %315 : vector<8x32xf32> to vector<1x8x32xf32>
    %cst_129 = arith.constant dense<0.000000e+00> : vector<1x32xf32>
    %317 = vector.multi_reduction <add>, %316, %cst_129 [1] : vector<1x8x32xf32> to vector<1x32xf32>
    %cst_130 = arith.constant 8.000000e+00 : f32
    %318 = vector.broadcast %cst_130 : f32 to vector<1x32xf32>
    %319 = arith.divf %317, %318 : vector<1x32xf32>
    %c0_131 = arith.constant 0 : index
    %c0_132 = arith.constant 0 : index
    %320 = vector.load %arg26[%c0_131, %c0_132] : memref<32x32xf32, #tpu.memory_space<vmem>>, vector<32x32xf32>
    %c0_133 = arith.constant 0 : index
    %c0_134 = arith.constant 0 : index
    %321 = vector.load %arg27[%c0_133, %c0_134] : memref<32x32xf32, #tpu.memory_space<vmem>>, vector<32x32xf32>
    %c0_135 = arith.constant 0 : index
    %c0_136 = arith.constant 0 : index
    %322 = vector.load %arg28[%c0_135, %c0_136] : memref<1x32xf32, #tpu.memory_space<vmem>>, vector<1x32xf32>
    %c0_137 = arith.constant 0 : index
    %c0_138 = arith.constant 0 : index
    %323 = vector.load %arg29[%c0_137, %c0_138] : memref<1x32xf32, #tpu.memory_space<vmem>>, vector<1x32xf32>
    %c0_139 = arith.constant 0 : index
    %c0_140 = arith.constant 0 : index
    %324 = vector.load %arg30[%c0_139, %c0_140] : memref<1x32xf32, #tpu.memory_space<vmem>>, vector<1x32xf32>
    %c0_141 = arith.constant 0 : index
    %c0_142 = arith.constant 0 : index
    %325 = vector.load %arg31[%c0_141, %c0_142] : memref<32x32xf32, #tpu.memory_space<vmem>>, vector<32x32xf32>
    %c0_143 = arith.constant 0 : index
    %c0_144 = arith.constant 0 : index
    %326 = vector.load %arg32[%c0_143, %c0_144] : memref<1x32xf32, #tpu.memory_space<vmem>>, vector<1x32xf32>
    %cst_145 = arith.constant dense<0.000000e+00> : vector<1x32xf32>
    %327 = tpu.matmul %319, %320, %cst_145 {dimension_numbers = #tpu.dot_dimension_numbers<[1], [0], [0], [1], [0, 0, 1, 1], [], []>} : vector<1x32xf32>, vector<32x32xf32>, vector<1x32xf32> -> vector<1x32xf32>
    %cst_146 = arith.constant dense<0.000000e+00> : vector<1x32xf32>
    %328 = tpu.matmul %191, %321, %cst_146 {dimension_numbers = #tpu.dot_dimension_numbers<[1], [0], [0], [1], [0, 0, 1, 1], [], []>} : vector<1x32xf32>, vector<32x32xf32>, vector<1x32xf32> -> vector<1x32xf32>
    %329 = arith.addf %327, %328 : vector<1x32xf32>
    %330 = arith.addf %329, %322 : vector<1x32xf32>
    %cst_147 = arith.constant dense<0.000000e+00> : vector<1xf32>
    %331 = vector.multi_reduction <add>, %330, %cst_147 [1] : vector<1x32xf32> to vector<1xf32>
    %332 = vector.shape_cast %331 : vector<1xf32> to vector<1x1xf32>
    %cst_148 = arith.constant 3.200000e+01 : f32
    %333 = vector.broadcast %cst_148 : f32 to vector<1x1xf32>
    %334 = arith.divf %332, %333 : vector<1x1xf32>
    %335 = vector.broadcast %334 : vector<1x1xf32> to vector<1x32xf32>
    %336 = arith.subf %330, %335 : vector<1x32xf32>
    %337 = arith.mulf %336, %336 : vector<1x32xf32>
    %cst_149 = arith.constant dense<0.000000e+00> : vector<1xf32>
    %338 = vector.multi_reduction <add>, %337, %cst_149 [1] : vector<1x32xf32> to vector<1xf32>
    %339 = vector.shape_cast %338 : vector<1xf32> to vector<1x1xf32>
    %cst_150 = arith.constant 3.200000e+01 : f32
    %340 = vector.broadcast %cst_150 : f32 to vector<1x1xf32>
    %341 = arith.divf %339, %340 : vector<1x1xf32>
    %342 = vector.broadcast %334 : vector<1x1xf32> to vector<1x32xf32>
    %343 = arith.subf %330, %342 : vector<1x32xf32>
    %cst_151 = arith.constant 9.99999974E-6 : f32
    %344 = vector.broadcast %cst_151 : f32 to vector<1x1xf32>
    %345 = arith.addf %341, %344 : vector<1x1xf32>
    %346 = math.rsqrt %345 : vector<1x1xf32>
    %347 = vector.broadcast %346 : vector<1x1xf32> to vector<1x32xf32>
    %348 = arith.mulf %343, %347 : vector<1x32xf32>
    %349 = arith.mulf %348, %323 : vector<1x32xf32>
    %350 = arith.addf %349, %324 : vector<1x32xf32>
    %cst_152 = arith.constant 0.000000e+00 : f32
    %351 = vector.broadcast %cst_152 : f32 to vector<1x32xf32>
    %352 = arith.maximumf %350, %351 : vector<1x32xf32>
    %cst_153 = arith.constant dense<0.000000e+00> : vector<1x32xf32>
    %353 = tpu.matmul %352, %325, %cst_153 {dimension_numbers = #tpu.dot_dimension_numbers<[1], [0], [0], [1], [0, 0, 1, 1], [], []>} : vector<1x32xf32>, vector<32x32xf32>, vector<1x32xf32> -> vector<1x32xf32>
    %354 = arith.addf %353, %326 : vector<1x32xf32>
    %cst_154 = arith.constant 0.000000e+00 : f32
    %355 = vector.broadcast %cst_154 : f32 to vector<1x32xf32>
    %356 = arith.subf %355, %354 : vector<1x32xf32>
    %357 = math.exp %356 : vector<1x32xf32>
    %cst_155 = arith.constant 1.000000e+00 : f32
    %358 = vector.broadcast %cst_155 : f32 to vector<1x32xf32>
    %359 = arith.addf %358, %357 : vector<1x32xf32>
    %cst_156 = arith.constant 1.000000e+00 : f32
    %360 = vector.broadcast %cst_156 : f32 to vector<1x32xf32>
    %361 = arith.divf %360, %359 : vector<1x32xf32>
    %362 = vector.shape_cast %361 : vector<1x32xf32> to vector<1x1x32xf32>
    %363 = vector.broadcast %362 : vector<1x1x32xf32> to vector<1x8x32xf32>
    %364 = arith.mulf %316, %363 : vector<1x8x32xf32>
    %365 = arith.addf %240, %364 : vector<1x8x32xf32>
    %366 = vector.shape_cast %365 : vector<1x8x32xf32> to vector<8x32xf32>
    %c0_157 = arith.constant 0 : index
    %c0_158 = arith.constant 0 : index
    %367 = vector.load %arg33[%c0_157, %c0_158] : memref<1x32xf32, #tpu.memory_space<vmem>>, vector<1x32xf32>
    %c0_159 = arith.constant 0 : index
    %c0_160 = arith.constant 0 : index
    %368 = vector.load %arg34[%c0_159, %c0_160] : memref<1x32xf32, #tpu.memory_space<vmem>>, vector<1x32xf32>
    %cst_161 = arith.constant dense<0.000000e+00> : vector<8xf32>
    %369 = vector.multi_reduction <add>, %366, %cst_161 [1] : vector<8x32xf32> to vector<8xf32>
    %370 = vector.shape_cast %369 : vector<8xf32> to vector<8x1xf32>
    %cst_162 = arith.constant 3.200000e+01 : f32
    %371 = vector.broadcast %cst_162 : f32 to vector<8x1xf32>
    %372 = arith.divf %370, %371 : vector<8x1xf32>
    %373 = vector.broadcast %372 : vector<8x1xf32> to vector<8x32xf32>
    %374 = arith.subf %366, %373 : vector<8x32xf32>
    %375 = arith.mulf %374, %374 : vector<8x32xf32>
    %cst_163 = arith.constant dense<0.000000e+00> : vector<8xf32>
    %376 = vector.multi_reduction <add>, %375, %cst_163 [1] : vector<8x32xf32> to vector<8xf32>
    %377 = vector.shape_cast %376 : vector<8xf32> to vector<8x1xf32>
    %cst_164 = arith.constant 3.200000e+01 : f32
    %378 = vector.broadcast %cst_164 : f32 to vector<8x1xf32>
    %379 = arith.divf %377, %378 : vector<8x1xf32>
    %380 = vector.broadcast %372 : vector<8x1xf32> to vector<8x32xf32>
    %381 = arith.subf %366, %380 : vector<8x32xf32>
    %cst_165 = arith.constant 9.99999974E-6 : f32
    %382 = vector.broadcast %cst_165 : f32 to vector<8x1xf32>
    %383 = arith.addf %379, %382 : vector<8x1xf32>
    %384 = math.rsqrt %383 : vector<8x1xf32>
    %385 = vector.broadcast %384 : vector<8x1xf32> to vector<8x32xf32>
    %386 = arith.mulf %381, %385 : vector<8x32xf32>
    %387 = vector.broadcast %367 : vector<1x32xf32> to vector<8x32xf32>
    %388 = arith.mulf %386, %387 : vector<8x32xf32>
    %389 = vector.broadcast %368 : vector<1x32xf32> to vector<8x32xf32>
    %390 = arith.addf %388, %389 : vector<8x32xf32>
    %cst_166 = arith.constant dense<0.000000e+00> : vector<8xf32>
    %391 = vector.multi_reduction <add>, %1, %cst_166 [1] : vector<8x32xf32> to vector<8xf32>
    %392 = vector.shape_cast %391 : vector<8xf32> to vector<8x1xf32>
    %cst_167 = arith.constant 3.200000e+01 : f32
    %393 = vector.broadcast %cst_167 : f32 to vector<8x1xf32>
    %394 = arith.divf %392, %393 : vector<8x1xf32>
    %395 = vector.broadcast %394 : vector<8x1xf32> to vector<8x32xf32>
    %396 = arith.subf %1, %395 : vector<8x32xf32>
    %397 = arith.mulf %396, %396 : vector<8x32xf32>
    %cst_168 = arith.constant dense<0.000000e+00> : vector<8xf32>
    %398 = vector.multi_reduction <add>, %397, %cst_168 [1] : vector<8x32xf32> to vector<8xf32>
    %399 = vector.shape_cast %398 : vector<8xf32> to vector<8x1xf32>
    %cst_169 = arith.constant 3.200000e+01 : f32
    %400 = vector.broadcast %cst_169 : f32 to vector<8x1xf32>
    %401 = arith.divf %399, %400 : vector<8x1xf32>
    %402 = vector.broadcast %394 : vector<8x1xf32> to vector<8x32xf32>
    %403 = arith.subf %1, %402 : vector<8x32xf32>
    %cst_170 = arith.constant 9.99999974E-6 : f32
    %404 = vector.broadcast %cst_170 : f32 to vector<8x1xf32>
    %405 = arith.addf %401, %404 : vector<8x1xf32>
    %406 = math.rsqrt %405 : vector<8x1xf32>
    %407 = vector.broadcast %406 : vector<8x1xf32> to vector<8x32xf32>
    %408 = arith.mulf %403, %407 : vector<8x32xf32>
    %409 = vector.broadcast %367 : vector<1x32xf32> to vector<8x32xf32>
    %410 = arith.mulf %408, %409 : vector<8x32xf32>
    %411 = vector.broadcast %368 : vector<1x32xf32> to vector<8x32xf32>
    %412 = arith.addf %410, %411 : vector<8x32xf32>
    %c0_171 = arith.constant 0 : index
    %c0_172 = arith.constant 0 : index
    %413 = vector.load %arg35[%c0_171, %c0_172] : memref<32x32xf32, #tpu.memory_space<vmem>>, vector<32x32xf32>
    %cst_173 = arith.constant dense<0.000000e+00> : vector<8x32xf32>
    %414 = tpu.matmul %390, %413, %cst_173 {dimension_numbers = #tpu.dot_dimension_numbers<[1], [0], [0], [1], [0, 0, 1, 1], [], []>} : vector<8x32xf32>, vector<32x32xf32>, vector<8x32xf32> -> vector<8x32xf32>
    %c0_174 = arith.constant 0 : index
    %c0_175 = arith.constant 0 : index
    %415 = vector.load %arg36[%c0_174, %c0_175] : memref<32x32xf32, #tpu.memory_space<vmem>>, vector<32x32xf32>
    %cst_176 = arith.constant dense<0.000000e+00> : vector<8x32xf32>
    %416 = tpu.matmul %412, %415, %cst_176 {dimension_numbers = #tpu.dot_dimension_numbers<[1], [0], [0], [1], [0, 0, 1, 1], [], []>} : vector<8x32xf32>, vector<32x32xf32>, vector<8x32xf32> -> vector<8x32xf32>
    %417 = arith.addf %414, %416 : vector<8x32xf32>
    %c0_177 = arith.constant 0 : index
    %c0_178 = arith.constant 0 : index
    %418 = vector.load %arg37[%c0_177, %c0_178] : memref<1x32xf32, #tpu.memory_space<vmem>>, vector<1x32xf32>
    %419 = vector.broadcast %418 : vector<1x32xf32> to vector<8x32xf32>
    %420 = arith.addf %417, %419 : vector<8x32xf32>
    %c0_179 = arith.constant 0 : index
    %c0_180 = arith.constant 0 : index
    %421 = vector.load %arg38[%c0_179, %c0_180] : memref<1x32xf32, #tpu.memory_space<vmem>>, vector<1x32xf32>
    %c0_181 = arith.constant 0 : index
    %c0_182 = arith.constant 0 : index
    %422 = vector.load %arg39[%c0_181, %c0_182] : memref<1x32xf32, #tpu.memory_space<vmem>>, vector<1x32xf32>
    %cst_183 = arith.constant dense<0.000000e+00> : vector<8xf32>
    %423 = vector.multi_reduction <add>, %420, %cst_183 [1] : vector<8x32xf32> to vector<8xf32>
    %424 = vector.shape_cast %423 : vector<8xf32> to vector<8x1xf32>
    %cst_184 = arith.constant 3.200000e+01 : f32
    %425 = vector.broadcast %cst_184 : f32 to vector<8x1xf32>
    %426 = arith.divf %424, %425 : vector<8x1xf32>
    %427 = vector.broadcast %426 : vector<8x1xf32> to vector<8x32xf32>
    %428 = arith.subf %420, %427 : vector<8x32xf32>
    %429 = arith.mulf %428, %428 : vector<8x32xf32>
    %cst_185 = arith.constant dense<0.000000e+00> : vector<8xf32>
    %430 = vector.multi_reduction <add>, %429, %cst_185 [1] : vector<8x32xf32> to vector<8xf32>
    %431 = vector.shape_cast %430 : vector<8xf32> to vector<8x1xf32>
    %cst_186 = arith.constant 3.200000e+01 : f32
    %432 = vector.broadcast %cst_186 : f32 to vector<8x1xf32>
    %433 = arith.divf %431, %432 : vector<8x1xf32>
    %434 = vector.broadcast %426 : vector<8x1xf32> to vector<8x32xf32>
    %435 = arith.subf %420, %434 : vector<8x32xf32>
    %cst_187 = arith.constant 9.99999974E-6 : f32
    %436 = vector.broadcast %cst_187 : f32 to vector<8x1xf32>
    %437 = arith.addf %433, %436 : vector<8x1xf32>
    %438 = math.rsqrt %437 : vector<8x1xf32>
    %439 = vector.broadcast %438 : vector<8x1xf32> to vector<8x32xf32>
    %440 = arith.mulf %435, %439 : vector<8x32xf32>
    %441 = vector.broadcast %421 : vector<1x32xf32> to vector<8x32xf32>
    %442 = arith.mulf %440, %441 : vector<8x32xf32>
    %443 = vector.broadcast %422 : vector<1x32xf32> to vector<8x32xf32>
    %444 = arith.addf %442, %443 : vector<8x32xf32>
    %cst_188 = arith.constant 0.000000e+00 : f32
    %445 = vector.broadcast %cst_188 : f32 to vector<8x32xf32>
    %446 = arith.maximumf %444, %445 : vector<8x32xf32>
    %c0_189 = arith.constant 0 : index
    %c0_190 = arith.constant 0 : index
    %447 = vector.load %arg40[%c0_189, %c0_190] : memref<32x2xf32, #tpu.memory_space<vmem>>, vector<32x2xf32>
    %cst_191 = arith.constant dense<0.000000e+00> : vector<8x2xf32>
    %448 = tpu.matmul %446, %447, %cst_191 {dimension_numbers = #tpu.dot_dimension_numbers<[1], [0], [0], [1], [0, 0, 1, 1], [], []>} : vector<8x32xf32>, vector<32x2xf32>, vector<8x2xf32> -> vector<8x2xf32>
    %c0_192 = arith.constant 0 : index
    %c0_193 = arith.constant 0 : index
    %449 = vector.load %arg41[%c0_192, %c0_193] : memref<1x2xf32, #tpu.memory_space<vmem>>, vector<1x2xf32>
    %450 = vector.broadcast %449 : vector<1x2xf32> to vector<8x2xf32>
    %451 = arith.addf %448, %450 : vector<8x2xf32>
    %cst_194 = arith.constant dense<0xFF800000> : vector<8xf32>
    %452 = vector.multi_reduction <maximumf>, %451, %cst_194 [1] : vector<8x2xf32> to vector<8xf32>
    %453 = vector.shape_cast %452 : vector<8xf32> to vector<8x1xf32>
    %454 = vector.broadcast %453 : vector<8x1xf32> to vector<8x2xf32>
    %455 = arith.subf %451, %454 : vector<8x2xf32>
    %456 = math.exp %455 : vector<8x2xf32>
    %cst_195 = arith.constant dense<0.000000e+00> : vector<8xf32>
    %457 = vector.multi_reduction <add>, %456, %cst_195 [1] : vector<8x2xf32> to vector<8xf32>
    %458 = vector.shape_cast %457 : vector<8xf32> to vector<8x1xf32>
    %459 = vector.broadcast %458 : vector<8x1xf32> to vector<8x2xf32>
    %460 = arith.divf %456, %459 : vector<8x2xf32>
    %461 = vector.extract_strided_slice %460 {offsets = [0, 0], sizes = [8, 1], strides = [1, 1]} : vector<8x2xf32> to vector<8x1xf32>
    %462 = vector.broadcast %461 : vector<8x1xf32> to vector<8x32xf32>
    %463 = arith.mulf %366, %462 : vector<8x32xf32>
    %464 = vector.extract_strided_slice %460 {offsets = [0, 1], sizes = [8, 1], strides = [1, 1]} : vector<8x2xf32> to vector<8x1xf32>
    %465 = vector.broadcast %464 : vector<8x1xf32> to vector<8x32xf32>
    %466 = arith.mulf %1, %465 : vector<8x32xf32>
    %467 = arith.addf %463, %466 : vector<8x32xf32>
    %468 = vector.shape_cast %467 : vector<8x32xf32> to vector<1x8x32xf32>
    %c0_196 = arith.constant 0 : index
    %c0_197 = arith.constant 0 : index
    %c0_198 = arith.constant 0 : index
    %469 = vector.load %arg42[%c0_196, %c0_197, %c0_198] : memref<1x8x32xf32, #tpu.memory_space<vmem>>, vector<1x8x32xf32>
    tpu.vector_store %arg42[%c0_196, %c0_197, %c0_198], %468 {strides = array<i32>} : memref<1x8x32xf32, #tpu.memory_space<vmem>>, vector<1x8x32xf32>,
    return
  }
  func.func @transform_0(%arg0: i32) -> (i32, i32, i32) {
    %c0_i32 = arith.constant 0 : i32
    %c0_i32_0 = arith.constant 0 : i32
    %c0_i32_1 = arith.constant 0 : i32
    return %arg0, %c0_i32, %c0_i32_0 : i32, i32, i32
  }
  func.func @transform_1(%arg0: i32) -> (i32, i32) {
    %c0_i32 = arith.constant 0 : i32
    %c0_i32_0 = arith.constant 0 : i32
    %c0_i32_1 = arith.constant 0 : i32
    return %c0_i32, %c0_i32_0 : i32, i32
  }
  func.func @transform_2(%arg0: i32) -> (i32, i32) {
    %c0_i32 = arith.constant 0 : i32
    %c0_i32_0 = arith.constant 0 : i32
    %c0_i32_1 = arith.constant 0 : i32
    return %c0_i32, %c0_i32_0 : i32, i32
  }
  func.func @transform_3(%arg0: i32) -> (i32, i32) {
    %c0_i32 = arith.constant 0 : i32
    %c0_i32_0 = arith.constant 0 : i32
    %c0_i32_1 = arith.constant 0 : i32
    return %c0_i32, %c0_i32_0 : i32, i32
  }
  func.func @transform_4(%arg0: i32) -> (i32, i32) {
    %c0_i32 = arith.constant 0 : i32
    %c0_i32_0 = arith.constant 0 : i32
    %c0_i32_1 = arith.constant 0 : i32
    return %c0_i32, %c0_i32_0 : i32, i32
  }
  func.func @transform_5(%arg0: i32) -> (i32, i32) {
    %c0_i32 = arith.constant 0 : i32
    %c0_i32_0 = arith.constant 0 : i32
    %c0_i32_1 = arith.constant 0 : i32
    return %c0_i32, %c0_i32_0 : i32, i32
  }
  func.func @transform_6(%arg0: i32) -> (i32, i32) {
    %c0_i32 = arith.constant 0 : i32
    %c0_i32_0 = arith.constant 0 : i32
    %c0_i32_1 = arith.constant 0 : i32
    return %c0_i32, %c0_i32_0 : i32, i32
  }
  func.func @transform_7(%arg0: i32) -> (i32, i32) {
    %c0_i32 = arith.constant 0 : i32
    %c0_i32_0 = arith.constant 0 : i32
    %c0_i32_1 = arith.constant 0 : i32
    return %c0_i32, %c0_i32_0 : i32, i32
  }
  func.func @transform_8(%arg0: i32) -> (i32, i32) {
    %c0_i32 = arith.constant 0 : i32
    %c0_i32_0 = arith.constant 0 : i32
    %c0_i32_1 = arith.constant 0 : i32
    return %c0_i32, %c0_i32_0 : i32, i32
  }
  func.func @transform_9(%arg0: i32) -> (i32, i32) {
    %c0_i32 = arith.constant 0 : i32
    %c0_i32_0 = arith.constant 0 : i32
    %c0_i32_1 = arith.constant 0 : i32
    return %c0_i32, %c0_i32_0 : i32, i32
  }
  func.func @transform_10(%arg0: i32) -> (i32, i32) {
    %c0_i32 = arith.constant 0 : i32
    %c0_i32_0 = arith.constant 0 : i32
    %c0_i32_1 = arith.constant 0 : i32
    return %c0_i32, %c0_i32_0 : i32, i32
  }
  func.func @transform_11(%arg0: i32) -> (i32, i32) {
    %c0_i32 = arith.constant 0 : i32
    %c0_i32_0 = arith.constant 0 : i32
    %c0_i32_1 = arith.constant 0 : i32
    return %c0_i32, %c0_i32_0 : i32, i32
  }
  func.func @transform_12(%arg0: i32) -> (i32, i32) {
    %c0_i32 = arith.constant 0 : i32
    %c0_i32_0 = arith.constant 0 : i32
    %c0_i32_1 = arith.constant 0 : i32
    return %c0_i32, %c0_i32_0 : i32, i32
  }
  func.func @transform_13(%arg0: i32) -> (i32, i32) {
    %c0_i32 = arith.constant 0 : i32
    %c0_i32_0 = arith.constant 0 : i32
    %c0_i32_1 = arith.constant 0 : i32
    return %c0_i32, %c0_i32_0 : i32, i32
  }
  func.func @transform_14(%arg0: i32) -> (i32, i32) {
    %c0_i32 = arith.constant 0 : i32
    %c0_i32_0 = arith.constant 0 : i32
    %c0_i32_1 = arith.constant 0 : i32
    return %c0_i32, %c0_i32_0 : i32, i32
  }
  func.func @transform_15(%arg0: i32) -> (i32, i32) {
    %c0_i32 = arith.constant 0 : i32
    %c0_i32_0 = arith.constant 0 : i32
    %c0_i32_1 = arith.constant 0 : i32
    return %c0_i32, %c0_i32_0 : i32, i32
  }
  func.func @transform_16(%arg0: i32) -> (i32, i32) {
    %c0_i32 = arith.constant 0 : i32
    %c0_i32_0 = arith.constant 0 : i32
    %c0_i32_1 = arith.constant 0 : i32
    return %c0_i32, %c0_i32_0 : i32, i32
  }
  func.func @transform_17(%arg0: i32) -> (i32, i32) {
    %c0_i32 = arith.constant 0 : i32
    %c0_i32_0 = arith.constant 0 : i32
    %c0_i32_1 = arith.constant 0 : i32
    return %c0_i32, %c0_i32_0 : i32, i32
  }
  func.func @transform_18(%arg0: i32) -> (i32, i32) {
    %c0_i32 = arith.constant 0 : i32
    %c0_i32_0 = arith.constant 0 : i32
    %c0_i32_1 = arith.constant 0 : i32
    return %c0_i32, %c0_i32_0 : i32, i32
  }
  func.func @transform_19(%arg0: i32) -> (i32, i32) {
    %c0_i32 = arith.constant 0 : i32
    %c0_i32_0 = arith.constant 0 : i32
    %c0_i32_1 = arith.constant 0 : i32
    return %c0_i32, %c0_i32_0 : i32, i32
  }
  func.func @transform_20(%arg0: i32) -> (i32, i32) {
    %c0_i32 = arith.constant 0 : i32
    %c0_i32_0 = arith.constant 0 : i32
    %c0_i32_1 = arith.constant 0 : i32
    return %c0_i32, %c0_i32_0 : i32, i32
  }
  func.func @transform_21(%arg0: i32) -> (i32, i32) {
    %c0_i32 = arith.constant 0 : i32
    %c0_i32_0 = arith.constant 0 : i32
    %c0_i32_1 = arith.constant 0 : i32
    return %c0_i32, %c0_i32_0 : i32, i32
  }
  func.func @transform_22(%arg0: i32) -> (i32, i32) {
    %c0_i32 = arith.constant 0 : i32
    %c0_i32_0 = arith.constant 0 : i32
    %c0_i32_1 = arith.constant 0 : i32
    return %c0_i32, %c0_i32_0 : i32, i32
  }
  func.func @transform_23(%arg0: i32) -> (i32, i32) {
    %c0_i32 = arith.constant 0 : i32
    %c0_i32_0 = arith.constant 0 : i32
    %c0_i32_1 = arith.constant 0 : i32
    return %c0_i32, %c0_i32_0 : i32, i32
  }
  func.func @transform_24(%arg0: i32) -> (i32, i32) {
    %c0_i32 = arith.constant 0 : i32
    %c0_i32_0 = arith.constant 0 : i32
    %c0_i32_1 = arith.constant 0 : i32
    return %c0_i32, %c0_i32_0 : i32, i32
  }
  func.func @transform_25(%arg0: i32) -> (i32, i32) {
    %c0_i32 = arith.constant 0 : i32
    %c0_i32_0 = arith.constant 0 : i32
    %c0_i32_1 = arith.constant 0 : i32
    return %c0_i32, %c0_i32_0 : i32, i32
  }
  func.func @transform_26(%arg0: i32) -> (i32, i32) {
    %c0_i32 = arith.constant 0 : i32
    %c0_i32_0 = arith.constant 0 : i32
    %c0_i32_1 = arith.constant 0 : i32
    return %c0_i32, %c0_i32_0 : i32, i32
  }
  func.func @transform_27(%arg0: i32) -> (i32, i32) {
    %c0_i32 = arith.constant 0 : i32
    %c0_i32_0 = arith.constant 0 : i32
    %c0_i32_1 = arith.constant 0 : i32
    return %c0_i32, %c0_i32_0 : i32, i32
  }
  func.func @transform_28(%arg0: i32) -> (i32, i32) {
    %c0_i32 = arith.constant 0 : i32
    %c0_i32_0 = arith.constant 0 : i32
    %c0_i32_1 = arith.constant 0 : i32
    return %c0_i32, %c0_i32_0 : i32, i32
  }
  func.func @transform_29(%arg0: i32) -> (i32, i32) {
    %c0_i32 = arith.constant 0 : i32
    %c0_i32_0 = arith.constant 0 : i32
    %c0_i32_1 = arith.constant 0 : i32
    return %c0_i32, %c0_i32_0 : i32, i32
  }
  func.func @transform_30(%arg0: i32) -> (i32, i32) {
    %c0_i32 = arith.constant 0 : i32
    %c0_i32_0 = arith.constant 0 : i32
    %c0_i32_1 = arith.constant 0 : i32
    return %c0_i32, %c0_i32_0 : i32, i32
  }
  func.func @transform_31(%arg0: i32) -> (i32, i32) {
    %c0_i32 = arith.constant 0 : i32
    %c0_i32_0 = arith.constant 0 : i32
    %c0_i32_1 = arith.constant 0 : i32
    return %c0_i32, %c0_i32_0 : i32, i32
  }
  func.func @transform_32(%arg0: i32) -> (i32, i32) {
    %c0_i32 = arith.constant 0 : i32
    %c0_i32_0 = arith.constant 0 : i32
    %c0_i32_1 = arith.constant 0 : i32
    return %c0_i32, %c0_i32_0 : i32, i32
  }
  func.func @transform_33(%arg0: i32) -> (i32, i32) {
    %c0_i32 = arith.constant 0 : i32
    %c0_i32_0 = arith.constant 0 : i32
    %c0_i32_1 = arith.constant 0 : i32
    return %c0_i32, %c0_i32_0 : i32, i32
  }
  func.func @transform_34(%arg0: i32) -> (i32, i32) {
    %c0_i32 = arith.constant 0 : i32
    %c0_i32_0 = arith.constant 0 : i32
    %c0_i32_1 = arith.constant 0 : i32
    return %c0_i32, %c0_i32_0 : i32, i32
  }
  func.func @transform_35(%arg0: i32) -> (i32, i32) {
    %c0_i32 = arith.constant 0 : i32
    %c0_i32_0 = arith.constant 0 : i32
    %c0_i32_1 = arith.constant 0 : i32
    return %c0_i32, %c0_i32_0 : i32, i32
  }
  func.func @transform_36(%arg0: i32) -> (i32, i32) {
    %c0_i32 = arith.constant 0 : i32
    %c0_i32_0 = arith.constant 0 : i32
    %c0_i32_1 = arith.constant 0 : i32
    return %c0_i32, %c0_i32_0 : i32, i32
  }
  func.func @transform_37(%arg0: i32) -> (i32, i32) {
    %c0_i32 = arith.constant 0 : i32
    %c0_i32_0 = arith.constant 0 : i32
    %c0_i32_1 = arith.constant 0 : i32
    return %c0_i32, %c0_i32_0 : i32, i32
  }
  func.func @transform_38(%arg0: i32) -> (i32, i32) {
    %c0_i32 = arith.constant 0 : i32
    %c0_i32_0 = arith.constant 0 : i32
    %c0_i32_1 = arith.constant 0 : i32
    return %c0_i32, %c0_i32_0 : i32, i32
  }
  func.func @transform_39(%arg0: i32) -> (i32, i32) {
    %c0_i32 = arith.constant 0 : i32
    %c0_i32_0 = arith.constant 0 : i32
    %c0_i32_1 = arith.constant 0 : i32
    return %c0_i32, %c0_i32_0 : i32, i32
  }
  func.func @transform_40(%arg0: i32) -> (i32, i32) {
    %c0_i32 = arith.constant 0 : i32
    %c0_i32_0 = arith.constant 0 : i32
    %c0_i32_1 = arith.constant 0 : i32
    return %c0_i32, %c0_i32_0 : i32, i32
  }
  func.func @transform_41(%arg0: i32) -> (i32, i32, i32) {
    %c0_i32 = arith.constant 0 : i32
    %c0_i32_0 = arith.constant 0 : i32
    %c0_i32_1 = arith.constant 0 : i32
    return %arg0, %c0_i32, %c0_i32_0 : i32, i32, i32
  }
}

</mosaic_0001>

<bundles_post_ra>
// kernel: tpu_custom_call.1
= control target key start
LH: loop header
LB: loop body
LE: loop exit
PB: predicated region body
PF: predicated region fallthrough
CT: control target
= control target key end

     0   :  { %s6159_s6 = smov 1   ;;  %s6160_s10 = smov 2   ;;  %s7262_s0 = inlined_call_operand.smem [shape: u32[42], index: -1, kind: input, shape index: {}] }
   0x1   :  { %s6245_s5 = sld [smem:[%s7262_s0]]   ;;  %s6161_s14 = smov 3  }
   0x2   :  { %s6250_s9 = sld [smem:[%s7262_s0 + %s6159_s6]]   ;;  %s6162_s18 = smov 4  }
   0x3   :  { %s6255_s13 = sld [smem:[%s7262_s0 + %s6160_s10]]   ;;  %s6163_s22 = smov 5  }
   0x4   :  { %s6260_s17 = sld [smem:[%s7262_s0 + %s6161_s14]]   ;;  %s6164_s26 = smov 6  }
   0x5   :  { %s6265_s21 = sld [smem:[%s7262_s0 + %s6162_s18]]   ;;  %s6165_s30 = smov 7  }
   0x6   :  { %s6270_s25 = sld [smem:[%s7262_s0 + %s6163_s22]]   ;;  %s6166_s4 = smov 8  }
   0x7   :  { %7321 = sst [smem:[#allocation59_spill]] %s6245_s5  ;;  %s6167_s10 = smov 9  }
   0x8   :  { %7322 = sst [smem:[#allocation60_spill]] %s6250_s9  ;;  %s6168_s15 = smov 10  }
   0x9   :  { %7323 = sst [smem:[#allocation61_spill]] %s6255_s13  ;;  %s6169_s20 = smov 11  }
   0xa   :  { %s6275_s29 = sld [smem:[%s7262_s0 + %s6164_s26]]   ;;  %s6170_s26 = smov 12  }
   0xb   :  { %7324 = sst [smem:[#allocation62_spill]] %s6265_s21  ;;  %s6171_s1 = smov 13  }
   0xc   :  { %7325 = sst [smem:[#allocation63_spill]] %s6270_s25  ;;  %s6172_s7 = smov 14  }
   0xd   :  { %s6280_s3 = sld [smem:[%s7262_s0 + %s6165_s30]]   ;;  %s6174_s22 = smov 16  }
   0xe   :  { %s6285_s8 = sld [smem:[%s7262_s0 + %s6166_s4]]   ;;  %s6175_s28 = smov 17  }
   0xf   :  { %s6290_s14 = sld [smem:[%s7262_s0 + %s6167_s10]]  }
  0x10   :  { %7326 = sst [smem:[#allocation64_spill]] %s6275_s29 }
  0x11   :  { %s6295_s19 = sld [smem:[%s7262_s0 + %s6168_s15]]   ;;  %s6173_s15 = smov 15  }
  0x12   :  { %s6300_s24 = sld [smem:[%s7262_s0 + %s6169_s20]]  }
  0x13   :  { %7327 = sst [smem:[#allocation65_spill]] %s6280_s3 }
  0x14   :  { %7328 = sst [smem:[#allocation66_spill]] %s6285_s8 }
  0x15   :  { %7329 = sst [smem:[#allocation67_spill]] %s6290_s14 }
  0x16   :  { %s6305_s30 = sld [smem:[%s7262_s0 + %s6170_s26]]  }
  0x17   :  { %7330 = sst [smem:[#allocation68_spill]] %s6295_s19 }
  0x18   :  { %7331 = sst [smem:[#allocation69_spill]] %s6300_s24 }
  0x19   :  { %s6310_s6 = sld [smem:[%s7262_s0 + %s6171_s1]]  }
  0x1a   :  { %s6315_s12 = sld [smem:[%s7262_s0 + %s6172_s7]]   ;;  %s6176_s7 = smov 18  }
  0x1b   :  { %s6320_s20 = sld [smem:[%s7262_s0 + %s6173_s15]]   ;;  %s6177_s15 = smov 19  }
  0x1c   :  { %7332 = sst [smem:[#allocation70_spill]] %s6305_s30 }
  0x1d   :  { %s6325_s27 = sld [smem:[%s7262_s0 + %s6174_s22]]   ;;  %s6178_s22 = smov 20  }
  0x1e   :  { %s6330_s4 = sld [smem:[%s7262_s0 + %s6175_s28]]   ;;  %s6179_s28 = smov 21  }
  0x1f   :  { %7333 = sst [smem:[#allocation71_spill]] %s6310_s6 }
  0x20   :  { %7334 = sst [smem:[#allocation72_spill]] %s6315_s12 }
  0x21   :  { %7335 = sst [smem:[#allocation73_spill]] %s6320_s20 }
  0x22   :  { %s6335_s30 = sld [smem:[%s7262_s0 + %s6176_s7]]   ;;  %s6180_s7 = smov 22  }
  0x23   :  { %s6340_s6 = sld [smem:[%s7262_s0 + %s6177_s15]]   ;;  %s6181_s15 = smov 23  }
  0x24   :  { %7336 = sst [smem:[#allocation74_spill]] %s6330_s4 }
  0x25   :  { %s6345_s19 = sld [smem:[%s7262_s0 + %s6178_s22]]   ;;  %s6182_s22 = smov 24  }
  0x26   :  { %s6350_s4 = sld [smem:[%s7262_s0 + %s6179_s28]]   ;;  %s6183_s28 = smov 25  }
  0x27   :  { %s6355_s29 = sld [smem:[%s7262_s0 + %s6180_s7]]   ;;  %s6184_s7 = smov 26  }
  0x28   :  { %7337 = sst [smem:[#allocation75_spill]] %s6335_s30 }
  0x29   :  { %7338 = sst [smem:[#allocation76_spill]] %s6340_s6 }
  0x2a   :  { %s6360_s25 = sld [smem:[%s7262_s0 + %s6181_s15]]   ;;  %s6185_s15 = smov 27  }
  0x2b   :  { %7339 = sst [smem:[#allocation77_spill]] %s6345_s19 }
  0x2c   :  { %7340 = sst [smem:[#allocation78_spill]] %s6350_s4 }
  0x2d   :  { %7341 = sst [smem:[#allocation79_spill]] %s6355_s29 }
  0x2e   :  { %s6365_s21 = sld [smem:[%s7262_s0 + %s6182_s22]]   ;;  %s6186_s22 = smov 28  }
  0x2f   :  { %s6370_s5 = sld [smem:[%s7262_s0 + %s6183_s28]]   ;;  %s6187_s28 = smov 29  }
  0x30   :  { %7342 = sst [smem:[#allocation80_spill]] %s6360_s25 }
  0x31   :  { %s6375_s29 = sld [smem:[%s7262_s0 + %s6184_s7]]   ;;  %s6188_s7 = smov 30  }
  0x32   :  { %s6380_s25 = sld [smem:[%s7262_s0 + %s6185_s15]]   ;;  %s6189_s15 = smov 31  }
  0x33   :  { %s6385_s19 = sld [smem:[%s7262_s0 + %s6186_s22]]   ;;  %s6190_s22 = smov 32  }
  0x34   :  { %s6400_s30 = sld [smem:[%s7262_s0 + %s6189_s15]]   ;;  %s6193_s15 = smov 35  }
  0x35   :  { %7343 = sst [smem:[#allocation81_spill]] %s6370_s5 }
  0x36   :  { %s6390_s5 = sld [smem:[%s7262_s0 + %s6187_s28]]   ;;  %s6191_s28 = smov 33  }
  0x37   :  { %7344 = sst [smem:[#allocation82_spill]] %s6375_s29 }
  0x38   :  { %s6395_s29 = sld [smem:[%s7262_s0 + %s6188_s7]]   ;;  %s6192_s7 = smov 34  }
  0x39   :  { %7345 = sst [smem:[#allocation83_spill]] %s6385_s19 }
  0x3a   :  { %s6405_s19 = sld [smem:[%s7262_s0 + %s6190_s22]]   ;;  %s6194_s22 = smov 36  }
  0x3b   :  { %s6410_s20 = sld [smem:[%s7262_s0 + %s6191_s28]]   ;;  %s6195_s28 = smov 37  }
  0x3c   :  { %7346 = sst [smem:[#allocation84_spill]] %s6390_s5 }
  0x3d   :  { %s6420_s24 = sld [smem:[%s7262_s0 + %s6193_s15]]   ;;  %s6197_s15 = smov 39  }
  0x3e   :  { %7347 = sst [smem:[#allocation85_spill]] %s6395_s29 }
  0x3f   :  { %s6415_s29 = sld [smem:[%s7262_s0 + %s6192_s7]]   ;;  %s6196_s7 = smov 38  }
  0x40   :  { %7348 = sst [smem:[#allocation86_spill]] %s6405_s19 }
  0x41   :  { %s6425_s19 = sld [smem:[%s7262_s0 + %s6194_s22]]   ;;  %s6198_s22 = smov 40  }
  0x42   :  { %s6430_s8 = sld [smem:[%s7262_s0 + %s6195_s28]]   ;;  %s6199_s28 = smov 41  }
  0x43   :  { %7350 = sst [smem:[#allocation88_spill]] %s6420_s24 }
  0x44   :  { %s6440_s24 = sld [smem:[%s7262_s0 + %s6197_s15]]  }
  0x45   :  { %7349 = sst [smem:[#allocation87_spill]] %s6415_s29 }
  0x46   :  { %s6435_s29 = sld [smem:[%s7262_s0 + %s6196_s7]]  }
  0x47   :  { %7351 = sst [smem:[#allocation89_spill]] %s6425_s19 }
  0x48   :  { %7352 = sst [smem:[#allocation90_spill]] %s6430_s8 }
  0x49   :  { %s6445_s19 = sld [smem:[%s7262_s0 + %s6198_s22]]  }
  0x4a   :  { %s6450_s8 = sld [smem:[%s7262_s0 + %s6199_s28]]  }
  0x4f   :  { %7353 = sst [smem:[#allocation91_spill]] %s6445_s19 }
  0x50   :  { %7354 = sst [smem:[#allocation92_spill]] %s6450_s8 }
  0x51   :  { %88 = vsyncpa [#allocation3], 0 }
  0x52   :  { %90 = vsyncpa [#allocation3 + $0x1], 0 }
  0x53   :  { %91 = vsyncpa [#allocation5], 0 }
  0x54   :  { %92 = vsyncpa [#allocation8], 0 }
  0x55   :  { %93 = vsyncpa [#allocation11], 0 }
  0x56   :  { %94 = vsyncpa [#allocation14], 0 }
  0x57   :  { %95 = vsyncpa [#allocation17], 0 }
  0x58   :  { %96 = vsyncpa [#allocation20], 0 }
  0x59   :  { %97 = vsyncpa [#allocation23], 0 }
  0x5a   :  { %98 = vsyncpa [#allocation26], 0 }
  0x5b   :  { %99 = vsyncpa [#allocation29], 0 }
  0x5c   :  { %100 = vsyncpa [#allocation32], 0 }
  0x5d   :  { %101 = vsyncpa [#allocation35], 0 }
  0x5e   :  { %102 = vsyncpa [#allocation38], 0 }
  0x5f   :  { %103 = vsyncpa [#allocation41], 0 }
  0x60   :  { %104 = vsyncpa [#allocation4], 0 }
  0x61   :  { %106 = vsyncpa [#allocation4 + $0x1], 0  ;;  %s6452_s7 = smov 0   ;;  %s6454_s0 = smov 0  }
  0x62   :  { %s6456_s10 = smov 0   ;;  %s6458_s11 = smov 0  }
  0x63 LB: > { %s7355_s14 = sld [smem:[#allocation67_spill]]  ;;  %s7356_s13 = sld [smem:[#allocation61_spill]]  ;;  %s6157_s11 = sphi %s6458_s11, %s7434_s11   ;;  %s6153_s10 = sphi %s6456_s10, %s7433_s10   ;;  %s6149_s0 = sphi %s6454_s0, %s7432_s0   ;;  %s6145_s7 = sphi %s6452_s7, %s7431_s7  }
  0x64   : > { %s7357_s12 = sld [smem:[#allocation72_spill]]  ;;  %s7358_s9 = sld [smem:[#allocation60_spill]] }
  0x65   : > { %s7359_s5 = sld [smem:[#allocation84_spill]]  ;;  %s7360_s4 = sld [smem:[#allocation78_spill]] }
  0x66   : > { %s7361_s6 = sld [smem:[#allocation76_spill]]  ;;  %s7362_s3 = sld [smem:[#allocation65_spill]] }
  0x67   : > { %s6200_s15 = smov [#allocation7]   ;;  %s6473_s18 = sadd.s32 4294967295, %s6157_s11  }
  0x68   : > { %s1031_s16 = sshll.u32 %s6200_s15, 4  ;;  %p4352_p0 = scmp.ge.s32.totalorder %s6157_s11, 1  ;;  %s6478_s16 = int_to_ptr.vmem [resolvable:$true] %s1031_s16 }
  0x69   : > { %p7286_p1 = scmp.eq.s32.totalorder %s6473_s18, 0  ;;  %p1009_p2 = scmp.lt.s32.totalorder %s6157_s11, 3 }
  0x6a   : > { %s6201_s23 = smov [#allocation10]   ;;  %s6202_s28 = smov [#allocation13]  }
  0x6b   : > { %p6480_p3 = pnand %p4352_p0, %p1009_p2  ;;  %s1062_s26 = sshll.u32 %s6201_s23, 4  ;;  %s6487_s26 = int_to_ptr.vmem [resolvable:$true] %s1062_s26 }
  0x6c   : > { %s1084_s1 = sshll.u32 %s6202_s28, 4  ;;  %s6203_s15 = smov [#allocation16]   ;;  %s6495_s1 = int_to_ptr.vmem [resolvable:$true] %s1084_s1 }
  0x6d   : > { %s7363_s22 = scalar_select %p6480_p3, 1, 0 }
  0x6e   : > { %p5009_p5 = pneg %p6480_p3  ;;  %s6497_s8 = sshll.u32 %s6203_s15, 4  ;;  %s1116_s8 = int_to_ptr.vmem [resolvable:$true] %s6497_s8 }
  0x6f   : > { %s5324_s19 = scalar_lea.hbm %s7356_s13, 16 }
  0x70   : > { %p6491_p6 = pnand %p5009_p5, %p7286_p1  ;;  %p5325_p7 = scmp.ne.s32.totalorder %s7356_s13, %s5324_s19 }
  0x71   : > { %p5331_p11 = scmp.lt.u32.totalorder %s5324_s19, %s7356_s13 }
  0x72   : > { %p6503_p8 = pneg %p6491_p6 }
  0x74   : > { %p5327_p9 = pnand %p6503_p8, %p5325_p7 }
  0x76   : > { %p5328_p10 = pneg %p5327_p9 }
  0x78   : > { %p5333_p12 = pnand %p5331_p11, %p5328_p10 }
  0x7a   : > { %5336 = shalt.err (!%p5333_p12)
}
  0x7b   : > { %s5337_s28 = scalar_lea.vmem %s6478_s16, 16  ;;  %s5344_s15 = scalar_lea.vmem %s6478_s16, 32 }
  0x7c   : > { %p5338_p13 = scmp.ne.s32.totalorder %s6478_s16, %s5337_s28  ;;  %p5345_p5 = scmp.lt.s32.totalorder %s6478_s16, %s6478_s16 }
  0x7d   : > { %p5346_p4 = scmp.lt.s32.totalorder %s5344_s15, %s5337_s28 }
  0x7e   : > { %p5340_p0 = pnand %p5338_p13, %p6503_p8 }
  0x7f   : > { %p5347_p1 = por %p5346_p4, %p5345_p5 }
  0x80   : > { %p5341_p2 = pneg %p5340_p0 }
  0x82   : > { %p5348_p7 = pnand %p5347_p1, %p5341_p2 }
  0x84   : > { %5351 = shalt.err (!%p5348_p7)
}
  0x85   : > { %5015 = dma.hbm_to_vmem [thread:$0]  (!%p6491_p6), %s7356_s13, 16, %s6478_s16, [#allocation8]  }
  0x86   : > { %s5352_s19 = scalar_lea.hbm %s7362_s3, 16 }
  0x87   : > { %p5353_p9 = scmp.ne.s32.totalorder %s7362_s3, %s5352_s19  ;;  %p5359_p12 = scmp.lt.u32.totalorder %s5352_s19, %s7362_s3 }
  0x89   : > { %p5355_p10 = pnand %p5353_p9, %p6503_p8 }
  0x8b   : > { %p5356_p11 = pneg %p5355_p10 }
  0x8d   : > { %p5361_p13 = pnand %p5359_p12, %p5356_p11 }
  0x8f   : > { %5364 = shalt.err (!%p5361_p13)
}
  0x90   : > { %s5365_s28 = scalar_lea.vmem %s6487_s26, 16  ;;  %s5372_s15 = scalar_lea.vmem %s6487_s26, 32 }
  0x91   : > { %p5366_p1 = scmp.ne.s32.totalorder %s6487_s26, %s5365_s28  ;;  %p5373_p2 = scmp.lt.s32.totalorder %s6487_s26, %s6487_s26 }
  0x92   : > { %p5374_p5 = scmp.lt.s32.totalorder %s5372_s15, %s5365_s28 }
  0x93   : > { %p5368_p4 = pnand %p5366_p1, %p6503_p8 }
  0x94   : > { %p5375_p7 = por %p5374_p5, %p5373_p2 }
  0x95   : > { %p5369_p0 = pneg %p5368_p4 }
  0x97   : > { %p5376_p9 = pnand %p5375_p7, %p5369_p0 }
  0x99   : > { %5379 = shalt.err (!%p5376_p9)
}
  0x9a   : > { %5021 = dma.hbm_to_vmem [thread:$0]  (!%p6491_p6), %s7362_s3, 16, %s6487_s26, [#allocation11]  }
  0x9b   : > { %s5380_s16 = scalar_lea.hbm %s7355_s14, 16 }
  0x9c   : > { %p5381_p10 = scmp.ne.s32.totalorder %s7355_s14, %s5380_s16  ;;  %p5387_p13 = scmp.lt.u32.totalorder %s5380_s16, %s7355_s14 }
  0x9e   : > { %p5383_p11 = pnand %p5381_p10, %p6503_p8 }
  0xa0   : > { %p5384_p12 = pneg %p5383_p11 }
  0xa2   : > { %p5389_p1 = pnand %p5387_p13, %p5384_p12 }
  0xa4   : > { %5392 = shalt.err (!%p5389_p1)
}
  0xa5   : > { %s5393_s19 = scalar_lea.vmem %s6495_s1, 16  ;;  %s5400_s28 = scalar_lea.vmem %s6495_s1, 32 }
  0xa6   : > { %p5394_p4 = scmp.ne.s32.totalorder %s6495_s1, %s5393_s19  ;;  %p5401_p5 = scmp.lt.s32.totalorder %s6495_s1, %s6495_s1 }
  0xa7   : > { %p5402_p7 = scmp.lt.s32.totalorder %s5400_s28, %s5393_s19 }
  0xa8   : > { %p5396_p0 = pnand %p5394_p4, %p6503_p8 }
  0xa9   : > { %p5403_p9 = por %p5402_p7, %p5401_p5 }
  0xaa   : > { %p5397_p2 = pneg %p5396_p0 }
  0xac   : > { %p5404_p10 = pnand %p5403_p9, %p5397_p2 }
  0xae   : > { %5407 = shalt.err (!%p5404_p10)
}
  0xaf   : > { %5027 = dma.hbm_to_vmem [thread:$0]  (!%p6491_p6), %s7355_s14, 16, %s6495_s1, [#allocation14]  }
  0xb0   : > { %s6204_s26 = smov [#allocation19]   ;;  %s5408_s16 = scalar_lea.hbm %s7357_s12, 16 }
  0xb1   : > { %s1137_s15 = sshll.u32 %s6204_s26, 4  ;;  %p5409_p11 = scmp.ne.s32.totalorder %s7357_s12, %s5408_s16  ;;  %s1138_s15 = int_to_ptr.vmem [resolvable:$true] %s1137_s15 }
  0xb2   : > { %p5415_p1 = scmp.lt.u32.totalorder %s5408_s16, %s7357_s12 }
  0xb3   : > { %p5411_p12 = pnand %p5409_p11, %p6503_p8 }
  0xb5   : > { %p5412_p13 = pneg %p5411_p12 }
  0xb7   : > { %p5417_p4 = pnand %p5415_p1, %p5412_p13 }
  0xb9   : > { %5420 = shalt.err (!%p5417_p4)
}
  0xba   : > { %s5421_s19 = scalar_lea.vmem %s1116_s8, 16  ;;  %s5428_s28 = scalar_lea.vmem %s1116_s8, 32 }
  0xbb   : > { %p5422_p0 = scmp.ne.s32.totalorder %s1116_s8, %s5421_s19  ;;  %p5429_p7 = scmp.lt.s32.totalorder %s1116_s8, %s1116_s8 }
  0xbc   : > { %p5430_p9 = scmp.lt.s32.totalorder %s5428_s28, %s5421_s19 }
  0xbd   : > { %p5424_p2 = pnand %p5422_p0, %p6503_p8 }
  0xbe   : > { %p5431_p10 = por %p5430_p9, %p5429_p7 }
  0xbf   : > { %p5425_p5 = pneg %p5424_p2 }
  0xc1   : > { %p5432_p3 = pnand %p5431_p10, %p5425_p5 }
  0xc3   : > { %5435 = shalt.err (!%p5432_p3)
}
  0xc4   : > { %5033 = dma.hbm_to_vmem [thread:$0]  (!%p6491_p6), %s7357_s12, 16, %s1116_s8, [#allocation17]  }
  0xc5   : > { %s5436_s1 = scalar_lea.hbm %s6325_s27, 16 }
  0xc6   : > { %p5437_p11 = scmp.ne.s32.totalorder %s6325_s27, %s5436_s1  ;;  %p5443_p1 = scmp.lt.u32.totalorder %s5436_s1, %s6325_s27 }
  0xc8   : > { %p5439_p12 = pnand %p5437_p11, %p6503_p8 }
  0xca   : > { %p5440_p13 = pneg %p5439_p12 }
  0xcc   : > { %p5445_p4 = pnand %p5443_p1, %p5440_p13 }
  0xce   : > { %5448 = shalt.err (!%p5445_p4)
}
  0xcf   : > { %s5449_s26 = scalar_lea.vmem %s1138_s15, 16  ;;  %s5456_s16 = scalar_lea.vmem %s1138_s15, 32 }
  0xd0   : > { %p5450_p3 = scmp.ne.s32.totalorder %s1138_s15, %s5449_s26  ;;  %p5457_p5 = scmp.lt.s32.totalorder %s1138_s15, %s1138_s15 }
  0xd1   : > { %p5458_p7 = scmp.lt.s32.totalorder %s5456_s16, %s5449_s26 }
  0xd2   : > { %p5452_p0 = pnand %p5450_p3, %p6503_p8 }
  0xd3   : > { %p5459_p9 = por %p5458_p7, %p5457_p5 }
  0xd4   : > { %p5453_p2 = pneg %p5452_p0 }
  0xd6   : > { %p5460_p10 = pnand %p5459_p9, %p5453_p2 }
  0xd8   : > { %5463 = shalt.err (!%p5460_p10)
}
  0xd9   : > { %5039 = dma.hbm_to_vmem [thread:$0]  (!%p6491_p6), %s6325_s27, 16, %s1138_s15, [#allocation20]  }
  0xda   : > { %s6205_s8 = smov [#allocation22]   ;;  %s6206_s28 = smov [#allocation25]  }
  0xdb   : > { %s1162_s19 = sshll.u32 %s6205_s8, 4  ;;  %s1183_s1 = sshll.u32 %s6206_s28, 4  ;;  %s1163_s19 = int_to_ptr.vmem [resolvable:$true] %s1162_s19  ;;  %s1184_s1 = int_to_ptr.vmem [resolvable:$true] %s1183_s1 }
  0xdc   : > { %s5464_s3 = scalar_lea.hbm %s7361_s6, 16 }
  0xdd   : > { %p5465_p11 = scmp.ne.s32.totalorder %s7361_s6, %s5464_s3  ;;  %p5471_p1 = scmp.lt.u32.totalorder %s5464_s3, %s7361_s6 }
  0xdf   : > { %p5467_p12 = pnand %p5465_p11, %p6503_p8 }
  0xe1   : > { %p5468_p13 = pneg %p5467_p12 }
  0xe3   : > { %p5473_p4 = pnand %p5471_p1, %p5468_p13 }
  0xe5   : > { %5476 = shalt.err (!%p5473_p4)
}
  0xe6   : > { %s5477_s26 = scalar_lea.vmem %s1163_s19, 16  ;;  %s5484_s15 = scalar_lea.vmem %s1163_s19, 32 }
  0xe7   : > { %p5478_p3 = scmp.ne.s32.totalorder %s1163_s19, %s5477_s26  ;;  %p5485_p5 = scmp.lt.s32.totalorder %s1163_s19, %s1163_s19 }
  0xe8   : > { %p5486_p7 = scmp.lt.s32.totalorder %s5484_s15, %s5477_s26 }
  0xe9   : > { %p5480_p0 = pnand %p5478_p3, %p6503_p8 }
  0xea   : > { %p5487_p9 = por %p5486_p7, %p5485_p5 }
  0xeb   : > { %p5481_p2 = pneg %p5480_p0 }
  0xed   : > { %p5488_p10 = pnand %p5487_p9, %p5481_p2 }
  0xef   : > { %5491 = shalt.err (!%p5488_p10)
}
  0xf0   : > { %5045 = dma.hbm_to_vmem [thread:$0]  (!%p6491_p6), %s7361_s6, 16, %s1163_s19, [#allocation23]  }
  0xf1   : > { %s5492_s3 = scalar_lea.hbm %s7360_s4, 512 }
  0xf2   : > { %p5493_p11 = scmp.ne.s32.totalorder %s7360_s4, %s5492_s3  ;;  %p5499_p1 = scmp.lt.u32.totalorder %s5492_s3, %s7360_s4 }
  0xf4   : > { %p5495_p12 = pnand %p5493_p11, %p6503_p8 }
  0xf6   : > { %p5496_p13 = pneg %p5495_p12 }
  0xf8   : > { %p5501_p4 = pnand %p5499_p1, %p5496_p13 }
  0xfa   : > { %5504 = shalt.err (!%p5501_p4)
}
  0xfb   : > { %s5505_s16 = scalar_lea.vmem %s1184_s1, 512  ;;  %p5513_p5 = scmp.lt.s32.totalorder %s1184_s1, %s1184_s1 }
  0xfc   : > { %p5506_p3 = scmp.ne.s32.totalorder %s1184_s1, %s5505_s16  ;;  %p5514_p7 = scmp.lt.s32.totalorder %s5505_s16, %s5505_s16 }
  0xfe   : > { %p5508_p0 = pnand %p5506_p3, %p6503_p8  ;;  %p5515_p9 = por %p5514_p7, %p5513_p5 }
 0x100   : > { %p5509_p2 = pneg %p5508_p0 }
 0x102   : > { %p5516_p10 = pnand %p5515_p9, %p5509_p2 }
 0x104   : > { %5519 = shalt.err (!%p5516_p10)
}
 0x105   : > { %s7290_s8 = smov 128   ;;  %s7292_s19 = smov 8  }
 0x106   : > { %5051 = dma.hbm_to_vmem [thread:$0]  (!%p6491_p6), %s7360_s4, 512, %s1184_s1, [#allocation26], %s7290_s8, %s7290_s8, %s7292_s19  }
 0x107   : > { %s6209_s28 = smov [#allocation28]   ;;  %s6210_s15 = smov [#allocation31]  }
 0x108   : > { %s1211_s26 = sshll.u32 %s6209_s28, 4  ;;  %s1238_s3 = sshll.u32 %s6210_s15, 4  ;;  %s1212_s26 = int_to_ptr.vmem [resolvable:$true] %s1211_s26  ;;  %s1239_s3 = int_to_ptr.vmem [resolvable:$true] %s1238_s3 }
 0x109   : > { %s5520_s16 = scalar_lea.hbm %s6365_s21, 16 }
 0x10a   : > { %p5521_p11 = scmp.ne.s32.totalorder %s6365_s21, %s5520_s16  ;;  %p5527_p1 = scmp.lt.u32.totalorder %s5520_s16, %s6365_s21 }
 0x10c   : > { %p5523_p12 = pnand %p5521_p11, %p6503_p8 }
 0x10e   : > { %p5524_p13 = pneg %p5523_p12 }
 0x110   : > { %p5529_p4 = pnand %p5527_p1, %p5524_p13 }
 0x112   : > { %5532 = shalt.err (!%p5529_p4)
}
 0x113   : > { %s5533_s6 = scalar_lea.vmem %s1212_s26, 16  ;;  %s5540_s1 = scalar_lea.vmem %s1212_s26, 32 }
 0x114   : > { %p5534_p3 = scmp.ne.s32.totalorder %s1212_s26, %s5533_s6  ;;  %p5541_p5 = scmp.lt.s32.totalorder %s1212_s26, %s1212_s26 }
 0x115   : > { %p5542_p7 = scmp.lt.s32.totalorder %s5540_s1, %s5533_s6 }
 0x116   : > { %p5536_p0 = pnand %p5534_p3, %p6503_p8 }
 0x117   : > { %p5543_p9 = por %p5542_p7, %p5541_p5 }
 0x118   : > { %p5537_p2 = pneg %p5536_p0 }
 0x11a   : > { %p5544_p10 = pnand %p5543_p9, %p5537_p2 }
 0x11c   : > { %5547 = shalt.err (!%p5544_p10)
}
 0x11d   : > { %5057 = dma.hbm_to_vmem [thread:$0]  (!%p6491_p6), %s6365_s21, 16, %s1212_s26, [#allocation29]  }
 0x11e   : > { %s5548_s28 = scalar_lea.hbm %s6380_s25, 16 }
 0x11f   : > { %p5549_p11 = scmp.ne.s32.totalorder %s6380_s25, %s5548_s28  ;;  %p5555_p1 = scmp.lt.u32.totalorder %s5548_s28, %s6380_s25 }
 0x121   : > { %p5551_p12 = pnand %p5549_p11, %p6503_p8 }
 0x123   : > { %p5552_p13 = pneg %p5551_p12 }
 0x125   : > { %p5557_p4 = pnand %p5555_p1, %p5552_p13 }
 0x127   : > { %5560 = shalt.err (!%p5557_p4)
}
 0x128   : > { %s5561_s6 = scalar_lea.vmem %s1239_s3, 16  ;;  %s5568_s15 = scalar_lea.vmem %s1239_s3, 32 }
 0x129   : > { %p5562_p3 = scmp.ne.s32.totalorder %s1239_s3, %s5561_s6  ;;  %p5569_p5 = scmp.lt.s32.totalorder %s1239_s3, %s1239_s3 }
 0x12a   : > { %p5570_p7 = scmp.lt.s32.totalorder %s5568_s15, %s5561_s6 }
 0x12b   : > { %p5564_p0 = pnand %p5562_p3, %p6503_p8 }
 0x12c   : > { %p5571_p9 = por %p5570_p7, %p5569_p5 }
 0x12d   : > { %p5565_p2 = pneg %p5564_p0 }
 0x12f   : > { %p5572_p10 = pnand %p5571_p9, %p5565_p2 }
 0x131   : > { %5575 = shalt.err (!%p5572_p10)
}
 0x132   : > { %5063 = dma.hbm_to_vmem [thread:$0]  (!%p6491_p6), %s6380_s25, 16, %s1239_s3, [#allocation32]  }
 0x133   : > { %s6211_s26 = smov [#allocation34]   ;;  %s6212_s1 = smov [#allocation37]  }
 0x134   : > { %s1260_s16 = sshll.u32 %s6211_s26, 4  ;;  %s1284_s28 = sshll.u32 %s6212_s1, 4  ;;  %s1261_s16 = int_to_ptr.vmem [resolvable:$true] %s1260_s16  ;;  %s1285_s28 = int_to_ptr.vmem [resolvable:$true] %s1284_s28 }
 0x135   : > { %s5576_s8 = scalar_lea.hbm %s7359_s5, 16 }
 0x136   : > { %p5577_p11 = scmp.ne.s32.totalorder %s7359_s5, %s5576_s8  ;;  %p5583_p1 = scmp.lt.u32.totalorder %s5576_s8, %s7359_s5 }
 0x138   : > { %p5579_p12 = pnand %p5577_p11, %p6503_p8 }
 0x13a   : > { %p5580_p13 = pneg %p5579_p12 }
 0x13c   : > { %p5585_p4 = pnand %p5583_p1, %p5580_p13 }
 0x13e   : > { %5588 = shalt.err (!%p5585_p4)
}
 0x13f   : > { %s5589_s6 = scalar_lea.vmem %s1261_s16, 16  ;;  %s5596_s3 = scalar_lea.vmem %s1261_s16, 32 }
 0x140   : > { %p5590_p3 = scmp.ne.s32.totalorder %s1261_s16, %s5589_s6  ;;  %p5597_p5 = scmp.lt.s32.totalorder %s1261_s16, %s1261_s16 }
 0x141   : > { %p5598_p7 = scmp.lt.s32.totalorder %s5596_s3, %s5589_s6 }
 0x142   : > { %p5592_p0 = pnand %p5590_p3, %p6503_p8 }
 0x143   : > { %p5599_p9 = por %p5598_p7, %p5597_p5 }
 0x144   : > { %p5593_p2 = pneg %p5592_p0 }
 0x146   : > { %p5600_p10 = pnand %p5599_p9, %p5593_p2 }
 0x148   : > { %5603 = shalt.err (!%p5600_p10)
}
 0x149   : > { %5069 = dma.hbm_to_vmem [thread:$0]  (!%p6491_p6), %s7359_s5, 16, %s1261_s16, [#allocation35]  }
 0x14a   : > { %s5604_s8 = scalar_lea.hbm %s6400_s30, 16 }
 0x14b   : > { %p5605_p11 = scmp.ne.s32.totalorder %s6400_s30, %s5604_s8  ;;  %p5611_p1 = scmp.lt.u32.totalorder %s5604_s8, %s6400_s30 }
 0x14d   : > { %p5607_p12 = pnand %p5605_p11, %p6503_p8 }
 0x14f   : > { %p5608_p13 = pneg %p5607_p12 }
 0x151   : > { %p5613_p4 = pnand %p5611_p1, %p5608_p13 }
 0x153   : > { %5616 = shalt.err (!%p5613_p4)
}
 0x154   : > { %s5617_s15 = scalar_lea.vmem %s1285_s28, 16  ;;  %s5624_s26 = scalar_lea.vmem %s1285_s28, 32 }
 0x155   : > { %p5618_p3 = scmp.ne.s32.totalorder %s1285_s28, %s5617_s15  ;;  %p5625_p5 = scmp.lt.s32.totalorder %s1285_s28, %s1285_s28 }
 0x156   : > { %p5626_p7 = scmp.lt.s32.totalorder %s5624_s26, %s5617_s15 }
 0x157   : > { %p5620_p0 = pnand %p5618_p3, %p6503_p8 }
 0x158   : > { %p5627_p9 = por %p5626_p7, %p5625_p5 }
 0x159   : > { %p5621_p2 = pneg %p5620_p0 }
 0x15b   : > { %p5628_p10 = pnand %p5627_p9, %p5621_p2 }
 0x15d   : > { %5631 = shalt.err (!%p5628_p10)
}
 0x15e   : > { %5075 = dma.hbm_to_vmem [thread:$0]  (!%p6491_p6), %s6400_s30, 16, %s1285_s28, [#allocation38]  }
 0x15f   : > { %s6213_s16 = smov [#allocation40]   ;;  %s5632_s6 = scalar_lea.hbm %s6410_s20, 16 }
 0x160   : > { %s1306_s1 = sshll.u32 %s6213_s16, 4  ;;  %p5633_p11 = scmp.ne.s32.totalorder %s6410_s20, %s5632_s6  ;;  %s1307_s1 = int_to_ptr.vmem [resolvable:$true] %s1306_s1 }
 0x161   : > { %p5639_p1 = scmp.lt.u32.totalorder %s5632_s6, %s6410_s20 }
 0x162   : > { %p5635_p12 = pnand %p5633_p11, %p6503_p8 }
 0x164   : > { %p5636_p13 = pneg %p5635_p12 }
 0x166   : > { %p5641_p4 = pnand %p5639_p1, %p5636_p13 }
 0x168   : > { %5644 = shalt.err (!%p5641_p4)
}
 0x169   : > { %s5645_s3 = scalar_lea.vmem %s1307_s1, 16  ;;  %s5652_s8 = scalar_lea.vmem %s1307_s1, 32 }
 0x16a   : > { %p5646_p3 = scmp.ne.s32.totalorder %s1307_s1, %s5645_s3  ;;  %p5653_p5 = scmp.lt.s32.totalorder %s1307_s1, %s1307_s1 }
 0x16b   : > { %p5654_p7 = scmp.lt.s32.totalorder %s5652_s8, %s5645_s3 }
 0x16c   : > { %p5648_p0 = pnand %p5646_p3, %p6503_p8 }
 0x16d   : > { %p5655_p9 = por %p5654_p7, %p5653_p5 }
 0x16e   : > { %p5649_p2 = pneg %p5648_p0 }
 0x170   : > { %p5656_p10 = pnand %p5655_p9, %p5649_p2 }
 0x172   : > { %5659 = shalt.err (!%p5656_p10)
}
 0x173   : > { %5081 = dma.hbm_to_vmem [thread:$0]  (!%p6491_p6), %s6410_s20, 16, %s1307_s1, [#allocation41]  }
 0x174   : > { %s5660_s28 = scalar_lea.hbm %s7358_s9, 16 }
 0x175   : > { %p5661_p11 = scmp.ne.s32.totalorder %s7358_s9, %s5660_s28  ;;  %p5667_p1 = scmp.lt.u32.totalorder %s5660_s28, %s7358_s9 }
 0x177   : > { %p5663_p12 = pnand %p5661_p11, %p6503_p8 }
 0x179   : > { %p5664_p13 = pneg %p5663_p12 }
 0x17b   : > { %p5669_p4 = pnand %p5667_p1, %p5664_p13 }
 0x17d   : > { %5672 = shalt.err (!%p5669_p4)
}
 0x17e   : > { %s6214_s15 = smov [#allocation6]   ;;  %s6215_s26 = smov [#allocation9]  }
 0x17f   : > { %5012 = dma.hbm_to_smem (!%p6491_p6), %s7358_s9, 16, %s6214_s15, [#allocation5]  }
 0x180   : > { %s1042_s16 = sshll.u32 %s6215_s26, 4  ;;  %s6216_s1 = smov [#allocation12]   ;;  %s1043_s16 = int_to_ptr.vmem [resolvable:$true] %s1042_s16 }
 0x181   : > { %s1073_s6 = sshll.u32 %s6216_s1, 4  ;;  %s5673_s3 = scalar_lea.hbm %s6260_s17, 16  ;;  %s1074_s6 = int_to_ptr.vmem [resolvable:$true] %s1073_s6 }
 0x182   : > { %p5674_p3 = scmp.ne.s32.totalorder %s6260_s17, %s5673_s3  ;;  %p5680_p5 = scmp.lt.u32.totalorder %s5673_s3, %s6260_s17 }
 0x184   : > { %p5676_p0 = pnand %p5674_p3, %p6503_p8 }
 0x186   : > { %p5677_p2 = pneg %p5676_p0 }
 0x188   : > { %p5682_p7 = pnand %p5680_p5, %p5677_p2 }
 0x18a   : > { %5685 = shalt.err (!%p5682_p7)
}
 0x18b   : > { %s5686_s8 = scalar_lea.vmem %s1043_s16, 16  ;;  %s5693_s28 = scalar_lea.vmem %s1043_s16, 32 }
 0x18c   : > { %p5687_p9 = scmp.ne.s32.totalorder %s1043_s16, %s5686_s8  ;;  %p5694_p12 = scmp.lt.s32.totalorder %s1043_s16, %s1043_s16 }
 0x18d   : > { %p5695_p13 = scmp.lt.s32.totalorder %s5693_s28, %s5686_s8 }
 0x18e   : > { %p5689_p10 = pnand %p5687_p9, %p6503_p8 }
 0x18f   : > { %p5696_p1 = por %p5695_p13, %p5694_p12 }
 0x190   : > { %p5690_p11 = pneg %p5689_p10 }
 0x192   : > { %p5697_p4 = pnand %p5696_p1, %p5690_p11 }
 0x194   : > { %5700 = shalt.err (!%p5697_p4)
}
 0x195   : > { %s7366_s15 = sld [smem:[#allocation66_spill]] }
 0x196   : > { %5018 = dma.hbm_to_vmem [thread:$0]  (!%p6491_p6), %s6260_s17, 16, %s1043_s16, [#allocation8]  }
 0x19b   : > { %s5701_s26 = scalar_lea.hbm %s7366_s15, 16 }
 0x19c   : > { %p5702_p3 = scmp.ne.s32.totalorder %s7366_s15, %s5701_s26  ;;  %p5708_p5 = scmp.lt.u32.totalorder %s5701_s26, %s7366_s15 }
 0x19e   : > { %p5704_p0 = pnand %p5702_p3, %p6503_p8 }
 0x1a0   : > { %p5705_p2 = pneg %p5704_p0 }
 0x1a2   : > { %p5710_p7 = pnand %p5708_p5, %p5705_p2 }
 0x1a4   : > { %5713 = shalt.err (!%p5710_p7)
}
 0x1a5   : > { %s5714_s1 = scalar_lea.vmem %s1074_s6, 16  ;;  %s5721_s3 = scalar_lea.vmem %s1074_s6, 32 }
 0x1a6   : > { %p5715_p9 = scmp.ne.s32.totalorder %s1074_s6, %s5714_s1  ;;  %p5722_p12 = scmp.lt.s32.totalorder %s1074_s6, %s1074_s6 }
 0x1a7   : > { %p5723_p13 = scmp.lt.s32.totalorder %s5721_s3, %s5714_s1 }
 0x1a8   : > { %p5717_p10 = pnand %p5715_p9, %p6503_p8 }
 0x1a9   : > { %p5724_p1 = por %p5723_p13, %p5722_p12 }
 0x1aa   : > { %p5718_p11 = pneg %p5717_p10 }
 0x1ac   : > { %p5725_p4 = pnand %p5724_p1, %p5718_p11 }
 0x1ae   : > { %5728 = shalt.err (!%p5725_p4)
}
 0x1af   : > { %s7367_s16 = sld [smem:[#allocation69_spill]]  ;;  %s6217_s8 = smov [#allocation15]  }
 0x1b0   : > { %5024 = dma.hbm_to_vmem [thread:$0]  (!%p6491_p6), %s7366_s15, 16, %s1074_s6, [#allocation11]  }
 0x1b1   : > { %s1098_s28 = sshll.u32 %s6217_s8, 4  ;;  %s6218_s26 = smov [#allocation18]   ;;  %s1099_s28 = int_to_ptr.vmem [resolvable:$true] %s1098_s28 }
 0x1b2   : > { %s1126_s19 = sshll.u32 %s6218_s26, 4  ;;  %s1127_s19 = int_to_ptr.vmem [resolvable:$true] %s1126_s19 }
 0x1b5   : > { %s5729_s4 = scalar_lea.hbm %s7367_s16, 16 }
 0x1b6   : > { %p5730_p3 = scmp.ne.s32.totalorder %s7367_s16, %s5729_s4  ;;  %p5736_p5 = scmp.lt.u32.totalorder %s5729_s4, %s7367_s16 }
 0x1b8   : > { %p5732_p0 = pnand %p5730_p3, %p6503_p8 }
 0x1ba   : > { %p5733_p2 = pneg %p5732_p0 }
 0x1bc   : > { %p5738_p7 = pnand %p5736_p5, %p5733_p2 }
 0x1be   : > { %5741 = shalt.err (!%p5738_p7)
}
 0x1bf   : > { %s5742_s1 = scalar_lea.vmem %s1099_s28, 16  ;;  %s5749_s6 = scalar_lea.vmem %s1099_s28, 32 }
 0x1c0   : > { %p5743_p9 = scmp.ne.s32.totalorder %s1099_s28, %s5742_s1  ;;  %p5750_p12 = scmp.lt.s32.totalorder %s1099_s28, %s1099_s28 }
 0x1c1   : > { %p5751_p13 = scmp.lt.s32.totalorder %s5749_s6, %s5742_s1 }
 0x1c2   : > { %p5745_p10 = pnand %p5743_p9, %p6503_p8 }
 0x1c3   : > { %p5752_p1 = por %p5751_p13, %p5750_p12 }
 0x1c4   : > { %p5746_p11 = pneg %p5745_p10 }
 0x1c6   : > { %p5753_p4 = pnand %p5752_p1, %p5746_p11 }
 0x1c8   : > { %5756 = shalt.err (!%p5753_p4)
}
 0x1c9   : > { %s7368_s3 = sld [smem:[#allocation73_spill]] }
 0x1ca   : > { %5030 = dma.hbm_to_vmem [thread:$0]  (!%p6491_p6), %s7367_s16, 16, %s1099_s28, [#allocation14]  }
 0x1cf   : > { %s5757_s4 = scalar_lea.hbm %s7368_s3, 16 }
 0x1d0   : > { %p5758_p3 = scmp.ne.s32.totalorder %s7368_s3, %s5757_s4  ;;  %p5764_p5 = scmp.lt.u32.totalorder %s5757_s4, %s7368_s3 }
 0x1d2   : > { %p5760_p0 = pnand %p5758_p3, %p6503_p8 }
 0x1d4   : > { %p5761_p2 = pneg %p5760_p0 }
 0x1d6   : > { %p5766_p7 = pnand %p5764_p5, %p5761_p2 }
 0x1d8   : > { %5769 = shalt.err (!%p5766_p7)
}
 0x1d9   : > { %s5770_s8 = scalar_lea.vmem %s1127_s19, 16  ;;  %s5777_s26 = scalar_lea.vmem %s1127_s19, 32 }
 0x1da   : > { %p5771_p9 = scmp.ne.s32.totalorder %s1127_s19, %s5770_s8  ;;  %p5778_p12 = scmp.lt.s32.totalorder %s1127_s19, %s1127_s19 }
 0x1db   : > { %p5779_p13 = scmp.lt.s32.totalorder %s5777_s26, %s5770_s8 }
 0x1dc   : > { %p5773_p10 = pnand %p5771_p9, %p6503_p8 }
 0x1dd   : > { %p5780_p1 = por %p5779_p13, %p5778_p12 }
 0x1de   : > { %p5774_p11 = pneg %p5773_p10 }
 0x1e0   : > { %p5781_p4 = pnand %p5780_p1, %p5774_p11 }
 0x1e2   : > { %5784 = shalt.err (!%p5781_p4)
}
 0x1e3   : > { %s7369_s28 = sld [smem:[#allocation75_spill]]  ;;  %s6219_s1 = smov [#allocation21]  }
 0x1e4   : > { %5036 = dma.hbm_to_vmem [thread:$0]  (!%p6491_p6), %s7368_s3, 16, %s1127_s19, [#allocation17]  }
 0x1e5   : > { %s1151_s6 = sshll.u32 %s6219_s1, 4  ;;  %s6220_s4 = smov [#allocation24]   ;;  %s1152_s6 = int_to_ptr.vmem [resolvable:$true] %s1151_s6 }
 0x1e6   : > { %s1173_s5 = sshll.u32 %s6220_s4, 4  ;;  %s1174_s5 = int_to_ptr.vmem [resolvable:$true] %s1173_s5 }
 0x1e9   : > { %s5785_s9 = scalar_lea.hbm %s7369_s28, 16 }
 0x1ea   : > { %p5786_p3 = scmp.ne.s32.totalorder %s7369_s28, %s5785_s9  ;;  %p5792_p5 = scmp.lt.u32.totalorder %s5785_s9, %s7369_s28 }
 0x1ec   : > { %p5788_p0 = pnand %p5786_p3, %p6503_p8 }
 0x1ee   : > { %p5789_p2 = pneg %p5788_p0 }
 0x1f0   : > { %p5794_p7 = pnand %p5792_p5, %p5789_p2 }
 0x1f2   : > { %5797 = shalt.err (!%p5794_p7)
}
 0x1f3   : > { %s5798_s8 = scalar_lea.vmem %s1152_s6, 16  ;;  %s5805_s19 = scalar_lea.vmem %s1152_s6, 32 }
 0x1f4   : > { %p5799_p9 = scmp.ne.s32.totalorder %s1152_s6, %s5798_s8  ;;  %p5806_p12 = scmp.lt.s32.totalorder %s1152_s6, %s1152_s6 }
 0x1f5   : > { %p5807_p13 = scmp.lt.s32.totalorder %s5805_s19, %s5798_s8 }
 0x1f6   : > { %p5801_p10 = pnand %p5799_p9, %p6503_p8 }
 0x1f7   : > { %p5808_p1 = por %p5807_p13, %p5806_p12 }
 0x1f8   : > { %p5802_p11 = pneg %p5801_p10 }
 0x1fa   : > { %p5809_p4 = pnand %p5808_p1, %p5802_p11 }
 0x1fc   : > { %5812 = shalt.err (!%p5809_p4)
}
 0x1fd   : > { %s7370_s26 = sld [smem:[#allocation77_spill]] }
 0x1fe   : > { %5042 = dma.hbm_to_vmem [thread:$0]  (!%p6491_p6), %s7369_s28, 16, %s1152_s6, [#allocation20]  }
 0x203   : > { %s5813_s9 = scalar_lea.hbm %s7370_s26, 16 }
 0x204   : > { %p5814_p3 = scmp.ne.s32.totalorder %s7370_s26, %s5813_s9  ;;  %p5820_p5 = scmp.lt.u32.totalorder %s5813_s9, %s7370_s26 }
 0x206   : > { %p5816_p0 = pnand %p5814_p3, %p6503_p8 }
 0x208   : > { %p5817_p2 = pneg %p5816_p0 }
 0x20a   : > { %p5822_p7 = pnand %p5820_p5, %p5817_p2 }
 0x20c   : > { %5825 = shalt.err (!%p5822_p7)
}
 0x20d   : > { %s5826_s1 = scalar_lea.vmem %s1174_s5, 16  ;;  %s5833_s4 = scalar_lea.vmem %s1174_s5, 32 }
 0x20e   : > { %p5827_p9 = scmp.ne.s32.totalorder %s1174_s5, %s5826_s1  ;;  %p5834_p12 = scmp.lt.s32.totalorder %s1174_s5, %s1174_s5 }
 0x20f   : > { %p5835_p13 = scmp.lt.s32.totalorder %s5833_s4, %s5826_s1 }
 0x210   : > { %p5829_p10 = pnand %p5827_p9, %p6503_p8 }
 0x211   : > { %p5836_p1 = por %p5835_p13, %p5834_p12 }
 0x212   : > { %p5830_p11 = pneg %p5829_p10 }
 0x214   : > { %p5837_p4 = pnand %p5836_p1, %p5830_p11 }
 0x216   : > { %5840 = shalt.err (!%p5837_p4)
}
 0x217   : > { %s7371_s6 = sld [smem:[#allocation79_spill]]  ;;  %s6221_s8 = smov [#allocation27]  }
 0x218   : > { %5048 = dma.hbm_to_vmem [thread:$0]  (!%p6491_p6), %s7370_s26, 16, %s1174_s5, [#allocation23]  }
 0x219   : > { %s1197_s19 = sshll.u32 %s6221_s8, 4  ;;  %s6222_s9 = smov [#allocation30]   ;;  %s1198_s19 = int_to_ptr.vmem [resolvable:$true] %s1197_s19 }
 0x21a   : > { %s1224_s3 = sshll.u32 %s6222_s9, 4  ;;  %s1225_s3 = int_to_ptr.vmem [resolvable:$true] %s1224_s3 }
 0x21d   : > { %s5841_s12 = scalar_lea.hbm %s7371_s6, 16 }
 0x21e   : > { %p5842_p3 = scmp.ne.s32.totalorder %s7371_s6, %s5841_s12  ;;  %p5848_p5 = scmp.lt.u32.totalorder %s5841_s12, %s7371_s6 }
 0x220   : > { %p5844_p0 = pnand %p5842_p3, %p6503_p8 }
 0x222   : > { %p5845_p2 = pneg %p5844_p0 }
 0x224   : > { %p5850_p7 = pnand %p5848_p5, %p5845_p2 }
 0x226   : > { %5853 = shalt.err (!%p5850_p7)
}
 0x227   : > { %s5854_s1 = scalar_lea.vmem %s1198_s19, 16  ;;  %s5861_s5 = scalar_lea.vmem %s1198_s19, 32 }
 0x228   : > { %p5855_p9 = scmp.ne.s32.totalorder %s1198_s19, %s5854_s1  ;;  %p5862_p12 = scmp.lt.s32.totalorder %s1198_s19, %s1198_s19 }
 0x229   : > { %p5863_p13 = scmp.lt.s32.totalorder %s5861_s5, %s5854_s1 }
 0x22a   : > { %p5857_p10 = pnand %p5855_p9, %p6503_p8 }
 0x22b   : > { %p5864_p1 = por %p5863_p13, %p5862_p12 }
 0x22c   : > { %p5858_p11 = pneg %p5857_p10 }
 0x22e   : > { %p5865_p4 = pnand %p5864_p1, %p5858_p11 }
 0x230   : > { %5868 = shalt.err (!%p5865_p4)
}
 0x231   : > { %s7372_s4 = sld [smem:[#allocation82_spill]] }
 0x232   : > { %5054 = dma.hbm_to_vmem [thread:$0]  (!%p6491_p6), %s7371_s6, 16, %s1198_s19, [#allocation26]  }
 0x237   : > { %s5869_s12 = scalar_lea.hbm %s7372_s4, 512 }
 0x238   : > { %p5870_p3 = scmp.ne.s32.totalorder %s7372_s4, %s5869_s12  ;;  %p5876_p5 = scmp.lt.u32.totalorder %s5869_s12, %s7372_s4 }
 0x23a   : > { %p5872_p0 = pnand %p5870_p3, %p6503_p8 }
 0x23c   : > { %p5873_p2 = pneg %p5872_p0 }
 0x23e   : > { %p5878_p7 = pnand %p5876_p5, %p5873_p2 }
 0x240   : > { %5881 = shalt.err (!%p5878_p7)
}
 0x241   : > { %s5882_s8 = scalar_lea.vmem %s1225_s3, 512  ;;  %p5890_p12 = scmp.lt.s32.totalorder %s1225_s3, %s1225_s3 }
 0x242   : > { %p5883_p9 = scmp.ne.s32.totalorder %s1225_s3, %s5882_s8  ;;  %p5891_p13 = scmp.lt.s32.totalorder %s5882_s8, %s5882_s8 }
 0x244   : > { %p5885_p10 = pnand %p5883_p9, %p6503_p8  ;;  %p5892_p1 = por %p5891_p13, %p5890_p12 }
 0x246   : > { %p5886_p11 = pneg %p5885_p10 }
 0x248   : > { %p5893_p4 = pnand %p5892_p1, %p5886_p11 }
 0x24a   : > { %5896 = shalt.err (!%p5893_p4)
}
 0x24b   : > { %s7373_s19 = smov 8   ;;  %s7374_s9 = smov 128  }
 0x24c   : > { %s7375_s1 = sld [smem:[#allocation83_spill]]  ;;  %s6223_s5 = smov [#allocation33]  }
 0x24d   : > { %5060 = dma.hbm_to_vmem [thread:$0]  (!%p6491_p6), %s7372_s4, 512, %s1225_s3, [#allocation29], %s7374_s9, %s7374_s9, %s7373_s19  }
 0x24e   : > { %s1249_s12 = sshll.u32 %s6223_s5, 4  ;;  %s6224_s6 = smov [#allocation36]   ;;  %s1250_s12 = int_to_ptr.vmem [resolvable:$true] %s1249_s12 }
 0x24f   : > { %s1270_s13 = sshll.u32 %s6224_s6, 4  ;;  %s1271_s13 = int_to_ptr.vmem [resolvable:$true] %s1270_s13 }
 0x252   : > { %s5897_s8 = scalar_lea.hbm %s7375_s1, 16 }
 0x253   : > { %p5898_p3 = scmp.ne.s32.totalorder %s7375_s1, %s5897_s8  ;;  %p5904_p5 = scmp.lt.u32.totalorder %s5897_s8, %s7375_s1 }
 0x255   : > { %p5900_p0 = pnand %p5898_p3, %p6503_p8 }
 0x257   : > { %p5901_p2 = pneg %p5900_p0 }
 0x259   : > { %p5906_p7 = pnand %p5904_p5, %p5901_p2 }
 0x25b   : > { %5909 = shalt.err (!%p5906_p7)
}
 0x25c   : > { %s5910_s14 = scalar_lea.vmem %s1250_s12, 16  ;;  %s5917_s3 = scalar_lea.vmem %s1250_s12, 32 }
 0x25d   : > { %p5911_p9 = scmp.ne.s32.totalorder %s1250_s12, %s5910_s14  ;;  %p5918_p12 = scmp.lt.s32.totalorder %s1250_s12, %s1250_s12 }
 0x25e   : > { %p5919_p13 = scmp.lt.s32.totalorder %s5917_s3, %s5910_s14 }
 0x25f   : > { %p5913_p10 = pnand %p5911_p9, %p6503_p8 }
 0x260   : > { %p5920_p1 = por %p5919_p13, %p5918_p12 }
 0x261   : > { %p5914_p11 = pneg %p5913_p10 }
 0x263   : > { %p5921_p4 = pnand %p5920_p1, %p5914_p11 }
 0x265   : > { %5924 = shalt.err (!%p5921_p4)
}
 0x266   : > { %s7376_s6 = sld [smem:[#allocation85_spill]] }
 0x267   : > { %5066 = dma.hbm_to_vmem [thread:$0]  (!%p6491_p6), %s7375_s1, 16, %s1250_s12, [#allocation32]  }
 0x26c   : > { %s5925_s5 = scalar_lea.hbm %s7376_s6, 512 }
 0x26d   : > { %p5926_p3 = scmp.ne.s32.totalorder %s7376_s6, %s5925_s5  ;;  %p5932_p5 = scmp.lt.u32.totalorder %s5925_s5, %s7376_s6 }
 0x26f   : > { %p5928_p0 = pnand %p5926_p3, %p6503_p8 }
 0x271   : > { %p5929_p2 = pneg %p5928_p0 }
 0x273   : > { %p5934_p7 = pnand %p5932_p5, %p5929_p2 }
 0x275   : > { %5937 = shalt.err (!%p5934_p7)
}
 0x276   : > { %s5938_s14 = scalar_lea.vmem %s1271_s13, 512  ;;  %p5946_p12 = scmp.lt.s32.totalorder %s1271_s13, %s1271_s13 }
 0x277   : > { %p5939_p9 = scmp.ne.s32.totalorder %s1271_s13, %s5938_s14  ;;  %p5947_p13 = scmp.lt.s32.totalorder %s5938_s14, %s5938_s14 }
 0x279   : > { %p5941_p10 = pnand %p5939_p9, %p6503_p8  ;;  %p5948_p1 = por %p5947_p13, %p5946_p12 }
 0x27b   : > { %p5942_p11 = pneg %p5941_p10 }
 0x27d   : > { %p5949_p4 = pnand %p5948_p1, %p5942_p11 }
 0x27f   : > { %5952 = shalt.err (!%p5949_p4)
}
 0x280   : > { %s7377_s12 = sld [smem:[#allocation86_spill]]  ;;  %s6225_s8 = smov [#allocation39]  }
 0x281   : > { %5072 = dma.hbm_to_vmem [thread:$0]  (!%p6491_p6), %s7376_s6, 512, %s1271_s13, [#allocation35], %s7374_s9, %s7374_s9, %s7373_s19  }
 0x282   : > { %s1295_s3 = sshll.u32 %s6225_s8, 4  ;;  %s6226_s5 = smov [#allocation42]   ;;  %s1296_s3 = int_to_ptr.vmem [resolvable:$true] %s1295_s3 }
 0x283   : > { %s1319_s1 = sshll.u32 %s6226_s5, 4  ;;  %s1320_s1 = int_to_ptr.vmem [resolvable:$true] %s1319_s1 }
 0x286   : > { %s5953_s14 = scalar_lea.hbm %s7377_s12, 16 }
 0x287   : > { %p5954_p3 = scmp.ne.s32.totalorder %s7377_s12, %s5953_s14  ;;  %p5960_p5 = scmp.lt.u32.totalorder %s5953_s14, %s7377_s12 }
 0x289   : > { %p5956_p0 = pnand %p5954_p3, %p6503_p8 }
 0x28b   : > { %p5957_p2 = pneg %p5956_p0 }
 0x28d   : > { %p5962_p7 = pnand %p5960_p5, %p5957_p2 }
 0x28f   : > { %5965 = shalt.err (!%p5962_p7)
}
 0x290   : > { %s5966_s4 = scalar_lea.vmem %s1296_s3, 16  ;;  %s5973_s13 = scalar_lea.vmem %s1296_s3, 32 }
 0x291   : > { %p5967_p9 = scmp.ne.s32.totalorder %s1296_s3, %s5966_s4  ;;  %p5974_p12 = scmp.lt.s32.totalorder %s1296_s3, %s1296_s3 }
 0x292   : > { %p5975_p13 = scmp.lt.s32.totalorder %s5973_s13, %s5966_s4 }
 0x293   : > { %p5969_p10 = pnand %p5967_p9, %p6503_p8 }
 0x294   : > { %p5976_p1 = por %p5975_p13, %p5974_p12 }
 0x295   : > { %p5970_p11 = pneg %p5969_p10 }
 0x297   : > { %p5977_p4 = pnand %p5976_p1, %p5970_p11 }
 0x299   : > { %5980 = shalt.err (!%p5977_p4)
}
 0x29a   : > { %s7378_s8 = sld [smem:[#allocation88_spill]] }
 0x29b   : > { %5078 = dma.hbm_to_vmem [thread:$0]  (!%p6491_p6), %s7377_s12, 16, %s1296_s3, [#allocation38]  }
 0x2a0   : > { %s5981_s5 = scalar_lea.hbm %s7378_s8, 512 }
 0x2a1   : > { %p5982_p3 = scmp.ne.s32.totalorder %s7378_s8, %s5981_s5  ;;  %p5988_p5 = scmp.lt.u32.totalorder %s5981_s5, %s7378_s8 }
 0x2a3   : > { %p5984_p0 = pnand %p5982_p3, %p6503_p8 }
 0x2a5   : > { %p5985_p2 = pneg %p5984_p0 }
 0x2a7   : > { %p5990_p7 = pnand %p5988_p5, %p5985_p2 }
 0x2a9   : > { %5993 = shalt.err (!%p5990_p7)
}
 0x2aa   : > { %s5994_s4 = scalar_lea.vmem %s1320_s1, 512  ;;  %p6002_p12 = scmp.lt.s32.totalorder %s1320_s1, %s1320_s1 }
 0x2ab   : > { %p5995_p9 = scmp.ne.s32.totalorder %s1320_s1, %s5994_s4  ;;  %p6003_p13 = scmp.lt.s32.totalorder %s5994_s4, %s5994_s4 }
 0x2ad   : > { %p5997_p10 = pnand %p5995_p9, %p6503_p8  ;;  %p6004_p1 = por %p6003_p13, %p6002_p12 }
 0x2af   : > { %p5998_p11 = pneg %p5997_p10 }
 0x2b1   : > { %p6005_p4 = pnand %p6004_p1, %p5998_p11 }
 0x2b3   : > { %6008 = shalt.err (!%p6005_p4)
}
 0x2b4   : > { %5084 = dma.hbm_to_vmem [thread:$0]  (!%p6491_p6), %s7378_s8, 512, %s1320_s1, [#allocation41], %s7374_s9, %s7374_s9, %s7373_s19  }
 0x2b5   : > { %s4351_s2 = sadd.s32 4294967294, %s6157_s11   ;;  %s6786_s23 = sadd.s32 1, %s6157_s11  }
 0x2b6   : > { %s119_s3 = sadd.s32 1, %s6153_s10  ;;  %s116_s14 = ssub.s32 %s6157_s11, %s6786_s23 }
 0x2b7   : > { %s7379_s13 = sld [smem:[#allocation59_spill]]  ;;  %p126_p8 = scmp.ne.s32.totalorder %s6153_s10, %s6149_s0 }
 0x2b8   : > { %p117_p3 = scmp.eq.s32.totalorder %s116_s14, 0  ;;  %p127_p0 = scmp.eq.s32.totalorder %s6157_s11, 0 }
 0x2b9   : > { %p132_p2 = scmp.ne.s32.totalorder %s6149_s0, %s6145_s7  ;;  %p996_p5 = scmp.eq.s32.totalorder %s6473_s18, 1 }
 0x2ba   : > { %s6798_s5 = scalar_select %p117_p3, %s6153_s10, %s119_s3  }
 0x2bb   : > { %p128_p7 = por %p127_p0, %p126_p8  ;;  %p7380_p9 = scmp.eq.s32.totalorder %s6473_s18, 0 }
 0x2bc   : > { %p6806_p6 = por %p996_p5, %p126_p8  ;;  %p1002_p11 = scmp.eq.s32.totalorder %s4351_s2, 1 }
 0x2bd   : > { %p6802_p10 = por %p7380_p9, %p132_p2  ;;  %p5118_p12 = scmp.lt.s32.totalorder %s6157_s11, 2 }
 0x2be   : > { %s7382_s9 = scalar_select %p6806_p6, 1, 0 }
 0x2bf   : > { %s7381_s19 = scalar_select %p6802_p10, 1, 0 }
 0x2c0   : > { %s1348_s1 = sand.u32 1, %s6153_s10   ;;  %p6812_p13 = por %p1002_p11, %p132_p2 }
 0x2c1   : > { %s4379_s3 = sshll.u32 %s1348_s1, 3  ;;  %s4380_s14 = sshll.u32 %s6157_s11, 7 }
 0x2c2   : > { %s7383_s4 = scalar_select %p6812_p13, 1, 0 }
 0x2c3   : > { %s6818_s6 = scalar_lea.hbm %s7379_s13, %s4380_s14  ;;  %s1352_s8 = scalar_lea.vmem [#allocation2], %s4379_s3 }
 0x2c4   : > { %s1359_s12 = sshll.u32 %s1352_s8, 4  ;;  %p6820_p1 = pnand %p5118_p12, %p128_p7  ;;  %s6824_s12 = int_to_ptr.vmem [resolvable:$true] %s1359_s12 }
 0x2c5   : > { %s1349_s15 = scalar_lea.sflag [#allocation3], %s1348_s1  ;;  %s6009_s16 = scalar_lea.hbm %s6818_s6, 128 }
 0x2c6   : > { %p6010_p4 = scmp.ne.s32.totalorder %s6818_s6, %s6009_s16  ;;  %p6011_p8 = pneg %p6820_p1 }
 0x2c7   : > { %s6014_s14 = scalar_lea.hbm %s7379_s13, 256  ;;  %p6015_p2 = scmp.lt.u32.totalorder %s6818_s6, %s7379_s13 }
 0x2c8   : > { %p6012_p3 = pnand %p6011_p8, %p6010_p4  ;;  %p6016_p5 = scmp.lt.u32.totalorder %s6014_s14, %s6009_s16 }
 0x2c9   : > { %p6018_p9 = scmp.lt.u32.totalorder %s6009_s16, %s6818_s6 }
 0x2ca   : > { %p6013_p0 = pneg %p6012_p3  ;;  %p6017_p7 = por %p6016_p5, %p6015_p2 }
 0x2cc   : > { %p6019_p11 = por %p6018_p9, %p6017_p7 }
 0x2ce   : > { %p6020_p12 = pnand %p6019_p11, %p6013_p0 }
 0x2d0   : > { %6023 = shalt.err (!%p6020_p12)
}
 0x2d1   : > { %s6024_s8 = scalar_lea.vmem %s6824_s12, 128  ;;  %s6227_s1 = smov [#allocation2]  }
 0x2d2   : > { %p6025_p13 = scmp.ne.s32.totalorder %s6824_s12, %s6024_s8  ;;  %s6029_s3 = sshll.u32 %s6227_s1, 4  ;;  %s6030_s3 = int_to_ptr.vmem [resolvable:$false] %s6029_s3 }
 0x2d3   : > { %s6031_s13 = scalar_lea.vmem %s6030_s3, 256  ;;  %p6032_p4 = scmp.lt.s32.totalorder %s6824_s12, %s6030_s3 }
 0x2d4   : > { %p6027_p6 = pnand %p6025_p13, %p6011_p8  ;;  %p6033_p3 = scmp.lt.s32.totalorder %s6031_s13, %s6024_s8 }
 0x2d6   : > { %p6028_p10 = pneg %p6027_p6  ;;  %p6034_p2 = por %p6033_p3, %p6032_p4 }
 0x2d8   : > { %p6035_p5 = pnand %p6034_p2, %p6028_p10 }
 0x2da   : > { %6038 = shalt.err (!%p6035_p5)
}
 0x2db   : > { %5088 = dma.hbm_to_vmem [thread:$0]  (!%p6820_p1), %s6818_s6, 128, %s6824_s12, %s1349_s15  }
 0x2dc   : > { %p7385_p0 = scmp.ne.s32.totalorder %s7363_s22, 0 }
 0x2dd   : > { %s6850_s16 = sand.u32 (!%p7385_p0), 1, %s6149_s0   ;;  %p7386_p10 = scmp.ne.s32.totalorder (!%p7385_p0), %s7381_s19, 0 }
 0x2de   : > { %1368 = sbr.rel (%p7385_p0) target bundleno = 8122 (0x1fba), region = 184  ;;  %s7312_s14 = sshll.u32 (!%p7385_p0), %s6850_s16, 3 }
 0x2df   : > { %s1371_s13 = scalar_lea.sflag (!%p7385_p0), [#allocation3], %s6850_s16  ;;  %s6856_s8 = scalar_lea.vmem (!%p7385_p0), [#allocation2], %s7312_s14 }
 0x2e5   : > { %6084 = dma.done.wait (%p7386_p10), %s1371_s13, 128  }
 0x2e6   : > { %6086 = vsyncadd (%p7386_p10), %s1371_s13, 4294967168  ;;  %p7387_p6 = scmp.eq.s32.totalorder %s6473_s18, 0 }
 0x2e8   : > { %6088 = dma.done.wait (%p7387_p6), [#allocation5], 16   ;;  %p7388_p13 = pmov %p7387_p6 }
 0x2e9   : > { %p7389_p1 = pmov %p7387_p6 }
 0x2ea   : > { %6090 = vsyncadd (%p7388_p13), [#allocation5], 4294967280 }
 0x2eb   : > { %6092 = dma.done.wait (%p7389_p1), [#allocation8], 32   ;;  %p7390_p8 = pmov %p7389_p1 }
 0x2ec   : > { %p7391_p7 = pmov %p7389_p1 }
 0x2ed   : > { %6094 = vsyncadd (%p7390_p8), [#allocation8], 4294967264 }
 0x2ee   : > { %6096 = dma.done.wait (%p7391_p7), [#allocation11], 32   ;;  %p7392_p9 = pmov %p7389_p1 }
 0x2ef   : > { %p7393_p11 = pmov %p7389_p1 }
 0x2f0   : > { %6098 = vsyncadd (%p7392_p9), [#allocation11], 4294967264 }
 0x2f1   : > { %6100 = dma.done.wait (%p7393_p11), [#allocation14], 32   ;;  %p7394_p12 = pmov %p7389_p1 }
 0x2f2   : > { %p7395_p4 = pmov %p7389_p1 }
 0x2f3   : > { %6102 = vsyncadd (%p7394_p12), [#allocation14], 4294967264 }
 0x2f4   : > { %6104 = dma.done.wait (%p7395_p4), [#allocation17], 32   ;;  %p7396_p3 = pmov %p7389_p1 }
 0x2f5   : > { %p7397_p2 = pmov %p7389_p1 }
 0x2f6   : > { %6106 = vsyncadd (%p7396_p3), [#allocation17], 4294967264 }
 0x2f7   : > { %6108 = dma.done.wait (%p7397_p2), [#allocation20], 32   ;;  %p7398_p5 = pmov %p7389_p1 }
 0x2f8   : > { %p7399_p0 = pmov %p7389_p1 }
 0x2f9   : > { %6110 = vsyncadd (%p7398_p5), [#allocation20], 4294967264 }
 0x2fa   : > { %6112 = dma.done.wait (%p7399_p0), [#allocation23], 32   ;;  %p7400_p10 = pmov %p7399_p0 }
 0x2fb   : > { %p7401_p6 = pmov %p7399_p0 }
 0x2fc   : > { %6114 = vsyncadd (%p7400_p10), [#allocation23], 4294967264 }
 0x2fd   : > { %6116 = dma.done.wait (%p7401_p6), [#allocation26], 528   ;;  %p7402_p13 = pmov %p7399_p0 }
 0x2fe   : > { %p7403_p1 = pmov %p7399_p0 }
 0x2ff   : > { %6118 = vsyncadd (%p7402_p13), [#allocation26], 4294966768 }
 0x300   : > { %6120 = dma.done.wait (%p7403_p1), [#allocation29], 528   ;;  %p7404_p8 = pmov %p7399_p0 }
 0x301   : > { %p7405_p7 = pmov %p7399_p0 }
 0x302   : > { %6122 = vsyncadd (%p7404_p8), [#allocation29], 4294966768 }
 0x303   : > { %6124 = dma.done.wait (%p7405_p7), [#allocation32], 32   ;;  %p7406_p9 = pmov %p7399_p0 }
 0x304   : > { %p7407_p11 = pmov %p7399_p0 }
 0x305   : > { %6126 = vsyncadd (%p7406_p9), [#allocation32], 4294967264 }
 0x306   : > { %6128 = dma.done.wait (%p7407_p11), [#allocation35], 528   ;;  %p7408_p12 = pmov %p7399_p0 }
 0x307   : > { %p7409_p4 = pmov %p7399_p0 }
 0x308   : > { %6130 = vsyncadd (%p7408_p12), [#allocation35], 4294966768 }
 0x309   : > { %6132 = dma.done.wait (%p7409_p4), [#allocation38], 32   ;;  %p7410_p3 = pmov %p7399_p0 }
 0x30a   : > { %p7411_p2 = pmov %p7399_p0 }
 0x30b   : > { %6134 = vsyncadd (%p7410_p3), [#allocation38], 4294967264 }
 0x30c   : > { %6136 = dma.done.wait (%p7411_p2), [#allocation41], 528   ;;  %p7412_p5 = pmov %p7399_p0 }
 0x30e   : > { %6138 = vsyncadd (%p7412_p5), [#allocation41], 4294966768 }
 0x30f   : > { %1479 = sfence }
 0x310   : > { %s7413_s22 = sld [smem:[#allocation62_spill]]  ;;  %s7414_s15 = sld [smem:[#allocation63_spill]]  ;;  %v6915_v0 = vld [vmem:[%s6856_s8] sm:$0xff]  ;;  %vm1577_vm0 = vcmask 261120   ;;  %v6228_v10 = vmov 0.0|0.0   ;;  %vm6229_vm1 = vmmov 0  }
 0x311   : > { %v6919_v1 = vsel %vm1577_vm0, %v6915_v0, 0.0  ;;  %4803 = vmatprep.subr.bf16.mxu0 %v6228_v10  ;;  %4809 = vmatprep.subr.bf16.mxu1 %v6228_v10  ;;  %v6230_v18 = vmov 0.0   ;;  %s7415_s6 = sld [smem:[#allocation64_spill]]  ;;  %v4409_v25 = vld [vmem:[#allocation7] ss:$0 sm:$0xff]  ;;  %vm1858_vm2 = vcmask 64512  }
 0x312   : > { %1579 = vadd.xlane.f32.xlu0 %v6919_v1  ;;  %4573 = vmatprep.mubr.msk.f32.mxu0 %vm6229_vm1, %v6230_v18  ;;  %v4410_v29 = vld [vmem:[#allocation9] ss:$0 sm:$0xff]  ;;  %v4413_v36 = vld [vmem:[#allocation12] ss:$0 sm:$0xff]  ;;  %v4411_v39 = vld [vmem:[#allocation10] ss:$0 sm:$0xff] }
 0x313   : > { %4584 = vmatprep.mubr.msk.f32.mxu1 %vm6229_vm1, %v6230_v18  ;;  %s6231_s12 = smov 120   ;;  %v4415_v44 = vld [vmem:[#allocation13] ss:$0 sm:$0xff]  ;;  %s6232_s19 = smov 112   ;;  %vm3050_vm3 = vcmask 253952   ;;  %vm3961_vm5 = vcmask 15360  }
 0x314   : > { %s4417_s2 = sld [smem:[#allocation6 + $0x1]]  ;;  %s1852_s1 = sld [smem:[#allocation6]] }
 0x315   : > { %s7416_s3 = sld [smem:[#allocation68_spill]]  ;;  %s6233_s13 = smov 104  }
 0x316   : > { %v1606_v7 = vld [vmem:[%s7413_s22] sm:$0xff]  ;;  %v1607_v8 = vld [vmem:[%s7413_s22 + $0x8] sm:$0xff]  ;;  %v1608_v13 = vld [vmem:[%s7413_s22 + $0x10] sm:$0xff]  ;;  %s7422_s14 = sld [smem:[#allocation87_spill]]  ;;  %p7428_p10 = scmp.ne.s32.totalorder %s7382_s9, 0 }
 0x317   : > { %v1690_v9 = vld [vmem:[%s7414_s15] sm:$0xff]  ;;  %v4804_v11 = vpack.c.bf16 %v1607_v8, %v1606_v7  ;;  %v1691_v12 = vld [vmem:[%s7414_s15 + $0x8] sm:$0xff]  ;;  %v1609_v14 = vld [vmem:[%s7413_s22 + $0x18] sm:$0xff] }
 0x318   : > { %v4810_v15 = vpack.c.bf16 %v1691_v12, %v1690_v9  ;;  %v1692_v16 = vld [vmem:[%s7414_s15 + $0x10] sm:$0xff]  ;;  %v1693_v17 = vld [vmem:[%s7414_s15 + $0x18] sm:$0xff]  ;;  %v4807_v19 = vpack.c.bf16 %v1609_v14, %v1608_v13  ;;  %v1771_v27 = vld [vmem:[%s7415_s6] sm:$0xff] }
 0x319   : > { %4805 = vmatpush3.bf16.msra.mxu0 %v4804_v11  ;;  %v4813_v20 = vpack.c.bf16 %v1693_v17, %v1692_v16  ;;  %v1772_v28 = vld [vmem:[%s7415_s6 + $0x8] sm:$0xff]  ;;  %v1773_v33 = vld [vmem:[%s7415_s6 + $0x10] sm:$0xff]  ;;  %v1774_v34 = vld [vmem:[%s7415_s6 + $0x18] sm:$0xff] }
 0x31a   : > { %4811 = vmatpush3.bf16.msra.mxu1 %v4810_v15  ;;  %4806 = vmatprep.subr.bf16.mxu0 %v6228_v10  ;;  %v4816_v31 = vpack.c.bf16 %v1772_v28, %v1771_v27  ;;  %v4819_v35 = vpack.c.bf16 %v1774_v34, %v1773_v33  ;;  %v6990_v11 = vstv %s4417_s2  ;;  %v6993_v15 = vstv %s1852_s1  ;;  %s7419_s2 = sld [smem:[#allocation74_spill]]  ;;  %s7420_s1 = sld [smem:[#allocation80_spill]] }
 0x31b   : > { %4812 = vmatprep.subr.bf16.mxu1 %v6228_v10 }
 0x31d   : > { %4808 = vmatpush3.bf16.msra.mxu0 %v4807_v19 }
 0x31e   : > { %4814 = vmatpush3.bf16.msra.mxu1 %v4813_v20  ;;  %4815 = vmatprep.subr.bf16.mxu0 %v6228_v10 }
 0x31f   : > { %4598 = vmatprep.subr.mxu1 %v6230_v18 }
 0x39f   : > { %v1580_v2 = vpop.xlane.xlu0 %1579 }
 0x3a0   : > { %v1582_v3 = vmul.f32 0.03125, %v1580_v2 }
 0x3a2   : > { %v1583_v4 = vsub.f32 %v6915_v0, %v1582_v3 }
 0x3a4   : > { %v1584_v5 = vmul.f32 %v1583_v4, %v1583_v4 }
 0x3a6   : > { %v1585_v6 = vsel %vm1577_vm0, %v1584_v5, 0.0 }
 0x3a7   : > { %1586 = vadd.xlane.f32.xlu0 %v1585_v6 }
 0x434   : > { %v1587_v21 = vpop.xlane.xlu0 %1586 }
 0x435   : > { %v1588_v22 = vmul.f32 0.03125, %v1587_v21 }
 0x437   : > { %v1589_v23 = vadd.f32 1e-05, %v1588_v22 }
 0x439   : > { %5255 = vrsqrt.f32 %v1589_v23 }
 0x443   : > { %v5256_v24 = vpop.eup %5255 }
 0x444   : > { %v6942_v26 = vmul.f32 %v5256_v24, %v1583_v4 }
 0x446   : > { %v1598_v30 = vmul.f32 %v4409_v25, %v6942_v26 }
 0x448   : > { %v1605_v32 = vadd.f32 %v4410_v29, %v1598_v30 }
 0x44a   : > { %4574 = vmatmul.mubr.msk.f32.vlgmr.msra.gmra.mrb[0].mxu0 %vm1577_vm0, %v1605_v32  ;;  %4585 = vmatmul.mubr.msk.f32.vlgmr.msra.gmra.mrb[0].mxu1 %vm1577_vm0, %v1605_v32 }
 0x44b   : > { %4817 = vmatpush3.bf16.msra.mxu0 %v4816_v31  ;;  %4595 = vmatprep.mubr.msk.f32.mxu0 %vm6229_vm1, %v6230_v18 }
 0x44c   : > { %4818 = vmatprep.subr.bf16.mxu0 %v6228_v10  ;;  %4600 = vmatprep.mubr.msk.f32.mxu1 %vm6229_vm1, %v6230_v18 }
 0x44f   : > { %4820 = vmatpush3.bf16.msra.mxu0 %v4819_v35  ;;  %v1855_v35 = vld [vmem:[%s7416_s3 + $0x8] sm:$0xff] }
 0x450   : > { %4608 = vmatprep.subr.mxu0 %v6230_v18 }
 0x452   : > { %4596 = vmatmul.mubr.msk.f32.vlgmr.msra.gmra.mrb[2].mxu0 %vm1577_vm0, %v1605_v32 }
 0x453   : > { %4610 = vmatprep.mubr.msk.f32.mxu0 %vm6229_vm1, %v6230_v18 }
 0x51d   : > { %v1686_v37 = vpop.f32.mrb[0].mxu0  ;;  %v1767_v38 = vpop.f32.mrb[0].mxu1 }
 0x51e   : > { %v6960_v40 = vadd.f32 %v4413_v36, %v1767_v38  ;;  %v4575_v41 = vpop.f32.mrb[1].mxu0  ;;  %v4586_v42 = vpop.f32.mrb[1].mxu1  ;;  %v6966_v43 = vadd.f32 %v4411_v39, %v1686_v37 }
 0x51f   : > { %v1854_v42 = vld [vmem:[%s7416_s3] sm:$0xff] }
 0x520   : > { %2036 = vrot.lane.b32.xlu1 %v6960_v40, %s6231_s12  ;;  %4599 = vmatpush3.xpose.msk.msra.mxu1 %vm1858_vm2, %v6960_v40 }
 0x521   : > { %4603 = vmatprep.subr.mxu1 %v6230_v18 }
 0x523   : > { %4601 = vmatmul.mubr.msk.f32.vlgmr.msra.gmra.mrb[2].mxu1 %vm1858_vm2, %v6966_v43 }
 0x524   : > { %2034 = vrot.lane.b32.xlu1 %v6966_v43, %s6231_s12  ;;  %4605 = vmatprep.mubr.msk.f32.mxu1 %vm6229_vm1, %v6230_v18 }
 0x525   : > { %v1848_v45 = vpop.f32.mrb[2].mxu0 }
 0x526   : > { %v6975_v46 = vadd.f32 %v4415_v44, %v1848_v45  ;;  %v4597_v47 = vpop.f32.mrb[3].mxu0 }
 0x528   : > { %4604 = vmatpush3.msra.mxu1 %v6975_v46 }
 0x529   : > { %4613 = vmatprep.subr.mxu1 %v6230_v18 }
 0x592   : > { %v2037_v48 = vpop.permute.xlu1 %2036 }
 0x593   : > { %4609 = vmatpush3.xpose.msk.msra.mxu0 %vm1858_vm2, %v2037_v48 }
 0x594   : > { %4618 = vmatprep.subr.mxu0 %v6230_v18 }
 0x596   : > { %v2035_v49 = vpop.permute.xlu1 %2034 }
 0x597   : > { %4611 = vmatmul.mubr.msk.f32.vlgmr.msra.gmra.mrb[4].mxu0 %vm1858_vm2, %v2035_v49 }
 0x598   : > { %4620 = vmatprep.mubr.msk.f32.mxu0 %vm6229_vm1, %v6230_v18  ;;  %4619 = vmatpush3.msra.mxu0 %v1855_v35 }
 0x599   : > { %4628 = vmatprep.subr.mxu0 %v6230_v18 }
 0x5f6   : > { %v1931_v50 = vpop.f32.mrb[2].mxu1 }
 0x5f7   : > { %v1935_v51 = vmul.f32 0.35355338, %v1931_v50  ;;  %v4602_v52 = vpop.f32.mrb[3].mxu1 }
 0x5f9   : > { %v1936_v53 = vsel %vm1858_vm2, %v1935_v51, -inf }
 0x5fa   : > { %1937 = vmax.xlane.f32.xlu0 %v1936_v53 }
 0x66a   : > { %v2108_v54 = vpop.f32.mrb[4].mxu0 }
 0x66b   : > { %v2112_v55 = vmul.f32 0.35355338, %v2108_v54  ;;  %v4612_v56 = vpop.f32.mrb[5].mxu0 }
 0x66d   : > { %v2113_v57 = vsel %vm1858_vm2, %v2112_v55, -inf }
 0x66e   : > { %2114 = vmax.xlane.f32.xlu1 %v2113_v57 }
 0x67f   : > { %2361 = vrot.lane.b32.xlu1 %v6960_v40, %s6232_s19 }
 0x687   : > { %v1938_v58 = vpop.xlane.xlu0 %1937 }
 0x688   : > { %v1939_v59 = vsub.f32 %v1935_v51, %v1938_v58 }
 0x68a   : > { %v1940_v60 = vmul.f32 1.442695, %v1939_v59 }
 0x68c   : > { %5257 = vpow2.f32 %v1940_v60 }
 0x696   : > { %v5258_v61 = vpop.eup %5257 }
 0x697   : > { %v1942_v62 = vsel %vm1858_vm2, %v5258_v61, 0.0 }
 0x698   : > { %1943 = vadd.xlane.f32.xlu0 %v1942_v62 }
 0x6fb   : > { %v2115_v63 = vpop.xlane.xlu1 %2114 }
 0x6fc   : > { %v2116_v2 = vsub.f32 %v2112_v55, %v2115_v63 }
 0x6fe   : > { %v2117_v3 = vmul.f32 1.442695, %v2116_v2 }
 0x6ff   : > { %v2362_v48 = vpop.permute.xlu1 %2361 }
 0x700   : > { %5259 = vpow2.f32 %v2117_v3 }
 0x70a   : > { %v5260_v4 = vpop.eup %5259 }
 0x70b   : > { %v2119_v5 = vsel %vm1858_vm2, %v5260_v4, 0.0 }
 0x70c   : > { %2120 = vadd.xlane.f32.xlu0 %v2119_v5 }
 0x725   : > { %v1944_v6 = vpop.xlane.xlu0 %1943 }
 0x726   : > { %5261 = vrcp.f32 %v1944_v6 }
 0x730   : > { %v5262_v7 = vpop.eup %5261 }
 0x731   : > { %v1946_v8 = vmul.f32 %v5262_v7, %v5258_v61 }
 0x733   : > { %5263 = vlog2.f32 %v1946_v8 }
 0x73d   : > { %v5264_v9 = vpop.eup %5263 }
 0x73e   : > { %v1948_v12 = vmul.f32 0.6931472, %v5264_v9 }
 0x740   : > { %v1950_v13 = vmul.f32 %v6990_v11, %v1948_v12 }
 0x742   : > { %v1951_v14 = vmul.f32 1.442695, %v1950_v13 }
 0x744   : > { %5265 = vpow2.f32 %v1951_v14 }
 0x74e   : > { %v5266_v16 = vpop.eup %5265 }
 0x74f   : > { %v1954_v17 = vmul.f32 %v5266_v16, %v6993_v15 }
 0x751   : > { %v1955_v19 = vsel %vm1858_vm2, %v1954_v17, 0.0 }
 0x752   : > { %1956 = vadd.xlane.f32.xlu0 %v1955_v19 }
 0x799   : > { %v2121_v20 = vpop.xlane.xlu0 %2120 }
 0x79a   : > { %5267 = vrcp.f32 %v2121_v20 }
 0x7a4   : > { %v5268_v21 = vpop.eup %5267 }
 0x7a5   : > { %v2123_v22 = vmul.f32 %v5268_v21, %v5260_v4 }
 0x7a7   : > { %5269 = vlog2.f32 %v2123_v22  ;;  %v1856_v22 = vld [vmem:[%s7416_s3 + $0x10] sm:$0xff] }
 0x7b1   : > { %v5270_v23 = vpop.eup %5269 }
 0x7b2   : > { %v2125_v24 = vmul.f32 0.6931472, %v5270_v23 }
 0x7b4   : > { %v2126_v25 = vmul.f32 %v2125_v24, %v6990_v11 }
 0x7b6   : > { %v2127_v27 = vmul.f32 1.442695, %v2126_v25 }
 0x7b8   : > { %5271 = vpow2.f32 %v2127_v27 }
 0x7c2   : > { %v5272_v28 = vpop.eup %5271 }
 0x7c3   : > { %v2129_v29 = vmul.f32 %v5272_v28, %v6993_v15 }
 0x7c5   : > { %v2130_v30 = vsel %vm1858_vm2, %v2129_v29, 0.0 }
 0x7c6   : > { %2131 = vadd.xlane.f32.xlu0 %v2130_v30 }
 0x7dc   : > { %2137 = vrot.lane.b32.xlu0 %v6975_v46, %s6231_s12  ;;  %s7417_s12 = sld [smem:[#allocation71_spill]] }
 0x7df   : > { %v1957_v31 = vpop.xlane.xlu0 %1956 }
 0x7e0   : > { %v1958_v32 = vadd.f32 1e-06, %v1957_v31  ;;  %2359 = vrot.lane.b32.xlu0 %v6966_v43, %s6232_s19 }
 0x7e2   : > { %5273 = vrcp.f32 %v1958_v32 }
 0x7ec   : > { %v5274_v33 = vpop.eup %5273 }
 0x7ed   : > { %v1960_v34 = vmul.f32 %v5274_v33, %v1954_v17 }
 0x7ef   : > { %4606 = vmatmul.mubr.msk.f32.vlgmr.msra.gmra.mrb[4].mxu1 %vm1858_vm2, %v1960_v34 }
 0x7f0   : > { %4615 = vmatprep.mubr.msk.f32.mxu1 %vm6229_vm1, %v6230_v18 }
 0x853   : > { %v2132_v36 = vpop.xlane.xlu0 %2131 }
 0x854   : > { %v2133_v37 = vadd.f32 1e-06, %v2132_v36 }
 0x856   : > { %5275 = vrcp.f32 %v2133_v37 }
 0x857   : > { %v2138_v38 = vpop.permute.xlu0 %2137 }
 0x858   : > { %4614 = vmatpush3.msra.mxu1 %v2138_v38 }
 0x859   : > { %4623 = vmatprep.subr.mxu1 %v6230_v18 }
 0x85b   : > { %v2360_v50 = vpop.permute.xlu0 %2359 }
 0x860   : > { %v5276_v39 = vpop.eup %5275 }
 0x861   : > { %v2135_v41 = vmul.f32 %v5276_v39, %v2129_v29 }
 0x863   : > { %4616 = vmatmul.mubr.msk.f32.vlgmr.msra.gmra.mrb[6].mxu1 %vm1858_vm2, %v2135_v41 }
 0x864   : > { %4624 = vmatpush3.msra.mxu1 %v1854_v42  ;;  %4625 = vmatprep.mubr.msk.f32.mxu1 %vm6229_vm1, %v6230_v18 }
 0x865   : > { %4633 = vmatprep.subr.mxu1 %v6230_v18 }
 0x8c2   : > { %v2030_v44 = vpop.f32.mrb[4].mxu1 }
 0x8c3   : > { %v4607_v45 = vpop.f32.mrb[5].mxu1  ;;  %4626 = vmatmul.mubr.msk.f32.vlgmr.msra.gmra.mrb[8].mxu1 %vm1858_vm2, %v2030_v44 }
 0x8c4   : > { %4635 = vmatprep.mubr.msk.f32.mxu1 %vm6229_vm1, %v6230_v18 }
 0x936   : > { %v2209_v47 = vpop.f32.mrb[6].mxu1 }
 0x937   : > { %v4617_v49 = vpop.f32.mrb[7].mxu1  ;;  %4621 = vmatmul.mubr.msk.f32.vlgmr.msra.gmra.mrb[6].mxu0 %vm1858_vm2, %v2209_v47 }
 0x938   : > { %4629 = vmatpush3.xpose.msk.msra.mxu0 %vm1858_vm2, %v2362_v48  ;;  %4630 = vmatprep.mubr.msk.f32.mxu0 %vm6229_vm1, %v6230_v18 }
 0x939   : > { %4638 = vmatprep.subr.mxu0 %v6230_v18 }
 0x93b   : > { %4631 = vmatmul.mubr.msk.f32.vlgmr.msra.gmra.mrb[8].mxu0 %vm1858_vm2, %v2360_v50 }
 0x93c   : > { %4640 = vmatprep.mubr.msk.f32.mxu0 %vm6229_vm1, %v6230_v18  ;;  %4639 = vmatpush3.msra.mxu0 %v1856_v22 }
 0x93d   : > { %4648 = vmatprep.subr.mxu0 %v6230_v18 }
 0x996   : > { %v2355_v51 = vpop.f32.mrb[8].mxu1 }
 0x997   : > { %v4627_v52 = vpop.f32.mrb[9].mxu1 }
 0xa0a   : > { %v2282_v53 = vpop.f32.mrb[6].mxu0 }
 0xa0b   : > { %v7026_v54 = vadd.f32 %v2355_v51, %v2282_v53  ;;  %v4622_v55 = vpop.f32.mrb[7].mxu0  ;;  %v1857_v51 = vld [vmem:[%s7416_s3 + $0x18] sm:$0xff]  ;;  %s7427_s3 = sshll.u32 %s6850_s16, 3 }
 0xa0c   : > { %s1573_s6 = scalar_lea.vmem [#allocation43], %s7427_s3 }
 0xa0e   : > { %v2433_v56 = vpop.f32.mrb[8].mxu0 }
 0xa0f   : > { %v2437_v57 = vmul.f32 0.35355338, %v2433_v56  ;;  %v4632_v58 = vpop.f32.mrb[9].mxu0  ;;  %v2871_v56 = vrot.slane %v6919_v1, 4 }
 0xa11   : > { %v2438_v59 = vsel %vm1858_vm2, %v2437_v57, -inf }
 0xa12   : > { %2439 = vmax.xlane.f32.xlu0 %v2438_v59 }
 0xa9f   : > { %v2440_v60 = vpop.xlane.xlu0 %2439 }
 0xaa0   : > { %v2441_v61 = vsub.f32 %v2437_v57, %v2440_v60  ;;  %v2872_v57 = vadd.f32 %v2871_v56, %v6919_v1 }
 0xaa2   : > { %v2442_v62 = vmul.f32 1.442695, %v2441_v61  ;;  %v2873_v58 = vrot.slane %v2872_v57, 2  ;;  %v2891_v61 = vld [vmem:[%s7417_s12] sm:$0xff] }
 0xaa4   : > { %5277 = vpow2.f32 %v2442_v62  ;;  %v2874_v59 = vadd.f32 %v2873_v58, %v2872_v57  ;;  %v2892_v62 = vld [vmem:[%s7417_s12 + $0x8] sm:$0xff]  ;;  %v2902_v57 = vld [vmem:[#allocation21] sm:$0x1] }
 0xaa6   : > { %v2875_v60 = vrot.slane %v2874_v59, 1 }
 0xaae   : > { %v5278_v63 = vpop.eup %5277 }
 0xaaf   : > { %v2444_v2 = vsel %vm1858_vm2, %v5278_v63, 0.0 }
 0xab0   : > { %2445 = vadd.xlane.f32.xlu1 %v2444_v2 }
 0xac1   : > { %2613 = vrot.lane.b32.xlu1 %v6960_v40, %s6233_s13 }
 0xb3d   : > { %v2446_v3 = vpop.xlane.xlu1 %2445 }
 0xb3e   : > { %5279 = vrcp.f32 %v2446_v3 }
 0xb41   : > { %v2614_v21 = vpop.permute.xlu1 %2613 }
 0xb48   : > { %v5280_v4 = vpop.eup %5279 }
 0xb49   : > { %v2448_v5 = vmul.f32 %v5280_v4, %v5278_v63  ;;  %v4822_v63 = vpack.c.bf16 %v2892_v62, %v2891_v61  ;;  %v2876_v4 = vadd.f32 %v2875_v60, %v2874_v59 }
 0xb4b   : > { %5281 = vlog2.f32 %v2448_v5 }
 0xb55   : > { %v5282_v6 = vpop.eup %5281 }
 0xb56   : > { %v2450_v7 = vmul.f32 0.6931472, %v5282_v6  ;;  %v2893_v6 = vld [vmem:[%s7417_s12 + $0x10] sm:$0xff] }
 0xb58   : > { %v2451_v8 = vmul.f32 %v2450_v7, %v6990_v11  ;;  %v2894_v7 = vld [vmem:[%s7417_s12 + $0x18] sm:$0xff]  ;;  %s4000_s12 = sshll.u32 %s1573_s6, 4  ;;  %s7223_s12 = int_to_ptr.vmem [resolvable:$true] %s4000_s12 }
 0xb59   : > { %s6039_s15 = scalar_lea.vmem %s7223_s12, 128 }
 0xb5a   : > { %v2452_v9 = vmul.f32 1.442695, %v2451_v8  ;;  %v4825_v8 = vpack.c.bf16 %v2894_v7, %v2893_v6  ;;  %p6040_p0 = scmp.ne.s32.totalorder %s7223_s12, %s6039_s15 }
 0xb5c   : > { %5283 = vpow2.f32 %v2452_v9  ;;  %p6041_p6 = pnand %p6040_p0, %p7428_p10 }
 0xb5e   : > { %p6042_p13 = pneg %p6041_p6 }
 0xb66   : > { %v5284_v12 = vpop.eup %5283 }
 0xb67   : > { %v2454_v13 = vmul.f32 %v5284_v12, %v6993_v15  ;;  %v7084_v12 = vmul.f32 0.125, %v2876_v4 }
 0xb69   : > { %v2455_v14 = vsel %vm1858_vm2, %v2454_v13, 0.0 }
 0xb6a   : > { %2456 = vadd.xlane.f32.xlu0 %v2455_v14 }
 0xb80   : > { %2461 = vrot.lane.b32.xlu0 %v6975_v46, %s6232_s19  ;;  %s7418_s19 = sld [smem:[#allocation70_spill]] }
 0xb84   : > { %2611 = vrot.lane.b32.xlu0 %v6966_v43, %s6233_s13 }
 0xb86   : > { %v2887_v2 = vld [vmem:[%s7418_s19] sm:$0xff]  ;;  %v2888_v3 = vld [vmem:[%s7418_s19 + $0x8] sm:$0xff]  ;;  %v2889_v1 = vld [vmem:[%s7418_s19 + $0x10] sm:$0xff] }
 0xb87   : > { %v4828_v5 = vpack.c.bf16 %v2888_v3, %v2887_v2  ;;  %v2890_v9 = vld [vmem:[%s7418_s19 + $0x18] sm:$0xff]  ;;  %v3146_v3 = vlaneseq }
 0xb89   : > { %v7111_v4 = vshrl.u32 %v3146_v3, 7 }
 0xbf7   : > { %v2457_v40 = vpop.xlane.xlu0 %2456 }
 0xbf8   : > { %v2458_v16 = vadd.f32 1e-06, %v2457_v40  ;;  %v4434_v40 = vld [vmem:[#allocation15] ss:$0 sm:$0xff] }
 0xbfa   : > { %5285 = vrcp.f32 %v2458_v16 }
 0xbfb   : > { %v2462_v17 = vpop.permute.xlu0 %2461 }
 0xbfc   : > { %4634 = vmatpush3.msra.mxu1 %v2462_v17 }
 0xbfd   : > { %4643 = vmatprep.subr.mxu1 %v6230_v18 }
 0xbff   : > { %v2612_v43 = vpop.permute.xlu0 %2611 }
 0xc04   : > { %v5286_v19 = vpop.eup %5285 }
 0xc05   : > { %v2460_v20 = vmul.f32 %v5286_v19, %v2454_v13  ;;  %v4831_v13 = vpack.c.bf16 %v2890_v9, %v2889_v1 }
 0xc07   : > { %4636 = vmatmul.mubr.msk.f32.vlgmr.msra.gmra.mrb[10].mxu1 %vm1858_vm2, %v2460_v20 }
 0xc08   : > { %4644 = vmatpush3.xpose.msk.msra.mxu1 %vm1858_vm2, %v2614_v21  ;;  %4645 = vmatprep.mubr.msk.f32.mxu1 %vm6229_vm1, %v6230_v18 }
 0xc09   : > { %4653 = vmatprep.subr.mxu1 %v6230_v18 }
 0xc0b   : > { %4646 = vmatmul.mubr.msk.f32.vlgmr.msra.gmra.mrb[12].mxu1 %vm1858_vm2, %v2612_v43 }
 0xc0c   : > { %4655 = vmatprep.mubr.msk.f32.mxu1 %vm6229_vm1, %v6230_v18  ;;  %4654 = vmatpush3.msra.mxu1 %v1857_v51 }
 0xc0d   : > { %4827 = vmatprep.subr.bf16.mxu1 %v6228_v10 }
 0xcda   : > { %v2533_v23 = vpop.f32.mrb[10].mxu1 }
 0xcdb   : > { %v4637_v24 = vpop.f32.mrb[11].mxu1  ;;  %4641 = vmatmul.mubr.msk.f32.vlgmr.msra.gmra.mrb[10].mxu0 %vm1858_vm2, %v2533_v23 }
 0xcdc   : > { %4650 = vmatprep.mubr.msk.f32.mxu0 %vm6229_vm1, %v6230_v18 }
 0xcde   : > { %v2685_v25 = vpop.f32.mrb[12].mxu1 }
 0xcdf   : > { %v2689_v27 = vmul.f32 0.35355338, %v2685_v25  ;;  %v4647_v28 = vpop.f32.mrb[13].mxu1 }
 0xce1   : > { %v2690_v29 = vsel %vm1858_vm2, %v2689_v27, -inf }
 0xce2   : > { %2691 = vmax.xlane.f32.xlu1 %v2690_v29 }
 0xd6f   : > { %v2692_v30 = vpop.xlane.xlu1 %2691 }
 0xd70   : > { %v2693_v31 = vsub.f32 %v2689_v27, %v2692_v30 }
 0xd72   : > { %v2694_v32 = vmul.f32 1.442695, %v2693_v31  ;;  %v2895_v31 = vld [vmem:[#allocation16] sm:$0x1] }
 0xd74   : > { %5287 = vpow2.f32 %v2694_v32 }
 0xd7e   : > { %v5288_v33 = vpop.eup %5287 }
 0xd7f   : > { %v2696_v34 = vsel %vm1858_vm2, %v5288_v33, 0.0 }
 0xd80   : > { %2697 = vadd.xlane.f32.xlu0 %v2696_v34 }
 0xdae   : > { %v2606_v35 = vpop.f32.mrb[10].mxu0 }
 0xdaf   : > { %v7056_v36 = vadd.f32 %v2606_v35, %v7026_v54  ;;  %v4642_v37 = vpop.f32.mrb[11].mxu0 }
 0xe0d   : > { %v2698_v38 = vpop.xlane.xlu0 %2697 }
 0xe0e   : > { %5289 = vrcp.f32 %v2698_v38 }
 0xe18   : > { %v5290_v39 = vpop.eup %5289 }
 0xe19   : > { %v2700_v41 = vmul.f32 %v5290_v39, %v5288_v33 }
 0xe1b   : > { %5291 = vlog2.f32 %v2700_v41 }
 0xe25   : > { %v5292_v42 = vpop.eup %5291 }
 0xe26   : > { %v2702_v44 = vmul.f32 0.6931472, %v5292_v42  ;;  %v2898_v42 = vld [vmem:[%s7419_s2] sm:$0xff] }
 0xe28   : > { %v2703_v45 = vmul.f32 %v2702_v44, %v6990_v11  ;;  %v2899_v44 = vld [vmem:[%s7419_s2 + $0x8] sm:$0xff] }
 0xe2a   : > { %v2704_v47 = vmul.f32 1.442695, %v2703_v45  ;;  %v4834_v45 = vpack.c.bf16 %v2899_v44, %v2898_v42  ;;  %v3298_v44 = vld [vmem:[%s7420_s1 + $0x30] sm:$0xff] }
 0xe2c   : > { %5293 = vpow2.f32 %v2704_v47  ;;  %v2900_v47 = vld [vmem:[%s7419_s2 + $0x10] sm:$0xff] }
 0xe36   : > { %v5294_v48 = vpop.eup %5293 }
 0xe37   : > { %v2706_v49 = vmul.f32 %v5294_v48, %v6993_v15  ;;  %v2901_v48 = vld [vmem:[%s7419_s2 + $0x18] sm:$0xff]  ;;  %s7424_s2 = sld [smem:[#allocation90_spill]] }
 0xe39   : > { %v2707_v50 = vsel %vm1858_vm2, %v2706_v49, 0.0 }
 0xe3a   : > { %2708 = vadd.xlane.f32.xlu0 %v2707_v50 }
 0xe50   : > { %2713 = vrot.lane.b32.xlu0 %v6975_v46, %s6233_s13  ;;  %s7421_s13 = sld [smem:[#allocation81_spill]] }
 0xec7   : > { %v2709_v52 = vpop.xlane.xlu0 %2708 }
 0xec8   : > { %v2710_v53 = vadd.f32 1e-06, %v2709_v52 }
 0xeca   : > { %5295 = vrcp.f32 %v2710_v53 }
 0xecb   : > { %v2714_v54 = vpop.permute.xlu0 %2713 }
 0xecc   : > { %4649 = vmatpush3.msra.mxu0 %v2714_v54  ;;  %v2896_v54 = vld [vmem:[#allocation18] sm:$0x1] }
 0xecd   : > { %4821 = vmatprep.subr.bf16.mxu0 %v6228_v10 }
 0xed4   : > { %v5296_v11 = vpop.eup %5295 }
 0xed5   : > { %v2712_v15 = vmul.f32 %v5296_v11, %v2706_v49  ;;  %v4837_v49 = vpack.c.bf16 %v2901_v48, %v2900_v47  ;;  %v3300_v48 = vld [vmem:[%s7420_s1 + $0x40] sm:$0xff] }
 0xed7   : > { %4651 = vmatmul.mubr.msk.f32.vlgmr.msra.gmra.mrb[12].mxu0 %vm1858_vm2, %v2712_v15  ;;  %v2897_v15 = vld [vmem:[#allocation19] sm:$0x1] }
 0xed8   : > { %4666 = vmatprep.mubr.msk.f32.mxu0 %vm6229_vm1, %v6230_v18  ;;  %4823 = vmatpush3.bf16.msra.mxu0 %v4822_v63 }
 0xed9   : > { %4824 = vmatprep.subr.bf16.mxu0 %v6228_v10 }
 0xedc   : > { %4826 = vmatpush3.bf16.msra.mxu0 %v4825_v8 }
 0xedd   : > { %4833 = vmatprep.subr.bf16.mxu0 %v6228_v10 }
 0xedf   : > { %4667 = vmatmul.mubr.msk.f32.vlgmr.msra.gmra.mrb[14].mxu0 %vm1577_vm0, %v7084_v12 }
 0xee0   : > { %4688 = vmatprep.mubr.msk.f32.mxu0 %vm6229_vm1, %v6230_v18  ;;  %4835 = vmatpush3.bf16.msra.mxu0 %v4834_v45  ;;  %v3299_v45 = vld [vmem:[%s7420_s1 + $0x38] sm:$0xff] }
 0xee1   : > { %4836 = vmatprep.subr.bf16.mxu0 %v6228_v10  ;;  %v4855_v47 = vpack.c.bf16 %v3299_v45, %v3298_v44 }
 0xee4   : > { %4838 = vmatpush3.bf16.msra.mxu0 %v4837_v49  ;;  %v3301_v49 = vld [vmem:[%s7420_s1 + $0x48] sm:$0xff] }
 0xee5   : > { %4845 = vmatprep.subr.bf16.mxu0 %v6228_v10 }
 0xfaa   : > { %v2785_v46 = vpop.f32.mrb[12].mxu0 }
 0xfab   : > { %v4652_v55 = vpop.f32.mrb[13].mxu0  ;;  %4656 = vmatmul.mubr.msk.f32.vlgmr.msra.gmra.mrb[14].mxu1 %vm1858_vm2, %v2785_v46 }
 0xfac   : > { %4677 = vmatprep.mubr.msk.f32.mxu1 %vm6229_vm1, %v6230_v18  ;;  %4829 = vmatpush3.bf16.msra.mxu1 %v4828_v5  ;;  %v3148_v5 = vsub.s32 0, %v7111_v4  ;;  %v3685_v4 = vld [vmem:[%s7422_s14] sm:$0xff] }
 0xfad   : > { %4830 = vmatprep.subr.bf16.mxu1 %v6228_v10 }
 0xfb0   : > { %4832 = vmatpush3.bf16.msra.mxu1 %v4831_v13 }
 0xfb1   : > { %4839 = vmatprep.subr.bf16.mxu1 %v6228_v10 }
 0xfb2   : > { %v2972_v28 = vpop.f32.mrb[14].mxu0 }
 0xfb3   : > { %v4668_v29 = vpop.f32.mrb[15].mxu0 }
0x107e   : > { %v2858_v14 = vpop.f32.mrb[14].mxu1 }
0x107f   : > { %v2862_v16 = vadd.f32 %v2858_v14, %v7056_v36  ;;  %v4657_v17 = vpop.f32.mrb[15].mxu1 }
0x1081   : > { %v7093_v19 = vadd.f32 %v4434_v40, %v2862_v16 }
0x1083   : > { %v2879_v20 = vsel %vm1577_vm0, %v7093_v19, 0.0 }
0x1084   : > { %v2880_v21 = vrot.slane %v2879_v20, 4 }
0x1086   : > { %v2881_v43 = vadd.f32 %v2880_v21, %v2879_v20  ;;  %v3181_v20 = vld [vmem:[#allocation25] sm:$0xff]  ;;  %v3182_v21 = vld [vmem:[#allocation25 + $0x8] sm:$0xff] }
0x1088   : > { %v2882_v22 = vrot.slane %v2881_v43, 2 }
0x108a   : > { %v2883_v23 = vadd.f32 %v2882_v22, %v2881_v43  ;;  %v4840_v43 = vpack.c.bf16 %v3182_v21, %v3181_v20  ;;  %v3184_v22 = vld [vmem:[#allocation25 + $0x18] sm:$0xff] }
0x108c   : > { %v2884_v24 = vrot.slane %v2883_v23, 1 }
0x108e   : > { %v2885_v25 = vadd.f32 %v2884_v24, %v2883_v23 }
0x1090   : > { %v2886_v27 = vmul.f32 0.125, %v2885_v25 }
0x1092   : > { %4678 = vmatmul.mubr.msk.f32.vlgmr.msra.gmra.mrb[16].mxu1 %vm1577_vm0, %v2886_v27 }
0x1093   : > { %4699 = vmatprep.mubr.msk.f32.mxu1 %vm6229_vm1, %v6230_v18  ;;  %4841 = vmatpush3.bf16.msra.mxu1 %v4840_v43 }
0x1094   : > { %4842 = vmatprep.subr.bf16.mxu1 %v6228_v10 }
0x1165   : > { %v3045_v30 = vpop.f32.mrb[16].mxu1 }
0x1166   : > { %v3046_v32 = vadd.f32 %v3045_v30, %v2972_v28  ;;  %v4679_v33 = vpop.f32.mrb[17].mxu1  ;;  %v4438_v28 = vld [vmem:[#allocation22] ss:$0 sm:$0xff]  ;;  %v4439_v30 = vld [vmem:[#allocation24] ss:$0 sm:$0xff] }
0x1167   : > { %v3292_v33 = vld [vmem:[%s7420_s1] sm:$0xff] }
0x1168   : > { %v3049_v34 = vadd.f32 %v3046_v32, %v2895_v31 }
0x116a   : > { %v3051_v35 = vsel %vm3050_vm3, %v3049_v34, 0.0 }
0x116b   : > { %3052 = vadd.xlane.f32.xlu1 %v3051_v35 }
0x11f8   : > { %v3053_v36 = vpop.xlane.xlu1 %3052 }
0x11f9   : > { %v3054_v37 = vmul.f32 0.03125, %v3053_v36  ;;  %v3294_v36 = vld [vmem:[%s7420_s1 + $0x10] sm:$0xff] }
0x11fb   : > { %v3055_v38 = vsub.f32 %v3049_v34, %v3054_v37  ;;  %v3293_v34 = vld [vmem:[%s7420_s1 + $0x8] sm:$0xff]  ;;  %v3295_v37 = vld [vmem:[%s7420_s1 + $0x18] sm:$0xff] }
0x11fc   : > { %v4846_v35 = vpack.c.bf16 %v3293_v34, %v3292_v33  ;;  %v3400_v33 = vld [vmem:[#allocation30 + $0x18] sm:$0xff] }
0x11fd   : > { %v3056_v39 = vmul.f32 %v3055_v38, %v3055_v38 }
0x11ff   : > { %v3057_v41 = vsel %vm3050_vm3, %v3056_v39, 0.0  ;;  %v3296_v39 = vld [vmem:[%s7420_s1 + $0x20] sm:$0xff] }
0x1200   : > { %3058 = vadd.xlane.f32.xlu1 %v3057_v41  ;;  %v3297_v41 = vld [vmem:[%s7420_s1 + $0x28] sm:$0xff] }
0x1201   : > { %v4852_v42 = vpack.c.bf16 %v3297_v41, %v3296_v39  ;;  %v3396_v39 = vld [vmem:[%s7421_s13 + $0x18] sm:$0xff] }
0x128d   : > { %v3059_v50 = vpop.xlane.xlu1 %3058 }
0x128e   : > { %v3060_v51 = vmul.f32 0.03125, %v3059_v50  ;;  %v4858_v50 = vpack.c.bf16 %v3301_v49, %v3300_v48 }
0x1290   : > { %v3061_v52 = vadd.f32 1e-05, %v3060_v51  ;;  %v3302_v51 = vld [vmem:[%s7420_s1 + $0x50] sm:$0xff] }
0x1292   : > { %5297 = vrsqrt.f32 %v3061_v52  ;;  %v3303_v52 = vld [vmem:[%s7420_s1 + $0x58] sm:$0xff] }
0x129c   : > { %v5298_v53 = vpop.eup %5297 }
0x129d   : > { %v3063_v11 = vmul.f32 %v5298_v53, %v3055_v38  ;;  %v4849_v38 = vpack.c.bf16 %v3295_v37, %v3294_v36  ;;  %v4861_v53 = vpack.c.bf16 %v3303_v52, %v3302_v51  ;;  %v3394_v36 = vld [vmem:[%s7421_s13 + $0x8] sm:$0xff] }
0x129f   : > { %v3064_v46 = vmul.f32 %v3063_v11, %v2896_v54  ;;  %v3304_v54 = vld [vmem:[%s7420_s1 + $0x60] sm:$0xff]  ;;  %v3305_v11 = vld [vmem:[%s7420_s1 + $0x68] sm:$0xff] }
0x12a1   : > { %v3065_v55 = vadd.f32 %v3064_v46, %v2897_v15  ;;  %v4864_v15 = vpack.c.bf16 %v3305_v11, %v3304_v54  ;;  %v3306_v46 = vld [vmem:[%s7420_s1 + $0x70] sm:$0xff] }
0x12a3   : > { %v3066_v56 = vmax.f32 %v3065_v55, 0.0  ;;  %v3307_v55 = vld [vmem:[%s7420_s1 + $0x78] sm:$0xff]  ;;  %s7423_s1 = sld [smem:[#allocation89_spill]] }
0x12a5   : > { %4689 = vmatmul.mubr.msk.f32.vlgmr.msra.gmra.mrb[16].mxu0 %vm1577_vm0, %v3066_v56  ;;  %v4867_v56 = vpack.c.bf16 %v3307_v55, %v3306_v46  ;;  %v3401_v55 = vld [vmem:[#allocation31] sm:$0x1] }
0x12a6   : > { %4734 = vmatprep.mubr.msk.f32.mxu0 %vm6229_vm1, %v6230_v18  ;;  %4847 = vmatpush3.bf16.msra.mxu0 %v4846_v35  ;;  %v3393_v35 = vld [vmem:[%s7421_s13] sm:$0xff] }
0x12a7   : > { %4848 = vmatprep.subr.bf16.mxu0 %v6228_v10  ;;  %v4876_v37 = vpack.c.bf16 %v3394_v36, %v3393_v35 }
0x12aa   : > { %4850 = vmatpush3.bf16.msra.mxu0 %v4849_v38  ;;  %v3395_v38 = vld [vmem:[%s7421_s13 + $0x10] sm:$0xff] }
0x12ab   : > { %4851 = vmatprep.subr.bf16.mxu0 %v6228_v10  ;;  %v4879_v41 = vpack.c.bf16 %v3396_v39, %v3395_v38 }
0x12ae   : > { %4853 = vmatpush3.bf16.msra.mxu0 %v4852_v42  ;;  %v4442_v42 = vld [vmem:[#allocation28] ss:$0 sm:$0xff] }
0x12af   : > { %4854 = vmatprep.subr.bf16.mxu0 %v6228_v10 }
0x12b2   : > { %4856 = vmatpush3.bf16.msra.mxu0 %v4855_v47 }
0x12b3   : > { %4857 = vmatprep.subr.bf16.mxu0 %v6228_v10 }
0x12b6   : > { %4859 = vmatpush3.bf16.msra.mxu0 %v4858_v50 }
0x12b7   : > { %4860 = vmatprep.subr.bf16.mxu0 %v6228_v10 }
0x12ba   : > { %4862 = vmatpush3.bf16.msra.mxu0 %v4861_v53 }
0x12bb   : > { %4863 = vmatprep.subr.bf16.mxu0 %v6228_v10 }
0x12be   : > { %4865 = vmatpush3.bf16.msra.mxu0 %v4864_v15 }
0x12bf   : > { %4866 = vmatprep.subr.bf16.mxu0 %v6228_v10 }
0x12c2   : > { %4868 = vmatpush3.bf16.msra.mxu0 %v4867_v56 }
0x12c3   : > { %4893 = vmatprep.subr.bf16.mxu0 %v6228_v10 }
0x1378   : > { %v3136_v58 = vpop.f32.mrb[16].mxu0 }
0x1379   : > { %v3137_v59 = vadd.f32 %v3136_v58, %v2902_v57  ;;  %v4690_v60 = vpop.f32.mrb[17].mxu0  ;;  %v4440_v57 = vld [vmem:[#allocation27] ss:$0 sm:$0xff] }
0x137b   : > { %v3140_v61 = vsub.f32 0.0, %v3137_v59 }
0x137d   : > { %v3141_v62 = vmul.f32 1.442695, %v3140_v61 }
0x137f   : > { %5299 = vpow2.f32 %v3141_v62 }
0x1389   : > { %v5300_v63 = vpop.eup %5299 }
0x138a   : > { %v3143_v2 = vadd.f32 1.0, %v5300_v63 }
0x138c   : > { %5301 = vrcp.f32 %v3143_v2 }
0x1396   : > { %v5302_v6 = vpop.eup %5301 }
0x1397   : > { %v3149_v7 = vrot.slane %v5302_v6, %v3148_v5 }
0x1399   : > { %v3150_v8 = vmul.f32 %v3149_v7, %v7093_v19  ;;  %v3183_v19 = vld [vmem:[#allocation25 + $0x10] sm:$0xff] }
0x139b   : > { %v7118_v1 = vadd.f32 %v3150_v8, %v6915_v0  ;;  %v4843_v0 = vpack.c.bf16 %v3184_v22, %v3183_v19 }
0x139d   : > { %v3154_v9 = vsel %vm1577_vm0, %v7118_v1, 0.0  ;;  %4844 = vmatpush3.bf16.msra.mxu1 %v4843_v0 }
0x139e   : > { %3155 = vadd.xlane.f32.xlu1 %v3154_v9  ;;  %4869 = vmatprep.subr.bf16.mxu1 %v6228_v10 }
0x142b   : > { %v3156_v13 = vpop.xlane.xlu1 %3155 }
0x142c   : > { %v3157_v14 = vmul.f32 0.03125, %v3156_v13 }
0x142e   : > { %v3158_v40 = vsub.f32 %v7118_v1, %v3157_v14 }
0x1430   : > { %v3159_v16 = vmul.f32 %v3158_v40, %v3158_v40 }
0x1432   : > { %v3160_v17 = vsel %vm1577_vm0, %v3159_v16, 0.0 }
0x1433   : > { %3161 = vadd.xlane.f32.xlu1 %v3160_v17 }
0x14c0   : > { %v3162_v23 = vpop.xlane.xlu1 %3161 }
0x14c1   : > { %v3163_v24 = vmul.f32 0.03125, %v3162_v23 }
0x14c3   : > { %v3164_v25 = vadd.f32 1e-05, %v3163_v24 }
0x14c5   : > { %5303 = vrsqrt.f32 %v3164_v25 }
0x14cf   : > { %v5304_v27 = vpop.eup %5303 }
0x14d0   : > { %v3166_v29 = vmul.f32 %v5304_v27, %v3158_v40 }
0x14d2   : > { %v3173_v31 = vmul.f32 %v4438_v28, %v3166_v29  ;;  %v3397_v29 = vld [vmem:[#allocation30] sm:$0xff] }
0x14d4   : > { %v3180_v32 = vadd.f32 %v4439_v30, %v3173_v31  ;;  %v3398_v30 = vld [vmem:[#allocation30 + $0x8] sm:$0xff] }
0x14d5   : > { %v4870_v31 = vpack.c.bf16 %v3398_v30, %v3397_v29  ;;  %v4446_v29 = vld [vmem:[#allocation39] ss:$0 sm:$0xff] }
0x14d6   : > { %4700 = vmatmul.mubr.msk.f32.vlgmr.msra.gmra.mrb[18].mxu1 %vm1577_vm0, %v3180_v32  ;;  %v3399_v32 = vld [vmem:[#allocation30 + $0x10] sm:$0xff] }
0x14d7   : > { %4745 = vmatprep.mubr.msk.f32.mxu1 %vm6229_vm1, %v6230_v18  ;;  %4871 = vmatpush3.bf16.msra.mxu1 %v4870_v31  ;;  %v4873_v34 = vpack.c.bf16 %v3400_v33, %v3399_v32  ;;  %v3683_v31 = vmul.f32 %v4446_v29, %v6942_v26  ;;  %v4447_v32 = vld [vmem:[#allocation40] ss:$0 sm:$0xff] }
0x14d8   : > { %4872 = vmatprep.subr.bf16.mxu1 %v6228_v10 }
0x14d9   : > { %v3684_v33 = vadd.f32 %v4447_v32, %v3683_v31 }
0x14db   : > { %4874 = vmatpush3.bf16.msra.mxu1 %v4873_v34  ;;  %v3408_v34 = vld [vmem:[#allocation37] sm:$0x1] }
0x14dc   : > { %4875 = vmatprep.subr.bf16.mxu1 %v6228_v10 }
0x14de   : > { %4746 = vmatmul.mubr.msk.f32.vlgmr.msra.gmra.mrb[20].mxu1 %vm1577_vm0, %v7084_v12 }
0x14df   : > { %4877 = vmatpush3.bf16.msra.mxu1 %v4876_v37  ;;  %4756 = vmatprep.mubr.msk.f32.mxu1 %vm6229_vm1, %v6230_v18 }
0x14e0   : > { %4878 = vmatprep.subr.bf16.mxu1 %v6228_v10 }
0x14e3   : > { %4880 = vmatpush3.bf16.msra.mxu1 %v4879_v41 }
0x14e4   : > { %4881 = vmatprep.subr.bf16.mxu1 %v6228_v10 }
0x15a9   : > { %v3261_v58 = vpop.f32.mrb[18].mxu1 }
0x15aa   : > { %v3262_v59 = vadd.f32 %v4440_v57, %v3261_v58  ;;  %v4701_v60 = vpop.f32.mrb[19].mxu1 }
0x15ac   : > { %v3265_v61 = vmul.f32 0.70710677, %v3262_v59  ;;  %v3289_v25 = vmul.f32 0.5, %v3262_v59 }
0x15ae   : > { %v3266_v62 = vand.u32 2147483647, %v3265_v61  ;;  %vm3286_vm4 = vcmp.ge.f32.partialorder %v3265_v61, 0.0 }
0x15b0   : > { %v3267_v63 = vmul.f32 0.3275911, %v3266_v62  ;;  %v3280_v3 = vsub.f32 0.0, %v3266_v62 }
0x15b1   : > { %v3475_v11 = vpop.f32.mrb[20].mxu1 }
0x15b2   : > { %v3268_v2 = vadd.f32 1.0, %v3267_v63  ;;  %v3281_v7 = vmul.f32 %v3280_v3, %v3266_v62  ;;  %v4747_v15 = vpop.f32.mrb[21].mxu1  ;;  %v3404_v3 = vld [vmem:[#allocation36] sm:$0xff] }
0x15b4   : > { %5305 = vrcp.f32 %v3268_v2  ;;  %v3282_v13 = vmul.f32 1.442695, %v3281_v7 }
0x15b6   : > { %5307 = vpow2.f32 %v3282_v13 }
0x15be   : > { %v5306_v6 = vpop.eup %5305 }
0x15bf   : > { %v3271_v8 = vmul.f32 1.0614054, %v5306_v6 }
0x15c0   : > { %v5308_v19 = vpop.eup %5307 }
0x15c1   : > { %v3272_v9 = vadd.f32 -1.4531521, %v3271_v8  ;;  %v3406_v8 = vld [vmem:[#allocation36 + $0x10] sm:$0xff] }
0x15c3   : > { %v3273_v14 = vmul.f32 %v5306_v6, %v3272_v9  ;;  %v3407_v9 = vld [vmem:[#allocation36 + $0x18] sm:$0xff] }
0x15c4   : > { %v4885_v13 = vpack.c.bf16 %v3407_v9, %v3406_v8 }
0x15c5   : > { %v3274_v40 = vadd.f32 1.4214138, %v3273_v14 }
0x15c7   : > { %v3275_v16 = vmul.f32 %v5306_v6, %v3274_v40 }
0x15c9   : > { %v3276_v17 = vadd.f32 -0.28449672, %v3275_v16 }
0x15cb   : > { %v3277_v20 = vmul.f32 %v5306_v6, %v3276_v17 }
0x15cd   : > { %v3278_v21 = vadd.f32 0.2548296, %v3277_v20  ;;  %v3402_v20 = vld [vmem:[#allocation33] sm:$0x1] }
0x15cf   : > { %v3279_v43 = vmul.f32 %v5306_v6, %v3278_v21  ;;  %v3405_v6 = vld [vmem:[#allocation36 + $0x8] sm:$0xff] }
0x15d0   : > { %v4882_v7 = vpack.c.bf16 %v3405_v6, %v3404_v3 }
0x15d1   : > { %v3284_v22 = vmul.f32 %v5308_v19, %v3279_v43  ;;  %v3403_v43 = vld [vmem:[#allocation34] sm:$0x1] }
0x15d3   : > { %v3285_v0 = vsub.f32 1.0, %v3284_v22  ;;  %v3689_v22 = vld [vmem:[#allocation42] sm:$0xff] }
0x15d5   : > { %v3287_v23 = vsub.f32 0.0, %v3285_v0 }
0x15d7   : > { %v3288_v24 = vsel %vm3286_vm4, %v3285_v0, %v3287_v23  ;;  %v3690_v0 = vld [vmem:[#allocation42 + $0x8] sm:$0xff] }
0x15d8   : > { %v3290_v27 = vadd.f32 1.0, %v3288_v24  ;;  %v4888_v24 = vpack.c.bf16 %v3690_v0, %v3689_v22 }
0x15da   : > { %v3291_v28 = vmul.f32 %v3290_v27, %v3289_v25  ;;  %v3691_v27 = vld [vmem:[#allocation42 + $0x10] sm:$0xff] }
0x15dc   : > { %4735 = vmatmul.mubr.f32.vlgmr.msra.gmra.mrb[18].mxu0 %v3291_v28  ;;  %v3692_v28 = vld [vmem:[#allocation42 + $0x18] sm:$0xff] }
0x15dd   : > { %4789 = vmatprep.mubr.msk.f32.mxu0 %vm6229_vm1, %v6230_v18  ;;  %v4891_v30 = vpack.c.bf16 %v3692_v28, %v3691_v27  ;;  %v4452_v27 = vld [vmem:[%s6435_s29] ss:$0 sm:$0xff] }
0x16af   : > { %v3381_v44 = vpop.f32.mrb[18].mxu0 }
0x16b0   : > { %v7167_v45 = vadd.f32 %v4442_v42, %v3381_v44  ;;  %v4736_v47 = vpop.f32.mrb[19].mxu0 }
0x16b2   : > { %v3385_v12 = vsel %vm1577_vm0, %v7167_v45, 0.0 }
0x16b3   : > { %v3386_v48 = vrot.slane %v3385_v12, 4 }
0x16b5   : > { %v3387_v49 = vadd.f32 %v3386_v48, %v3385_v12 }
0x16b7   : > { %v3388_v50 = vrot.slane %v3387_v49, 2 }
0x16b9   : > { %v3389_v51 = vadd.f32 %v3388_v50, %v3387_v49 }
0x16bb   : > { %v3390_v52 = vrot.slane %v3389_v51, 1 }
0x16bd   : > { %v3391_v53 = vadd.f32 %v3390_v52, %v3389_v51 }
0x16bf   : > { %v3392_v54 = vmul.f32 0.125, %v3391_v53 }
0x16c1   : > { %4757 = vmatmul.mubr.msk.f32.vlgmr.msra.gmra.mrb[22].mxu1 %vm1577_vm0, %v3392_v54 }
0x16c2   : > { %4767 = vmatprep.mubr.msk.f32.mxu1 %vm6229_vm1, %v6230_v18  ;;  %4883 = vmatpush3.bf16.msra.mxu1 %v4882_v7 }
0x16c3   : > { %4884 = vmatprep.subr.bf16.mxu1 %v6228_v10 }
0x16c6   : > { %4886 = vmatpush3.bf16.msra.mxu1 %v4885_v13 }
0x16c7   : > { %4887 = vmatprep.subr.bf16.mxu1 %v6228_v10 }
0x1794   : > { %v3548_v46 = vpop.f32.mrb[22].mxu1 }
0x1795   : > { %v3549_v56 = vadd.f32 %v3548_v46, %v3475_v11  ;;  %v4758_v57 = vpop.f32.mrb[23].mxu1 }
0x1797   : > { %v3552_v58 = vadd.f32 %v3549_v56, %v3401_v55 }
0x1799   : > { %v3553_v59 = vsel %vm3050_vm3, %v3552_v58, 0.0 }
0x179a   : > { %3554 = vadd.xlane.f32.xlu1 %v3553_v59 }
0x1827   : > { %v3555_v60 = vpop.xlane.xlu1 %3554 }
0x1828   : > { %v3556_v61 = vmul.f32 0.03125, %v3555_v60 }
0x182a   : > { %v3557_v62 = vsub.f32 %v3552_v58, %v3556_v61 }
0x182c   : > { %v3558_v63 = vmul.f32 %v3557_v62, %v3557_v62 }
0x182e   : > { %v3559_v2 = vsel %vm3050_vm3, %v3558_v63, 0.0 }
0x182f   : > { %3560 = vadd.xlane.f32.xlu1 %v3559_v2 }
0x18bc   : > { %v3561_v14 = vpop.xlane.xlu1 %3560 }
0x18bd   : > { %v3562_v40 = vmul.f32 0.03125, %v3561_v14 }
0x18bf   : > { %v3563_v16 = vadd.f32 1e-05, %v3562_v40  ;;  %v3877_v40 = vld [vmem:[%s6440_s24] sm:$0xff] }
0x18c1   : > { %5309 = vrsqrt.f32 %v3563_v16  ;;  %v3878_v16 = vld [vmem:[%s6440_s24 + $0x8] sm:$0xff] }
0x18cb   : > { %v5310_v17 = vpop.eup %5309 }
0x18cc   : > { %v3565_v21 = vmul.f32 %v5310_v17, %v3557_v62  ;;  %v4450_v62 = vld [vmem:[%s7423_s1] ss:$0 sm:$0xff]  ;;  %v4900_v17 = vpack.c.bf16 %v3878_v16, %v3877_v40  ;;  %s7425_s1 = sld [smem:[#allocation91_spill]] }
0x18ce   : > { %v3566_v19 = vmul.f32 %v3565_v21, %v3402_v20  ;;  %v3879_v20 = vld [vmem:[%s6440_s24 + $0x10] sm:$0xff]  ;;  %v3880_v21 = vld [vmem:[%s6440_s24 + $0x18] sm:$0xff] }
0x18d0   : > { %v3567_v23 = vadd.f32 %v3566_v19, %v3403_v43  ;;  %v4903_v43 = vpack.c.bf16 %v3880_v21, %v3879_v20 }
0x18d2   : > { %v3568_v25 = vmax.f32 %v3567_v23, 0.0  ;;  %v4453_v31 = vld [vmem:[%s7425_s1] ss:$0 sm:$0xff]  ;;  %s4456_s1 = sshll.u32 %s6473_s18, 7  ;;  %s6236_s18 = smov [#allocation43]  }
0x18d4   : > { %4768 = vmatmul.mubr.msk.f32.vlgmr.msra.gmra.mrb[24].mxu1 %vm1577_vm0, %v3568_v25 }
0x18d5   : > { %4889 = vmatpush3.bf16.msra.mxu1 %v4888_v24  ;;  %4778 = vmatprep.mubr.msk.f32.mxu1 %vm6229_vm1, %v6230_v18  ;;  %v4451_v24 = vld [vmem:[%s7424_s2] ss:$0 sm:$0xff]  ;;  %s7426_s2 = sld [smem:[#allocation92_spill]] }
0x18d6   : > { %4890 = vmatprep.subr.bf16.mxu1 %v6228_v10 }
0x18d9   : > { %4892 = vmatpush3.bf16.msra.mxu1 %v4891_v30 }
0x18da   : > { %4899 = vmatprep.subr.bf16.mxu1 %v6228_v10 }
0x18db   : > { %s7221_s13 = scalar_lea.hbm %s7426_s2, %s4456_s1 }
0x18dc   : > { %4779 = vmatmul.mubr.msk.f32.vlgmr.msra.gmra.mrb[26].mxu1 %vm1577_vm0, %v3684_v33 }
0x18dd   : > { %4800 = vmatprep.mubr.msk.f32.mxu1 %vm6229_vm1, %v6230_v18  ;;  %4901 = vmatpush3.bf16.msra.mxu1 %v4900_v17 }
0x18de   : > { %4902 = vmatprep.subr.bf16.mxu1 %v6228_v10 }
0x18e1   : > { %4904 = vmatpush3.bf16.msra.mxu1 %v4903_v43 }
0x19a7   : > { %v3638_v35 = vpop.f32.mrb[24].mxu1 }
0x19a8   : > { %v3639_v36 = vadd.f32 %v3638_v35, %v3408_v34  ;;  %v4769_v37 = vpop.f32.mrb[25].mxu1 }
0x19aa   : > { %v3642_v38 = vsub.f32 0.0, %v3639_v36 }
0x19ac   : > { %v3643_v39 = vmul.f32 1.442695, %v3642_v38 }
0x19ae   : > { %5311 = vpow2.f32 %v3643_v39 }
0x19af   : > { %v3762_v26 = vpop.f32.mrb[26].mxu1 }
0x19b0   : > { %v4780_v41 = vpop.f32.mrb[27].mxu1 }
0x19b1   : > { %v6235_v41 = vmov 0  }
0x19b2   : > { %5253 = vset.pattern.permute.xlu1 %v6235_v41 }
0x19b8   : > { %v5312_v42 = vpop.eup %5311 }
0x19b9   : > { %v3645_v44 = vadd.f32 1.0, %v5312_v42 }
0x19bb   : > { %5313 = vrcp.f32 %v3645_v44 }
0x19c5   : > { %v5314_v47 = vpop.eup %5313 }
0x19c6   : > { %v3651_v12 = vrot.slane %v5314_v47, %v3148_v5  ;;  %v3686_v5 = vld [vmem:[%s7422_s14 + $0x8] sm:$0xff] }
0x19c7   : > { %v4894_v11 = vpack.c.bf16 %v3686_v5, %v3685_v4 }
0x19c8   : > { %v3652_v18 = vmul.f32 %v3651_v12, %v7167_v45  ;;  %v3687_v45 = vld [vmem:[%s7422_s14 + $0x10] sm:$0xff] }
0x19c9   : > { %4895 = vmatpush3.bf16.msra.mxu0 %v4894_v11 }
0x19ca   : > { %v7191_v48 = vadd.f32 %v3652_v18, %v7118_v1  ;;  %v3688_v1 = vld [vmem:[%s7422_s14 + $0x18] sm:$0xff]  ;;  %4896 = vmatprep.subr.bf16.mxu0 %v6228_v10  ;;  %s3987_s14 = scalar_lea.sflag [#allocation4], %s6850_s16 }
0x19cb   : > { %v4897_v15 = vpack.c.bf16 %v3688_v1, %v3687_v45 }
0x19cc   : > { %v3656_v49 = vsel %vm1577_vm0, %v7191_v48, 0.0 }
0x19cd   : > { %3657 = vadd.xlane.f32.xlu0 %v3656_v49  ;;  %4898 = vmatpush3.bf16.msra.mxu0 %v4897_v15  ;;  %v5323_v49 = vld [vmem:[%s6856_s8] sm:$0xff]  ;;  %s6043_s8 = sshll.u32 %s6236_s18, 4  ;;  %s6044_s8 = int_to_ptr.vmem [resolvable:$false] %s6043_s8 }
0x19ce   : > { %s6045_s3 = scalar_lea.vmem %s6044_s8, 256  ;;  %p6046_p1 = scmp.lt.s32.totalorder %s7223_s12, %s6044_s8 }
0x19cf   : > { %p6047_p8 = scmp.lt.s32.totalorder %s6045_s3, %s6039_s15 }
0x19d1   : > { %p6048_p7 = por %p6047_p8, %p6046_p1 }
0x19d3   : > { %p6049_p9 = pnand %p6048_p7, %p6042_p13 }
0x1a5a   : > { %v3658_v50 = vpop.xlane.xlu0 %3657 }
0x1a5b   : > { %v3659_v51 = vmul.f32 0.03125, %v3658_v50 }
0x1a5d   : > { %v3660_v52 = vsub.f32 %v7191_v48, %v3659_v51 }
0x1a5f   : > { %v3661_v53 = vmul.f32 %v3660_v52, %v3660_v52 }
0x1a61   : > { %v3662_v54 = vsel %vm1577_vm0, %v3661_v53, 0.0 }
0x1a62   : > { %3663 = vadd.xlane.f32.xlu1 %v3662_v54 }
0x1aef   : > { %v3664_v46 = vpop.xlane.xlu1 %3663 }
0x1af0   : > { %v3665_v55 = vmul.f32 0.03125, %v3664_v46 }
0x1af2   : > { %v3666_v56 = vadd.f32 1e-05, %v3665_v55 }
0x1af4   : > { %5315 = vrsqrt.f32 %v3666_v56 }
0x1afe   : > { %v5316_v57 = vpop.eup %5315 }
0x1aff   : > { %v3668_v58 = vmul.f32 %v5316_v57, %v3660_v52 }
0x1b01   : > { %v3675_v59 = vmul.f32 %v4446_v29, %v3668_v58 }
0x1b03   : > { %v3682_v60 = vadd.f32 %v4447_v32, %v3675_v59 }
0x1b05   : > { %4790 = vmatmul.mubr.msk.f32.vlgmr.msra.gmra.mrb[20].mxu0 %vm1577_vm0, %v3682_v60 }
0x1bd8   : > { %v3835_v61 = vpop.f32.mrb[20].mxu0 }
0x1bd9   : > { %v3836_v63 = vadd.f32 %v3835_v61, %v3762_v26  ;;  %v4791_v2 = vpop.f32.mrb[21].mxu0  ;;  %v6234_v26 = vmov 1  }
0x1bda   : > { %5254 = vset.pattern.permute.xlu0 %v6234_v26 }
0x1bdb   : > { %v3846_v3 = vadd.f32 %v4450_v62, %v3836_v63 }
0x1bdd   : > { %v3849_v6 = vsel %vm1577_vm0, %v3846_v3, 0.0 }
0x1bde   : > { %3850 = vadd.xlane.f32.xlu1 %v3849_v6 }
0x1c6b   : > { %v3851_v7 = vpop.xlane.xlu1 %3850 }
0x1c6c   : > { %v3852_v8 = vmul.f32 0.03125, %v3851_v7 }
0x1c6e   : > { %v3853_v9 = vsub.f32 %v3846_v3, %v3852_v8 }
0x1c70   : > { %v3854_v13 = vmul.f32 %v3853_v9, %v3853_v9 }
0x1c72   : > { %v3855_v14 = vsel %vm1577_vm0, %v3854_v13, 0.0 }
0x1c73   : > { %3856 = vadd.xlane.f32.xlu1 %v3855_v14 }
0x1d00   : > { %v3857_v19 = vpop.xlane.xlu1 %3856 }
0x1d01   : > { %v3858_v22 = vmul.f32 0.03125, %v3857_v19 }
0x1d03   : > { %v3859_v0 = vadd.f32 1e-05, %v3858_v22 }
0x1d05   : > { %5317 = vrsqrt.f32 %v3859_v0 }
0x1d0f   : > { %v5318_v23 = vpop.eup %5317 }
0x1d10   : > { %v3861_v25 = vmul.f32 %v5318_v23, %v3853_v9 }
0x1d12   : > { %v3868_v28 = vmul.f32 %v4451_v24, %v3861_v25 }
0x1d14   : > { %v3875_v29 = vadd.f32 %v4452_v27, %v3868_v28 }
0x1d16   : > { %v3876_v30 = vmax.f32 %v3875_v29, 0.0 }
0x1d18   : > { %4801 = vmatmul.mubr.msk.f32.vlgmr.msra.gmra.mrb[28].mxu1 %vm1577_vm0, %v3876_v30 }
0x1deb   : > { %v3957_v32 = vpop.f32.mrb[28].mxu1 }
0x1dec   : > { %v3958_v33 = vadd.f32 %v4453_v31, %v3957_v32  ;;  %v4802_v34 = vpop.f32.mrb[29].mxu1 }
0x1dee   : > { %v3962_v10 = vsel %vm3961_vm5, %v3958_v33, -inf }
0x1def   : > { %3963 = vmax.xlane.f32.xlu1 %v3962_v10 }
0x1e7c   : > { %v3964_v35 = vpop.xlane.xlu1 %3963 }
0x1e7d   : > { %v3965_v36 = vsub.f32 %v3958_v33, %v3964_v35 }
0x1e7f   : > { %v3966_v37 = vmul.f32 1.442695, %v3965_v36 }
0x1e81   : > { %5319 = vpow2.f32 %v3966_v37 }
0x1e8b   : > { %v5320_v38 = vpop.eup %5319 }
0x1e8c   : > { %v3968_v39 = vsel %vm3961_vm5, %v5320_v38, 0.0 }
0x1e8d   : > { %3969 = vadd.xlane.f32.xlu1 %v3968_v39 }
0x1f1a   : > { %v3970_v42 = vpop.xlane.xlu1 %3969 }
0x1f1b   : > { %5321 = vrcp.f32 %v3970_v42 }
0x1f25   : > { %v5322_v44 = vpop.eup %5321 }
0x1f26   : > { %v3972_v47 = vmul.f32 %v5322_v44, %v5320_v38 }
0x1f28   : > { %3980 = vperm.xlu0 %5254, %v3972_v47   ;;  %3975 = vperm.xlu1 %5253, %v3972_v47  }
0x1fa7   : > { %v3981_v12 = vpop.permute.xlu0 %3980  ;;  %v3976_v18 = vpop.permute.xlu1 %3975 }
0x1fa8   : > { %v3983_v50 = vmul.f32 %v5323_v49, %v3981_v12  ;;  %v3978_v51 = vmul.f32 %v3976_v18, %v7191_v48 }
0x1faa   : > { %v3984_v52 = vadd.f32 %v3983_v50, %v3978_v51 }
0x1fac   : > { %3985 = vst.msk [vmem:[%s1573_s6] sm:$0xff] %vm1577_vm0, %v3984_v52 }
0x1fad   : > { %6052 = shalt.err (!%p6049_p9)
}
0x1fae   : > { %s6053_s16 = scalar_lea.hbm %s7221_s13, 128  ;;  %s6057_s6 = scalar_lea.hbm %s7426_s2, 256 }
0x1faf   : > { %p6054_p11 = scmp.ne.s32.totalorder %s7221_s13, %s6053_s16  ;;  %p6058_p3 = scmp.lt.u32.totalorder %s7221_s13, %s7426_s2 }
0x1fb0   : > { %p6059_p2 = scmp.lt.u32.totalorder %s6057_s6, %s6053_s16  ;;  %p6061_p0 = scmp.lt.u32.totalorder %s6053_s16, %s7221_s13 }
0x1fb1   : > { %p6055_p12 = pnand %p6054_p11, %p7428_p10 }
0x1fb2   : > { %p6060_p5 = por %p6059_p2, %p6058_p3 }
0x1fb3   : > { %p6056_p4 = pneg %p6055_p12 }
0x1fb4   : > { %p6062_p6 = por %p6061_p0, %p6060_p5 }
0x1fb6   : > { %p6063_p13 = pnand %p6062_p6, %p6056_p4 }
0x1fb8   : > { %6066 = shalt.err (!%p6063_p13)
}
0x1fb9   : > { %5007 = dma.vmem_to_hbm [thread:$0]  (%p7428_p10), %s7223_s12, 128, %s7221_s13, %s3987_s14  }
0x1fba PF: > { %s4012_s15 = sand.u32 1, %s6145_s7   ;;  %p7429_p1 = scmp.ne.s32.totalorder %s7383_s4, 0 }
0x1fbb   : > { %p7430_p8 = scmp.ge.s32.totalorder %s6157_s11, 2  ;;  %s4013_s1 = scalar_lea.sflag [#allocation4], %s4012_s15 }
0x1fbd   : > { %p5090_p7 = pnand %p7430_p8, %p7429_p1 }
0x1fbf   : > { %6140 = dma.done.wait (!%p5090_p7), %s4013_s1, 128  }
0x1fc0   : > { %6142 = vsyncadd (!%p5090_p7), %s4013_s1, 4294967168  ;;  %p109_p9 = scmp.ge.s32.totalorder %s6786_s23, 4   ;;  %s7431_s7 = smov %s6149_s0 }
0x1fc1   : > { %s7432_s0 = smov %s6153_s10  ;;  %s7433_s10 = smov %s6798_s5 }
0x1fc2   : > { %s7434_s11 = smov %s6786_s23  ;;  %111 = sbr.rel (!%p109_p9) target bundleno = 99 (0x63), region = 371 }
0x1fc9   :  { %4018 = vsyncpa [#allocation3], 1 }
0x1fca   :  { %4020 = vsyncpa [#allocation3 + $0x1], 1 }
0x1fcb   :  { %4021 = vsyncpa [#allocation8], 1 }
0x1fcc   :  { %4022 = vsyncpa [#allocation11], 1 }
0x1fcd   :  { %4023 = vsyncpa [#allocation14], 1 }
0x1fce   :  { %4024 = vsyncpa [#allocation17], 1 }
0x1fcf   :  { %4025 = vsyncpa [#allocation20], 1 }
0x1fd0   :  { %4026 = vsyncpa [#allocation23], 1 }
0x1fd1   :  { %4027 = vsyncpa [#allocation26], 1 }
0x1fd2   :  { %4028 = vsyncpa [#allocation29], 1 }
0x1fd3   :  { %4029 = vsyncpa [#allocation32], 1 }
0x1fd4   :  { %4030 = vsyncpa [#allocation35], 1 }
0x1fd5   :  { %4031 = vsyncpa [#allocation38], 1 }
0x1fd6   :  { %4032 = vsyncpa [#allocation41], 1 }
0x1fd7   :  { %4033 = vsyncpa [#allocation4], 1 }
0x1fd8   :  { %4035 = vsyncpa [#allocation4 + $0x1], 1 }
0x1fd9   :  { %4036 = vsyncpa [#allocation5], 1 }
0x1fda   :  { %4038 = vsyncpa [#allocation5 + $0x1], 1 }

</bundles_post_ra>
